<compile_context>
chip_gen: v7x
topology: tpu7x:2x2x1
jax: 0.10.0
libtpu: 0.0.40
codegen_flags: <defaults>
</compile_context>

<pallas_src>
import functools

import jax
import jax.numpy as jnp
import numpy as np
from jax.experimental import pallas as pl
from jax.experimental.pallas import tpu as pltpu

LANE = 128


def _round_up(x, m):
    return (x + m - 1) // m * m


# ----------------------------------------------------------------------------
# Fused kernel: 2 stacked LSTM layers (shared weights) over a time chunk,
# states persisted in VMEM scratch across chunks, + decoder epilogue per chunk.
# Gate order matches PyTorch: i, f, g, o; each gate is a lane-aligned Hp block.
# ----------------------------------------------------------------------------
def _deep_lstm_kernel(xproj_ref, wih_ref, whh_ref, b2_ref, wdec_ref, bdec_ref,
                      out_ref, h1_ref, c1_ref, h2_ref, c2_ref, last_h_ref):
    Tc, B, Hp4 = xproj_ref.shape
    Hp = Hp4 // 4
    last_b = B - 1                      # static index of the last batch element

    # zero initial states once (first chunk only); they persist across the grid
    @pl.when(pl.program_id(0) == 0)
    def _():
        h1_ref[...] = jnp.zeros_like(h1_ref)
        c1_ref[...] = jnp.zeros_like(c1_ref)
        h2_ref[...] = jnp.zeros_like(h2_ref)
        c2_ref[...] = jnp.zeros_like(c2_ref)

    # weights resident in VMEM for the whole chunk; bias broadcast hoisted
    wih = wih_ref[...]
    whh = whh_ref[...]
    b2 = jnp.broadcast_to(b2_ref[...].astype(jnp.float32), (B, Hp4))

    def gates_to_hc(g, c_prev):
        i_g = jax.nn.sigmoid(g[:, 0 * Hp:1 * Hp])
        f_g = jax.nn.sigmoid(g[:, 1 * Hp:2 * Hp])
        g_g = jnp.tanh(g[:, 2 * Hp:3 * Hp])
        o_g = jax.nn.sigmoid(g[:, 3 * Hp:4 * Hp])
        c_new = f_g * c_prev + i_g * g_g
        h_new = o_g * jnp.tanh(c_new)
        return h_new, c_new

    def body(t, carry):
        h1, c1, h2, c2 = carry
        # layer-1 pre-activation (embedding @ W_ih + bias) was precomputed: row gather only
        xg = xproj_ref[t].astype(jnp.float32)                       # (B, 4Hp)
        # fused recurrent matmul for BOTH layers: (2B, Hp) @ (Hp, 4Hp)
        h_stack = jnp.concatenate([h1, h2], axis=0).astype(whh.dtype)
        rec = jnp.dot(h_stack, whh, preferred_element_type=jnp.float32)  # (2B, 4Hp)
        # layer 1
        h1n, c1n = gates_to_hc(xg + rec[:B], c1)
        # layer 2 (same weights — the forward calls lstm_1 twice)
        g2 = (jnp.dot(h1n.astype(wih.dtype), wih, preferred_element_type=jnp.float32)
              + b2 + rec[B:])
        h2n, c2n = gates_to_hc(g2, c2)
        # keep only what the decoder consumes: layer-2 h of the last batch element
        last_h_ref[pl.ds(t, 1), :] = h2n[last_b:last_b + 1, :]
        return (h1n, c1n, h2n, c2n)

    init = (h1_ref[...], c1_ref[...], h2_ref[...], c2_ref[...])
    h1, c1, h2, c2 = jax.lax.fori_loop(0, Tc, body, init, unroll=min(Tc, 8))

    # states written back ONCE per chunk (persist to the next grid step)
    h1_ref[...] = h1
    c1_ref[...] = c1
    h2_ref[...] = h2
    c2_ref[...] = c2

    # decoder epilogue: (Tc, Hp) @ (Hp, Op) + bias — lane-dense output block
    out_ref[...] = (
        jnp.dot(last_h_ref[...].astype(wdec_ref.dtype), wdec_ref[...],
                preferred_element_type=jnp.float32)
        + bdec_ref[...].astype(jnp.float32)
    )


def _fused_call(xproj, wih_pad, whh_pad, b2_pad, wdec_pad, bdec_pad, time_chunk):
    S_pad, B, Hp4 = xproj.shape
    Hp = Hp4 // 4
    Op = wdec_pad.shape[1]
    n_chunks = S_pad // time_chunk
    return pl.pallas_call(
        _deep_lstm_kernel,
        out_shape=jax.ShapeDtypeStruct((S_pad, Op), jnp.float32),
        grid=(n_chunks,),
        in_specs=[
            pl.BlockSpec((time_chunk, B, Hp4), lambda c: (c, 0, 0)),   # streamed per chunk
            pl.BlockSpec((Hp, Hp4), lambda c: (0, 0)),                 # W_ih  (resident)
            pl.BlockSpec((Hp, Hp4), lambda c: (0, 0)),                 # W_hh  (resident)
            pl.BlockSpec((1, Hp4), lambda c: (0, 0)),                  # layer-2 bias
            pl.BlockSpec((Hp, Op), lambda c: (0, 0)),                  # W_dec
            pl.BlockSpec((1, Op), lambda c: (0, 0)),                   # b_dec
        ],
        out_specs=pl.BlockSpec((time_chunk, Op), lambda c: (c, 0)),
        scratch_shapes=[
            pltpu.VMEM((B, Hp), jnp.float32),            # h1 (persists across chunks)
            pltpu.VMEM((B, Hp), jnp.float32),            # c1
            pltpu.VMEM((B, Hp), jnp.float32),            # h2
            pltpu.VMEM((B, Hp), jnp.float32),            # c2
            pltpu.VMEM((time_chunk, Hp), jnp.float32),   # layer-2 h[last batch] per step
        ],
        compiler_params=pltpu.CompilerParams(
            dimension_semantics=("arbitrary",),          # time recurrence is sequential
            vmem_limit_bytes=32 * 1024 * 1024,
        ),
    )(xproj, wih_pad, whh_pad, b2_pad, wdec_pad, bdec_pad)


# ----------------------------------------------------------------------------
# One-time parameter preprocessing: fuse embedding with the layer-1 input
# projection (+ both biases) into a (V, 4*Hp) table, transpose weights,
# zero-pad hidden / output dims to the 128-lane width (gate-block aligned).
# Zero padding is provably inert: padded c,h stay exactly 0 through the
# recurrence (zero weight rows/cols, zero bias, zero initial state).
# ----------------------------------------------------------------------------
def prepare_params(params, param_dtype=jnp.float32):
    # param_dtype=jnp.bfloat16 is recommended for large hidden sizes on v6e/v7x
    # (halves resident weight VMEM + DMA bytes; gate math stays f32 in-kernel).
    w_ih = jnp.asarray(params["w_ih"], jnp.float32)    # (4H, H)
    w_hh = jnp.asarray(params["w_hh"], jnp.float32)    # (4H, H)
    b = jnp.asarray(params["b_ih"], jnp.float32) + jnp.asarray(params["b_hh"], jnp.float32)
    w_dec = jnp.asarray(params["w_dec"], jnp.float32)  # (O, H)
    b_dec = jnp.asarray(params["b_dec"], jnp.float32)  # (O,)
    emb = jnp.asarray(params["emb"], jnp.float32)      # (V, H)

    H = w_hh.shape[1]
    O = w_dec.shape[0]
    Hp = _round_up(H, LANE)
    Op = _round_up(O, LANE)

    def pad_gate_matrix(w):        # (4H, H_in) -> (Hp, 4*Hp), gate-block lane-aligned
        h_in = w.shape[1]
        wt = w.T.reshape(h_in, 4, H)
        wt = jnp.pad(wt, ((0, Hp - h_in), (0, 0), (0, Hp - H)))
        return wt.reshape(Hp, 4 * Hp)

    # Fused embedding + layer-1 input projection + bias  -> (V, 4*Hp) gather table.
    xproj = emb @ w_ih.T + b                                       # (V, 4H)
    V = xproj.shape[0]
    xproj_table = jnp.pad(xproj.reshape(V, 4, H),
                          ((0, 0), (0, 0), (0, Hp - H))).reshape(V, 4 * Hp)

    wih_pad = pad_gate_matrix(w_ih)                                # (Hp, 4*Hp) for layer 2
    whh_pad = pad_gate_matrix(w_hh)                                # (Hp, 4*Hp)
    b2_pad = jnp.pad(b.reshape(4, H), ((0, 0), (0, Hp - H))).reshape(1, 4 * Hp)

    wdec_pad = jnp.pad(w_dec.T, ((0, Hp - H), (0, Op - O)))        # (Hp, Op)
    bdec_pad = jnp.pad(b_dec, (0, Op - O)).reshape(1, Op)

    return {
        "xproj_table": xproj_table.astype(param_dtype),
        "wih_pad": wih_pad.astype(param_dtype),
        "whh_pad": whh_pad.astype(param_dtype),
        "b2_pad": b2_pad.astype(param_dtype),
        "wdec_pad": wdec_pad.astype(param_dtype),
        "bdec_pad": bdec_pad.astype(param_dtype),
        "O": int(O),        # Python int — kept STATIC (not traced under jit)
    }


# ----------------------------------------------------------------------------
# deep_LSTM forward (the `hidden` argument is ignored, matching the PyTorch
# forward which never passes it to lstm_1).
# ----------------------------------------------------------------------------
@functools.partial(jax.jit, static_argnames=("out_size", "time_chunk"))
def _forward_impl(arrays, x_ids, out_size, time_chunk):
    S, _ = x_ids.shape
    # Embedding + layer-1 input projection + bias == one row gather from the table.
    xproj = jnp.take(arrays["xproj_table"], x_ids, axis=0)        # (S, B, 4*Hp)
    S_pad = _round_up(max(S, 1), time_chunk)
    if S_pad != S:
        # Padded trailing steps never influence valid outputs (recurrence is causal)
        # and their output rows are sliced off below.
        xproj = jnp.pad(xproj, ((0, S_pad - S), (0, 0), (0, 0)))
    dec_pad = _fused_call(xproj, arrays["wih_pad"], arrays["whh_pad"],
                          arrays["b2_pad"], arrays["wdec_pad"], arrays["bdec_pad"],
                          time_chunk)                             # (S_pad, Op)
    return dec_pad[:S, :out_size]                                 # static slice sizes


def deep_lstm_forward(prep, x_ids, hidden=None, *, time_chunk=8):
    del hidden  # ignored, as in the PyTorch forward
    arrays = {k: v for k, v in prep.items() if k != "O"}
    return _forward_impl(arrays, x_ids, out_size=prep["O"], time_chunk=time_chunk)


# ----------------------------------------------------------------------------
# Pure-JAX reference for correctness check (unpadded params)
# ----------------------------------------------------------------------------
def _ref_lstm(x, w_ih, w_hh, b_ih, b_hh):
    _, B, _ = x.shape
    H = w_hh.shape[1]

    def step(carry, x_t):
        h, c = carry
        gates = x_t @ w_ih.T + b_ih + h @ w_hh.T + b_hh
        i = jax.nn.sigmoid(gates[:, :H])
        f = jax.nn.sigmoid(gates[:, H:2 * H])
        g = jnp.tanh(gates[:, 2 * H:3 * H])
        o = jax.nn.sigmoid(gates[:, 3 * H:])
        c = f * c + i * g
        h = o * jnp.tanh(c)
        return (h, c), h

    init = (jnp.zeros((B, H), jnp.float32), jnp.zeros((B, H), jnp.float32))
    _, hs = jax.lax.scan(step, init, x)
    return hs


def _ref_forward(params, x_ids):
    emb = jnp.take(params["emb"], x_ids, axis=0)
    out = _ref_lstm(emb, params["w_ih"], params["w_hh"], params["b_ih"], params["b_hh"])
    out = _ref_lstm(out, params["w_ih"], params["w_hh"], params["b_ih"], params["b_hh"])
    last = out[:, -1, :]
    return last @ params["w_dec"].T + params["b_dec"]


if __name__ == "__main__":
    # Small, forward-consistent sizes (seq > time_chunk exercises the chunked grid).
    input_size = 16     # vocab size (Embedding num_embeddings == input_size)
    hidden_size = 32
    output_size = 8
    seq_len = 16
    batch = 2

    key = jax.random.PRNGKey(0)
    ks = jax.random.split(key, 8)
    scale = 1.0 / np.sqrt(hidden_size)
    params = {
        "emb":   jax.random.normal(ks[0], (input_size, hidden_size), jnp.float32),
        "w_ih":  jax.random.uniform(ks[1], (4 * hidden_size, hidden_size), jnp.float32, -scale, scale),
        "w_hh":  jax.random.uniform(ks[2], (4 * hidden_size, hidden_size), jnp.float32, -scale, scale),
        "b_ih":  jax.random.uniform(ks[3], (4 * hidden_size,), jnp.float32, -scale, scale),
        "b_hh":  jax.random.uniform(ks[4], (4 * hidden_size,), jnp.float32, -scale, scale),
        "w_dec": jax.random.uniform(ks[5], (output_size, hidden_size), jnp.float32, -scale, scale),
        "b_dec": jax.random.uniform(ks[6], (output_size,), jnp.float32, -scale, scale),
    }

    x_ids = jax.random.randint(ks[7], (seq_len, batch), 0, input_size)   # (seq, batch) ids

    prep = prepare_params(params)                  # one-time preprocessing (hoisted)

    decoded = deep_lstm_forward(prep, x_ids)
    decoded = jax.block_until_ready(decoded)

    ref = jax.block_until_ready(_ref_forward(params, x_ids))
    assert decoded.shape == (seq_len, output_size)
    np.testing.assert_allclose(np.asarray(decoded), np.asarray(ref), rtol=1e-3, atol=1e-3)

    print("KERNEL_OK")
</pallas_src>

<mosaic_0001>
module attributes {stable_mosaic.version = 11 : i64} {
  func.func @_deep_lstm_kernel(%arg0: i32, %arg1: memref<8x2x512xf32, #tpu.memory_space<vmem>>, %arg2: memref<128x512xf32, #tpu.memory_space<vmem>>, %arg3: memref<128x512xf32, #tpu.memory_space<vmem>>, %arg4: memref<1x512xf32, #tpu.memory_space<vmem>>, %arg5: memref<128x128xf32, #tpu.memory_space<vmem>>, %arg6: memref<1x128xf32, #tpu.memory_space<vmem>>, %arg7: memref<8x128xf32, #tpu.memory_space<vmem>>, %arg8: memref<2x128xf32, #tpu.memory_space<vmem>>, %arg9: memref<2x128xf32, #tpu.memory_space<vmem>>, %arg10: memref<2x128xf32, #tpu.memory_space<vmem>>, %arg11: memref<2x128xf32, #tpu.memory_space<vmem>>, %arg12: memref<8x128xf32, #tpu.memory_space<vmem>>) attributes {dimension_semantics = [#tpu.dimension_semantics<arbitrary>], iteration_bounds = array<i64: 2>, scalar_prefetch = 0 : i64, scratch_operands = 5 : i64, tpu.core_type = #tpu.core_type<tc>, window_params = [{transform_indices = @transform_0, window_bounds = array<i64: 8, 2, 512>}, {pipeline_mode = #tpu.pipeline_mode<synchronous>, transform_indices = @transform_1, window_bounds = array<i64: 128, 512>}, {pipeline_mode = #tpu.pipeline_mode<synchronous>, transform_indices = @transform_2, window_bounds = array<i64: 128, 512>}, {pipeline_mode = #tpu.pipeline_mode<synchronous>, transform_indices = @transform_3, window_bounds = array<i64: 1, 512>}, {pipeline_mode = #tpu.pipeline_mode<synchronous>, transform_indices = @transform_4, window_bounds = array<i64: 128, 128>}, {pipeline_mode = #tpu.pipeline_mode<synchronous>, transform_indices = @transform_5, window_bounds = array<i64: 1, 128>}, {transform_indices = @transform_6, window_bounds = array<i64: 8, 128>}]} {
    %c0_i32 = arith.constant 0 : i32
    %0 = arith.cmpi eq, %arg0, %c0_i32 : i32
    %1 = arith.extui %0 : i1 to i32
    %c0_i32_0 = arith.constant 0 : i32
    %2 = arith.cmpi ne, %1, %c0_i32_0 : i32
    scf.if %2 {
      %cst_119 = arith.constant 0.000000e+00 : f32
      %535 = vector.broadcast %cst_119 : f32 to vector<2x128xf32>
      %c0_120 = arith.constant 0 : index
      %c0_121 = arith.constant 0 : index
      %536 = vector.load %arg8[%c0_120, %c0_121] : memref<2x128xf32, #tpu.memory_space<vmem>>, vector<2x128xf32>
      tpu.vector_store %arg8[%c0_120, %c0_121], %535 {strides = array<i32>} : memref<2x128xf32, #tpu.memory_space<vmem>>, vector<2x128xf32>,
      %cst_122 = arith.constant 0.000000e+00 : f32
      %537 = vector.broadcast %cst_122 : f32 to vector<2x128xf32>
      %c0_123 = arith.constant 0 : index
      %c0_124 = arith.constant 0 : index
      %538 = vector.load %arg9[%c0_123, %c0_124] : memref<2x128xf32, #tpu.memory_space<vmem>>, vector<2x128xf32>
      tpu.vector_store %arg9[%c0_123, %c0_124], %537 {strides = array<i32>} : memref<2x128xf32, #tpu.memory_space<vmem>>, vector<2x128xf32>,
      %cst_125 = arith.constant 0.000000e+00 : f32
      %539 = vector.broadcast %cst_125 : f32 to vector<2x128xf32>
      %c0_126 = arith.constant 0 : index
      %c0_127 = arith.constant 0 : index
      %540 = vector.load %arg10[%c0_126, %c0_127] : memref<2x128xf32, #tpu.memory_space<vmem>>, vector<2x128xf32>
      tpu.vector_store %arg10[%c0_126, %c0_127], %539 {strides = array<i32>} : memref<2x128xf32, #tpu.memory_space<vmem>>, vector<2x128xf32>,
      %cst_128 = arith.constant 0.000000e+00 : f32
      %541 = vector.broadcast %cst_128 : f32 to vector<2x128xf32>
      %c0_129 = arith.constant 0 : index
      %c0_130 = arith.constant 0 : index
      %542 = vector.load %arg11[%c0_129, %c0_130] : memref<2x128xf32, #tpu.memory_space<vmem>>, vector<2x128xf32>
      tpu.vector_store %arg11[%c0_129, %c0_130], %541 {strides = array<i32>} : memref<2x128xf32, #tpu.memory_space<vmem>>, vector<2x128xf32>,
    } else {
    }
    %c0 = arith.constant 0 : index
    %c0_1 = arith.constant 0 : index
    %3 = vector.load %arg2[%c0, %c0_1] : memref<128x512xf32, #tpu.memory_space<vmem>>, vector<128x512xf32>
    %c0_2 = arith.constant 0 : index
    %c0_3 = arith.constant 0 : index
    %4 = vector.load %arg3[%c0_2, %c0_3] : memref<128x512xf32, #tpu.memory_space<vmem>>, vector<128x512xf32>
    %c0_4 = arith.constant 0 : index
    %c0_5 = arith.constant 0 : index
    %5 = vector.load %arg4[%c0_4, %c0_5] : memref<1x512xf32, #tpu.memory_space<vmem>>, vector<1x512xf32>
    %6 = vector.shape_cast %5 : vector<1x512xf32> to vector<1x512xf32>
    %7 = vector.broadcast %6 : vector<1x512xf32> to vector<2x512xf32>
    %c0_6 = arith.constant 0 : index
    %c0_7 = arith.constant 0 : index
    %8 = vector.load %arg8[%c0_6, %c0_7] : memref<2x128xf32, #tpu.memory_space<vmem>>, vector<2x128xf32>
    %c0_8 = arith.constant 0 : index
    %c0_9 = arith.constant 0 : index
    %9 = vector.load %arg9[%c0_8, %c0_9] : memref<2x128xf32, #tpu.memory_space<vmem>>, vector<2x128xf32>
    %c0_10 = arith.constant 0 : index
    %c0_11 = arith.constant 0 : index
    %10 = vector.load %arg10[%c0_10, %c0_11] : memref<2x128xf32, #tpu.memory_space<vmem>>, vector<2x128xf32>
    %c0_12 = arith.constant 0 : index
    %c0_13 = arith.constant 0 : index
    %11 = vector.load %arg11[%c0_12, %c0_13] : memref<2x128xf32, #tpu.memory_space<vmem>>, vector<2x128xf32>
    %c0_i32_14 = arith.constant 0 : i32
    %12 = arith.index_cast %c0_i32_14 : i32 to index
    %c0_15 = arith.constant 0 : index
    %c0_16 = arith.constant 0 : index
    %13 = vector.load %arg1[%12, %c0_15, %c0_16] : memref<8x2x512xf32, #tpu.memory_space<vmem>>, vector<1x2x512xf32>
    %14 = vector.shape_cast %13 : vector<1x2x512xf32> to vector<2x512xf32>
    %15 = tpu.concatenate %8, %10 in 0 : vector<2x128xf32>, vector<2x128xf32> -> vector<4x128xf32>
    %cst = arith.constant dense<0.000000e+00> : vector<4x512xf32>
    %16 = tpu.matmul %15, %4, %cst {dimension_numbers = #tpu.dot_dimension_numbers<[1], [0], [0], [1], [0, 0, 1, 1], [], []>} : vector<4x128xf32>, vector<128x512xf32>, vector<4x512xf32> -> vector<4x512xf32>
    %17 = vector.extract_strided_slice %16 {offsets = [0, 0], sizes = [2, 512], strides = [1, 1]} : vector<4x512xf32> to vector<2x512xf32>
    %18 = arith.addf %14, %17 : vector<2x512xf32>
    %19 = vector.extract_strided_slice %18 {offsets = [0, 0], sizes = [2, 128], strides = [1, 1]} : vector<2x512xf32> to vector<2x128xf32>
    %20 = arith.negf %19 : vector<2x128xf32>
    %21 = math.exp %20 : vector<2x128xf32>
    %cst_17 = arith.constant 1.000000e+00 : f32
    %22 = vector.broadcast %cst_17 : f32 to vector<2x128xf32>
    %23 = arith.addf %22, %21 : vector<2x128xf32>
    %24 = arith.divf %22, %23 : vector<2x128xf32>
    %25 = vector.extract_strided_slice %18 {offsets = [0, 128], sizes = [2, 128], strides = [1, 1]} : vector<2x512xf32> to vector<2x128xf32>
    %26 = arith.negf %25 : vector<2x128xf32>
    %27 = math.exp %26 : vector<2x128xf32>
    %cst_18 = arith.constant 1.000000e+00 : f32
    %28 = vector.broadcast %cst_18 : f32 to vector<2x128xf32>
    %29 = arith.addf %28, %27 : vector<2x128xf32>
    %30 = arith.divf %28, %29 : vector<2x128xf32>
    %31 = vector.extract_strided_slice %18 {offsets = [0, 256], sizes = [2, 128], strides = [1, 1]} : vector<2x512xf32> to vector<2x128xf32>
    %32 = math.tanh %31 : vector<2x128xf32>
    %33 = vector.extract_strided_slice %18 {offsets = [0, 384], sizes = [2, 128], strides = [1, 1]} : vector<2x512xf32> to vector<2x128xf32>
    %34 = arith.negf %33 : vector<2x128xf32>
    %35 = math.exp %34 : vector<2x128xf32>
    %cst_19 = arith.constant 1.000000e+00 : f32
    %36 = vector.broadcast %cst_19 : f32 to vector<2x128xf32>
    %37 = arith.addf %36, %35 : vector<2x128xf32>
    %38 = arith.divf %36, %37 : vector<2x128xf32>
    %39 = arith.mulf %30, %9 : vector<2x128xf32>
    %40 = arith.mulf %24, %32 : vector<2x128xf32>
    %41 = arith.addf %39, %40 : vector<2x128xf32>
    %42 = math.tanh %41 : vector<2x128xf32>
    %43 = arith.mulf %38, %42 : vector<2x128xf32>
    %cst_20 = arith.constant dense<0.000000e+00> : vector<2x512xf32>
    %44 = tpu.matmul %43, %3, %cst_20 {dimension_numbers = #tpu.dot_dimension_numbers<[1], [0], [0], [1], [0, 0, 1, 1], [], []>} : vector<2x128xf32>, vector<128x512xf32>, vector<2x512xf32> -> vector<2x512xf32>
    %45 = arith.addf %44, %7 : vector<2x512xf32>
    %46 = vector.extract_strided_slice %16 {offsets = [2, 0], sizes = [2, 512], strides = [1, 1]} : vector<4x512xf32> to vector<2x512xf32>
    %47 = arith.addf %45, %46 : vector<2x512xf32>
    %48 = vector.extract_strided_slice %47 {offsets = [0, 0], sizes = [2, 128], strides = [1, 1]} : vector<2x512xf32> to vector<2x128xf32>
    %49 = arith.negf %48 : vector<2x128xf32>
    %50 = math.exp %49 : vector<2x128xf32>
    %cst_21 = arith.constant 1.000000e+00 : f32
    %51 = vector.broadcast %cst_21 : f32 to vector<2x128xf32>
    %52 = arith.addf %51, %50 : vector<2x128xf32>
    %53 = arith.divf %51, %52 : vector<2x128xf32>
    %54 = vector.extract_strided_slice %47 {offsets = [0, 128], sizes = [2, 128], strides = [1, 1]} : vector<2x512xf32> to vector<2x128xf32>
    %55 = arith.negf %54 : vector<2x128xf32>
    %56 = math.exp %55 : vector<2x128xf32>
    %cst_22 = arith.constant 1.000000e+00 : f32
    %57 = vector.broadcast %cst_22 : f32 to vector<2x128xf32>
    %58 = arith.addf %57, %56 : vector<2x128xf32>
    %59 = arith.divf %57, %58 : vector<2x128xf32>
    %60 = vector.extract_strided_slice %47 {offsets = [0, 256], sizes = [2, 128], strides = [1, 1]} : vector<2x512xf32> to vector<2x128xf32>
    %61 = math.tanh %60 : vector<2x128xf32>
    %62 = vector.extract_strided_slice %47 {offsets = [0, 384], sizes = [2, 128], strides = [1, 1]} : vector<2x512xf32> to vector<2x128xf32>
    %63 = arith.negf %62 : vector<2x128xf32>
    %64 = math.exp %63 : vector<2x128xf32>
    %cst_23 = arith.constant 1.000000e+00 : f32
    %65 = vector.broadcast %cst_23 : f32 to vector<2x128xf32>
    %66 = arith.addf %65, %64 : vector<2x128xf32>
    %67 = arith.divf %65, %66 : vector<2x128xf32>
    %68 = arith.mulf %59, %11 : vector<2x128xf32>
    %69 = arith.mulf %53, %61 : vector<2x128xf32>
    %70 = arith.addf %68, %69 : vector<2x128xf32>
    %71 = math.tanh %70 : vector<2x128xf32>
    %72 = arith.mulf %67, %71 : vector<2x128xf32>
    %73 = vector.extract_strided_slice %72 {offsets = [1, 0], sizes = [1, 128], strides = [1, 1]} : vector<2x128xf32> to vector<1x128xf32>
    %74 = arith.index_cast %c0_i32_14 : i32 to index
    %c0_24 = arith.constant 0 : index
    %75 = vector.load %arg12[%74, %c0_24] : memref<8x128xf32, #tpu.memory_space<vmem>>, vector<1x128xf32>
    tpu.vector_store %arg12[%74, %c0_24], %73 {strides = array<i32>} : memref<8x128xf32, #tpu.memory_space<vmem>>, vector<1x128xf32>,
    %c1_i32 = arith.constant 1 : i32
    %76 = arith.index_cast %c1_i32 : i32 to index
    %c0_25 = arith.constant 0 : index
    %c0_26 = arith.constant 0 : index
    %77 = vector.load %arg1[%76, %c0_25, %c0_26] : memref<8x2x512xf32, #tpu.memory_space<vmem>>, vector<1x2x512xf32>
    %78 = vector.shape_cast %77 : vector<1x2x512xf32> to vector<2x512xf32>
    %79 = tpu.concatenate %43, %72 in 0 : vector<2x128xf32>, vector<2x128xf32> -> vector<4x128xf32>
    %cst_27 = arith.constant dense<0.000000e+00> : vector<4x512xf32>
    %80 = tpu.matmul %79, %4, %cst_27 {dimension_numbers = #tpu.dot_dimension_numbers<[1], [0], [0], [1], [0, 0, 1, 1], [], []>} : vector<4x128xf32>, vector<128x512xf32>, vector<4x512xf32> -> vector<4x512xf32>
    %81 = vector.extract_strided_slice %80 {offsets = [0, 0], sizes = [2, 512], strides = [1, 1]} : vector<4x512xf32> to vector<2x512xf32>
    %82 = arith.addf %78, %81 : vector<2x512xf32>
    %83 = vector.extract_strided_slice %82 {offsets = [0, 0], sizes = [2, 128], strides = [1, 1]} : vector<2x512xf32> to vector<2x128xf32>
    %84 = arith.negf %83 : vector<2x128xf32>
    %85 = math.exp %84 : vector<2x128xf32>
    %cst_28 = arith.constant 1.000000e+00 : f32
    %86 = vector.broadcast %cst_28 : f32 to vector<2x128xf32>
    %87 = arith.addf %86, %85 : vector<2x128xf32>
    %88 = arith.divf %86, %87 : vector<2x128xf32>
    %89 = vector.extract_strided_slice %82 {offsets = [0, 128], sizes = [2, 128], strides = [1, 1]} : vector<2x512xf32> to vector<2x128xf32>
    %90 = arith.negf %89 : vector<2x128xf32>
    %91 = math.exp %90 : vector<2x128xf32>
    %cst_29 = arith.constant 1.000000e+00 : f32
    %92 = vector.broadcast %cst_29 : f32 to vector<2x128xf32>
    %93 = arith.addf %92, %91 : vector<2x128xf32>
    %94 = arith.divf %92, %93 : vector<2x128xf32>
    %95 = vector.extract_strided_slice %82 {offsets = [0, 256], sizes = [2, 128], strides = [1, 1]} : vector<2x512xf32> to vector<2x128xf32>
    %96 = math.tanh %95 : vector<2x128xf32>
    %97 = vector.extract_strided_slice %82 {offsets = [0, 384], sizes = [2, 128], strides = [1, 1]} : vector<2x512xf32> to vector<2x128xf32>
    %98 = arith.negf %97 : vector<2x128xf32>
    %99 = math.exp %98 : vector<2x128xf32>
    %cst_30 = arith.constant 1.000000e+00 : f32
    %100 = vector.broadcast %cst_30 : f32 to vector<2x128xf32>
    %101 = arith.addf %100, %99 : vector<2x128xf32>
    %102 = arith.divf %100, %101 : vector<2x128xf32>
    %103 = arith.mulf %94, %41 : vector<2x128xf32>
    %104 = arith.mulf %88, %96 : vector<2x128xf32>
    %105 = arith.addf %103, %104 : vector<2x128xf32>
    %106 = math.tanh %105 : vector<2x128xf32>
    %107 = arith.mulf %102, %106 : vector<2x128xf32>
    %cst_31 = arith.constant dense<0.000000e+00> : vector<2x512xf32>
    %108 = tpu.matmul %107, %3, %cst_31 {dimension_numbers = #tpu.dot_dimension_numbers<[1], [0], [0], [1], [0, 0, 1, 1], [], []>} : vector<2x128xf32>, vector<128x512xf32>, vector<2x512xf32> -> vector<2x512xf32>
    %109 = arith.addf %108, %7 : vector<2x512xf32>
    %110 = vector.extract_strided_slice %80 {offsets = [2, 0], sizes = [2, 512], strides = [1, 1]} : vector<4x512xf32> to vector<2x512xf32>
    %111 = arith.addf %109, %110 : vector<2x512xf32>
    %112 = vector.extract_strided_slice %111 {offsets = [0, 0], sizes = [2, 128], strides = [1, 1]} : vector<2x512xf32> to vector<2x128xf32>
    %113 = arith.negf %112 : vector<2x128xf32>
    %114 = math.exp %113 : vector<2x128xf32>
    %cst_32 = arith.constant 1.000000e+00 : f32
    %115 = vector.broadcast %cst_32 : f32 to vector<2x128xf32>
    %116 = arith.addf %115, %114 : vector<2x128xf32>
    %117 = arith.divf %115, %116 : vector<2x128xf32>
    %118 = vector.extract_strided_slice %111 {offsets = [0, 128], sizes = [2, 128], strides = [1, 1]} : vector<2x512xf32> to vector<2x128xf32>
    %119 = arith.negf %118 : vector<2x128xf32>
    %120 = math.exp %119 : vector<2x128xf32>
    %cst_33 = arith.constant 1.000000e+00 : f32
    %121 = vector.broadcast %cst_33 : f32 to vector<2x128xf32>
    %122 = arith.addf %121, %120 : vector<2x128xf32>
    %123 = arith.divf %121, %122 : vector<2x128xf32>
    %124 = vector.extract_strided_slice %111 {offsets = [0, 256], sizes = [2, 128], strides = [1, 1]} : vector<2x512xf32> to vector<2x128xf32>
    %125 = math.tanh %124 : vector<2x128xf32>
    %126 = vector.extract_strided_slice %111 {offsets = [0, 384], sizes = [2, 128], strides = [1, 1]} : vector<2x512xf32> to vector<2x128xf32>
    %127 = arith.negf %126 : vector<2x128xf32>
    %128 = math.exp %127 : vector<2x128xf32>
    %cst_34 = arith.constant 1.000000e+00 : f32
    %129 = vector.broadcast %cst_34 : f32 to vector<2x128xf32>
    %130 = arith.addf %129, %128 : vector<2x128xf32>
    %131 = arith.divf %129, %130 : vector<2x128xf32>
    %132 = arith.mulf %123, %70 : vector<2x128xf32>
    %133 = arith.mulf %117, %125 : vector<2x128xf32>
    %134 = arith.addf %132, %133 : vector<2x128xf32>
    %135 = math.tanh %134 : vector<2x128xf32>
    %136 = arith.mulf %131, %135 : vector<2x128xf32>
    %137 = vector.extract_strided_slice %136 {offsets = [1, 0], sizes = [1, 128], strides = [1, 1]} : vector<2x128xf32> to vector<1x128xf32>
    %138 = arith.index_cast %c1_i32 : i32 to index
    %c0_35 = arith.constant 0 : index
    %139 = vector.load %arg12[%138, %c0_35] : memref<8x128xf32, #tpu.memory_space<vmem>>, vector<1x128xf32>
    tpu.vector_store %arg12[%138, %c0_35], %137 {strides = array<i32>} : memref<8x128xf32, #tpu.memory_space<vmem>>, vector<1x128xf32>,
    %c2_i32 = arith.constant 2 : i32
    %140 = arith.index_cast %c2_i32 : i32 to index
    %c0_36 = arith.constant 0 : index
    %c0_37 = arith.constant 0 : index
    %141 = vector.load %arg1[%140, %c0_36, %c0_37] : memref<8x2x512xf32, #tpu.memory_space<vmem>>, vector<1x2x512xf32>
    %142 = vector.shape_cast %141 : vector<1x2x512xf32> to vector<2x512xf32>
    %143 = tpu.concatenate %107, %136 in 0 : vector<2x128xf32>, vector<2x128xf32> -> vector<4x128xf32>
    %cst_38 = arith.constant dense<0.000000e+00> : vector<4x512xf32>
    %144 = tpu.matmul %143, %4, %cst_38 {dimension_numbers = #tpu.dot_dimension_numbers<[1], [0], [0], [1], [0, 0, 1, 1], [], []>} : vector<4x128xf32>, vector<128x512xf32>, vector<4x512xf32> -> vector<4x512xf32>
    %145 = vector.extract_strided_slice %144 {offsets = [0, 0], sizes = [2, 512], strides = [1, 1]} : vector<4x512xf32> to vector<2x512xf32>
    %146 = arith.addf %142, %145 : vector<2x512xf32>
    %147 = vector.extract_strided_slice %146 {offsets = [0, 0], sizes = [2, 128], strides = [1, 1]} : vector<2x512xf32> to vector<2x128xf32>
    %148 = arith.negf %147 : vector<2x128xf32>
    %149 = math.exp %148 : vector<2x128xf32>
    %cst_39 = arith.constant 1.000000e+00 : f32
    %150 = vector.broadcast %cst_39 : f32 to vector<2x128xf32>
    %151 = arith.addf %150, %149 : vector<2x128xf32>
    %152 = arith.divf %150, %151 : vector<2x128xf32>
    %153 = vector.extract_strided_slice %146 {offsets = [0, 128], sizes = [2, 128], strides = [1, 1]} : vector<2x512xf32> to vector<2x128xf32>
    %154 = arith.negf %153 : vector<2x128xf32>
    %155 = math.exp %154 : vector<2x128xf32>
    %cst_40 = arith.constant 1.000000e+00 : f32
    %156 = vector.broadcast %cst_40 : f32 to vector<2x128xf32>
    %157 = arith.addf %156, %155 : vector<2x128xf32>
    %158 = arith.divf %156, %157 : vector<2x128xf32>
    %159 = vector.extract_strided_slice %146 {offsets = [0, 256], sizes = [2, 128], strides = [1, 1]} : vector<2x512xf32> to vector<2x128xf32>
    %160 = math.tanh %159 : vector<2x128xf32>
    %161 = vector.extract_strided_slice %146 {offsets = [0, 384], sizes = [2, 128], strides = [1, 1]} : vector<2x512xf32> to vector<2x128xf32>
    %162 = arith.negf %161 : vector<2x128xf32>
    %163 = math.exp %162 : vector<2x128xf32>
    %cst_41 = arith.constant 1.000000e+00 : f32
    %164 = vector.broadcast %cst_41 : f32 to vector<2x128xf32>
    %165 = arith.addf %164, %163 : vector<2x128xf32>
    %166 = arith.divf %164, %165 : vector<2x128xf32>
    %167 = arith.mulf %158, %105 : vector<2x128xf32>
    %168 = arith.mulf %152, %160 : vector<2x128xf32>
    %169 = arith.addf %167, %168 : vector<2x128xf32>
    %170 = math.tanh %169 : vector<2x128xf32>
    %171 = arith.mulf %166, %170 : vector<2x128xf32>
    %cst_42 = arith.constant dense<0.000000e+00> : vector<2x512xf32>
    %172 = tpu.matmul %171, %3, %cst_42 {dimension_numbers = #tpu.dot_dimension_numbers<[1], [0], [0], [1], [0, 0, 1, 1], [], []>} : vector<2x128xf32>, vector<128x512xf32>, vector<2x512xf32> -> vector<2x512xf32>
    %173 = arith.addf %172, %7 : vector<2x512xf32>
    %174 = vector.extract_strided_slice %144 {offsets = [2, 0], sizes = [2, 512], strides = [1, 1]} : vector<4x512xf32> to vector<2x512xf32>
    %175 = arith.addf %173, %174 : vector<2x512xf32>
    %176 = vector.extract_strided_slice %175 {offsets = [0, 0], sizes = [2, 128], strides = [1, 1]} : vector<2x512xf32> to vector<2x128xf32>
    %177 = arith.negf %176 : vector<2x128xf32>
    %178 = math.exp %177 : vector<2x128xf32>
    %cst_43 = arith.constant 1.000000e+00 : f32
    %179 = vector.broadcast %cst_43 : f32 to vector<2x128xf32>
    %180 = arith.addf %179, %178 : vector<2x128xf32>
    %181 = arith.divf %179, %180 : vector<2x128xf32>
    %182 = vector.extract_strided_slice %175 {offsets = [0, 128], sizes = [2, 128], strides = [1, 1]} : vector<2x512xf32> to vector<2x128xf32>
    %183 = arith.negf %182 : vector<2x128xf32>
    %184 = math.exp %183 : vector<2x128xf32>
    %cst_44 = arith.constant 1.000000e+00 : f32
    %185 = vector.broadcast %cst_44 : f32 to vector<2x128xf32>
    %186 = arith.addf %185, %184 : vector<2x128xf32>
    %187 = arith.divf %185, %186 : vector<2x128xf32>
    %188 = vector.extract_strided_slice %175 {offsets = [0, 256], sizes = [2, 128], strides = [1, 1]} : vector<2x512xf32> to vector<2x128xf32>
    %189 = math.tanh %188 : vector<2x128xf32>
    %190 = vector.extract_strided_slice %175 {offsets = [0, 384], sizes = [2, 128], strides = [1, 1]} : vector<2x512xf32> to vector<2x128xf32>
    %191 = arith.negf %190 : vector<2x128xf32>
    %192 = math.exp %191 : vector<2x128xf32>
    %cst_45 = arith.constant 1.000000e+00 : f32
    %193 = vector.broadcast %cst_45 : f32 to vector<2x128xf32>
    %194 = arith.addf %193, %192 : vector<2x128xf32>
    %195 = arith.divf %193, %194 : vector<2x128xf32>
    %196 = arith.mulf %187, %134 : vector<2x128xf32>
    %197 = arith.mulf %181, %189 : vector<2x128xf32>
    %198 = arith.addf %196, %197 : vector<2x128xf32>
    %199 = math.tanh %198 : vector<2x128xf32>
    %200 = arith.mulf %195, %199 : vector<2x128xf32>
    %201 = vector.extract_strided_slice %200 {offsets = [1, 0], sizes = [1, 128], strides = [1, 1]} : vector<2x128xf32> to vector<1x128xf32>
    %202 = arith.index_cast %c2_i32 : i32 to index
    %c0_46 = arith.constant 0 : index
    %203 = vector.load %arg12[%202, %c0_46] : memref<8x128xf32, #tpu.memory_space<vmem>>, vector<1x128xf32>
    tpu.vector_store %arg12[%202, %c0_46], %201 {strides = array<i32>} : memref<8x128xf32, #tpu.memory_space<vmem>>, vector<1x128xf32>,
    %c3_i32 = arith.constant 3 : i32
    %204 = arith.index_cast %c3_i32 : i32 to index
    %c0_47 = arith.constant 0 : index
    %c0_48 = arith.constant 0 : index
    %205 = vector.load %arg1[%204, %c0_47, %c0_48] : memref<8x2x512xf32, #tpu.memory_space<vmem>>, vector<1x2x512xf32>
    %206 = vector.shape_cast %205 : vector<1x2x512xf32> to vector<2x512xf32>
    %207 = tpu.concatenate %171, %200 in 0 : vector<2x128xf32>, vector<2x128xf32> -> vector<4x128xf32>
    %cst_49 = arith.constant dense<0.000000e+00> : vector<4x512xf32>
    %208 = tpu.matmul %207, %4, %cst_49 {dimension_numbers = #tpu.dot_dimension_numbers<[1], [0], [0], [1], [0, 0, 1, 1], [], []>} : vector<4x128xf32>, vector<128x512xf32>, vector<4x512xf32> -> vector<4x512xf32>
    %209 = vector.extract_strided_slice %208 {offsets = [0, 0], sizes = [2, 512], strides = [1, 1]} : vector<4x512xf32> to vector<2x512xf32>
    %210 = arith.addf %206, %209 : vector<2x512xf32>
    %211 = vector.extract_strided_slice %210 {offsets = [0, 0], sizes = [2, 128], strides = [1, 1]} : vector<2x512xf32> to vector<2x128xf32>
    %212 = arith.negf %211 : vector<2x128xf32>
    %213 = math.exp %212 : vector<2x128xf32>
    %cst_50 = arith.constant 1.000000e+00 : f32
    %214 = vector.broadcast %cst_50 : f32 to vector<2x128xf32>
    %215 = arith.addf %214, %213 : vector<2x128xf32>
    %216 = arith.divf %214, %215 : vector<2x128xf32>
    %217 = vector.extract_strided_slice %210 {offsets = [0, 128], sizes = [2, 128], strides = [1, 1]} : vector<2x512xf32> to vector<2x128xf32>
    %218 = arith.negf %217 : vector<2x128xf32>
    %219 = math.exp %218 : vector<2x128xf32>
    %cst_51 = arith.constant 1.000000e+00 : f32
    %220 = vector.broadcast %cst_51 : f32 to vector<2x128xf32>
    %221 = arith.addf %220, %219 : vector<2x128xf32>
    %222 = arith.divf %220, %221 : vector<2x128xf32>
    %223 = vector.extract_strided_slice %210 {offsets = [0, 256], sizes = [2, 128], strides = [1, 1]} : vector<2x512xf32> to vector<2x128xf32>
    %224 = math.tanh %223 : vector<2x128xf32>
    %225 = vector.extract_strided_slice %210 {offsets = [0, 384], sizes = [2, 128], strides = [1, 1]} : vector<2x512xf32> to vector<2x128xf32>
    %226 = arith.negf %225 : vector<2x128xf32>
    %227 = math.exp %226 : vector<2x128xf32>
    %cst_52 = arith.constant 1.000000e+00 : f32
    %228 = vector.broadcast %cst_52 : f32 to vector<2x128xf32>
    %229 = arith.addf %228, %227 : vector<2x128xf32>
    %230 = arith.divf %228, %229 : vector<2x128xf32>
    %231 = arith.mulf %222, %169 : vector<2x128xf32>
    %232 = arith.mulf %216, %224 : vector<2x128xf32>
    %233 = arith.addf %231, %232 : vector<2x128xf32>
    %234 = math.tanh %233 : vector<2x128xf32>
    %235 = arith.mulf %230, %234 : vector<2x128xf32>
    %cst_53 = arith.constant dense<0.000000e+00> : vector<2x512xf32>
    %236 = tpu.matmul %235, %3, %cst_53 {dimension_numbers = #tpu.dot_dimension_numbers<[1], [0], [0], [1], [0, 0, 1, 1], [], []>} : vector<2x128xf32>, vector<128x512xf32>, vector<2x512xf32> -> vector<2x512xf32>
    %237 = arith.addf %236, %7 : vector<2x512xf32>
    %238 = vector.extract_strided_slice %208 {offsets = [2, 0], sizes = [2, 512], strides = [1, 1]} : vector<4x512xf32> to vector<2x512xf32>
    %239 = arith.addf %237, %238 : vector<2x512xf32>
    %240 = vector.extract_strided_slice %239 {offsets = [0, 0], sizes = [2, 128], strides = [1, 1]} : vector<2x512xf32> to vector<2x128xf32>
    %241 = arith.negf %240 : vector<2x128xf32>
    %242 = math.exp %241 : vector<2x128xf32>
    %cst_54 = arith.constant 1.000000e+00 : f32
    %243 = vector.broadcast %cst_54 : f32 to vector<2x128xf32>
    %244 = arith.addf %243, %242 : vector<2x128xf32>
    %245 = arith.divf %243, %244 : vector<2x128xf32>
    %246 = vector.extract_strided_slice %239 {offsets = [0, 128], sizes = [2, 128], strides = [1, 1]} : vector<2x512xf32> to vector<2x128xf32>
    %247 = arith.negf %246 : vector<2x128xf32>
    %248 = math.exp %247 : vector<2x128xf32>
    %cst_55 = arith.constant 1.000000e+00 : f32
    %249 = vector.broadcast %cst_55 : f32 to vector<2x128xf32>
    %250 = arith.addf %249, %248 : vector<2x128xf32>
    %251 = arith.divf %249, %250 : vector<2x128xf32>
    %252 = vector.extract_strided_slice %239 {offsets = [0, 256], sizes = [2, 128], strides = [1, 1]} : vector<2x512xf32> to vector<2x128xf32>
    %253 = math.tanh %252 : vector<2x128xf32>
    %254 = vector.extract_strided_slice %239 {offsets = [0, 384], sizes = [2, 128], strides = [1, 1]} : vector<2x512xf32> to vector<2x128xf32>
    %255 = arith.negf %254 : vector<2x128xf32>
    %256 = math.exp %255 : vector<2x128xf32>
    %cst_56 = arith.constant 1.000000e+00 : f32
    %257 = vector.broadcast %cst_56 : f32 to vector<2x128xf32>
    %258 = arith.addf %257, %256 : vector<2x128xf32>
    %259 = arith.divf %257, %258 : vector<2x128xf32>
    %260 = arith.mulf %251, %198 : vector<2x128xf32>
    %261 = arith.mulf %245, %253 : vector<2x128xf32>
    %262 = arith.addf %260, %261 : vector<2x128xf32>
    %263 = math.tanh %262 : vector<2x128xf32>
    %264 = arith.mulf %259, %263 : vector<2x128xf32>
    %265 = vector.extract_strided_slice %264 {offsets = [1, 0], sizes = [1, 128], strides = [1, 1]} : vector<2x128xf32> to vector<1x128xf32>
    %266 = arith.index_cast %c3_i32 : i32 to index
    %c0_57 = arith.constant 0 : index
    %267 = vector.load %arg12[%266, %c0_57] : memref<8x128xf32, #tpu.memory_space<vmem>>, vector<1x128xf32>
    tpu.vector_store %arg12[%266, %c0_57], %265 {strides = array<i32>} : memref<8x128xf32, #tpu.memory_space<vmem>>, vector<1x128xf32>,
    %c4_i32 = arith.constant 4 : i32
    %268 = arith.index_cast %c4_i32 : i32 to index
    %c0_58 = arith.constant 0 : index
    %c0_59 = arith.constant 0 : index
    %269 = vector.load %arg1[%268, %c0_58, %c0_59] : memref<8x2x512xf32, #tpu.memory_space<vmem>>, vector<1x2x512xf32>
    %270 = vector.shape_cast %269 : vector<1x2x512xf32> to vector<2x512xf32>
    %271 = tpu.concatenate %235, %264 in 0 : vector<2x128xf32>, vector<2x128xf32> -> vector<4x128xf32>
    %cst_60 = arith.constant dense<0.000000e+00> : vector<4x512xf32>
    %272 = tpu.matmul %271, %4, %cst_60 {dimension_numbers = #tpu.dot_dimension_numbers<[1], [0], [0], [1], [0, 0, 1, 1], [], []>} : vector<4x128xf32>, vector<128x512xf32>, vector<4x512xf32> -> vector<4x512xf32>
    %273 = vector.extract_strided_slice %272 {offsets = [0, 0], sizes = [2, 512], strides = [1, 1]} : vector<4x512xf32> to vector<2x512xf32>
    %274 = arith.addf %270, %273 : vector<2x512xf32>
    %275 = vector.extract_strided_slice %274 {offsets = [0, 0], sizes = [2, 128], strides = [1, 1]} : vector<2x512xf32> to vector<2x128xf32>
    %276 = arith.negf %275 : vector<2x128xf32>
    %277 = math.exp %276 : vector<2x128xf32>
    %cst_61 = arith.constant 1.000000e+00 : f32
    %278 = vector.broadcast %cst_61 : f32 to vector<2x128xf32>
    %279 = arith.addf %278, %277 : vector<2x128xf32>
    %280 = arith.divf %278, %279 : vector<2x128xf32>
    %281 = vector.extract_strided_slice %274 {offsets = [0, 128], sizes = [2, 128], strides = [1, 1]} : vector<2x512xf32> to vector<2x128xf32>
    %282 = arith.negf %281 : vector<2x128xf32>
    %283 = math.exp %282 : vector<2x128xf32>
    %cst_62 = arith.constant 1.000000e+00 : f32
    %284 = vector.broadcast %cst_62 : f32 to vector<2x128xf32>
    %285 = arith.addf %284, %283 : vector<2x128xf32>
    %286 = arith.divf %284, %285 : vector<2x128xf32>
    %287 = vector.extract_strided_slice %274 {offsets = [0, 256], sizes = [2, 128], strides = [1, 1]} : vector<2x512xf32> to vector<2x128xf32>
    %288 = math.tanh %287 : vector<2x128xf32>
    %289 = vector.extract_strided_slice %274 {offsets = [0, 384], sizes = [2, 128], strides = [1, 1]} : vector<2x512xf32> to vector<2x128xf32>
    %290 = arith.negf %289 : vector<2x128xf32>
    %291 = math.exp %290 : vector<2x128xf32>
    %cst_63 = arith.constant 1.000000e+00 : f32
    %292 = vector.broadcast %cst_63 : f32 to vector<2x128xf32>
    %293 = arith.addf %292, %291 : vector<2x128xf32>
    %294 = arith.divf %292, %293 : vector<2x128xf32>
    %295 = arith.mulf %286, %233 : vector<2x128xf32>
    %296 = arith.mulf %280, %288 : vector<2x128xf32>
    %297 = arith.addf %295, %296 : vector<2x128xf32>
    %298 = math.tanh %297 : vector<2x128xf32>
    %299 = arith.mulf %294, %298 : vector<2x128xf32>
    %cst_64 = arith.constant dense<0.000000e+00> : vector<2x512xf32>
    %300 = tpu.matmul %299, %3, %cst_64 {dimension_numbers = #tpu.dot_dimension_numbers<[1], [0], [0], [1], [0, 0, 1, 1], [], []>} : vector<2x128xf32>, vector<128x512xf32>, vector<2x512xf32> -> vector<2x512xf32>
    %301 = arith.addf %300, %7 : vector<2x512xf32>
    %302 = vector.extract_strided_slice %272 {offsets = [2, 0], sizes = [2, 512], strides = [1, 1]} : vector<4x512xf32> to vector<2x512xf32>
    %303 = arith.addf %301, %302 : vector<2x512xf32>
    %304 = vector.extract_strided_slice %303 {offsets = [0, 0], sizes = [2, 128], strides = [1, 1]} : vector<2x512xf32> to vector<2x128xf32>
    %305 = arith.negf %304 : vector<2x128xf32>
    %306 = math.exp %305 : vector<2x128xf32>
    %cst_65 = arith.constant 1.000000e+00 : f32
    %307 = vector.broadcast %cst_65 : f32 to vector<2x128xf32>
    %308 = arith.addf %307, %306 : vector<2x128xf32>
    %309 = arith.divf %307, %308 : vector<2x128xf32>
    %310 = vector.extract_strided_slice %303 {offsets = [0, 128], sizes = [2, 128], strides = [1, 1]} : vector<2x512xf32> to vector<2x128xf32>
    %311 = arith.negf %310 : vector<2x128xf32>
    %312 = math.exp %311 : vector<2x128xf32>
    %cst_66 = arith.constant 1.000000e+00 : f32
    %313 = vector.broadcast %cst_66 : f32 to vector<2x128xf32>
    %314 = arith.addf %313, %312 : vector<2x128xf32>
    %315 = arith.divf %313, %314 : vector<2x128xf32>
    %316 = vector.extract_strided_slice %303 {offsets = [0, 256], sizes = [2, 128], strides = [1, 1]} : vector<2x512xf32> to vector<2x128xf32>
    %317 = math.tanh %316 : vector<2x128xf32>
    %318 = vector.extract_strided_slice %303 {offsets = [0, 384], sizes = [2, 128], strides = [1, 1]} : vector<2x512xf32> to vector<2x128xf32>
    %319 = arith.negf %318 : vector<2x128xf32>
    %320 = math.exp %319 : vector<2x128xf32>
    %cst_67 = arith.constant 1.000000e+00 : f32
    %321 = vector.broadcast %cst_67 : f32 to vector<2x128xf32>
    %322 = arith.addf %321, %320 : vector<2x128xf32>
    %323 = arith.divf %321, %322 : vector<2x128xf32>
    %324 = arith.mulf %315, %262 : vector<2x128xf32>
    %325 = arith.mulf %309, %317 : vector<2x128xf32>
    %326 = arith.addf %324, %325 : vector<2x128xf32>
    %327 = math.tanh %326 : vector<2x128xf32>
    %328 = arith.mulf %323, %327 : vector<2x128xf32>
    %329 = vector.extract_strided_slice %328 {offsets = [1, 0], sizes = [1, 128], strides = [1, 1]} : vector<2x128xf32> to vector<1x128xf32>
    %330 = arith.index_cast %c4_i32 : i32 to index
    %c0_68 = arith.constant 0 : index
    %331 = vector.load %arg12[%330, %c0_68] : memref<8x128xf32, #tpu.memory_space<vmem>>, vector<1x128xf32>
    tpu.vector_store %arg12[%330, %c0_68], %329 {strides = array<i32>} : memref<8x128xf32, #tpu.memory_space<vmem>>, vector<1x128xf32>,
    %c5_i32 = arith.constant 5 : i32
    %332 = arith.index_cast %c5_i32 : i32 to index
    %c0_69 = arith.constant 0 : index
    %c0_70 = arith.constant 0 : index
    %333 = vector.load %arg1[%332, %c0_69, %c0_70] : memref<8x2x512xf32, #tpu.memory_space<vmem>>, vector<1x2x512xf32>
    %334 = vector.shape_cast %333 : vector<1x2x512xf32> to vector<2x512xf32>
    %335 = tpu.concatenate %299, %328 in 0 : vector<2x128xf32>, vector<2x128xf32> -> vector<4x128xf32>
    %cst_71 = arith.constant dense<0.000000e+00> : vector<4x512xf32>
    %336 = tpu.matmul %335, %4, %cst_71 {dimension_numbers = #tpu.dot_dimension_numbers<[1], [0], [0], [1], [0, 0, 1, 1], [], []>} : vector<4x128xf32>, vector<128x512xf32>, vector<4x512xf32> -> vector<4x512xf32>
    %337 = vector.extract_strided_slice %336 {offsets = [0, 0], sizes = [2, 512], strides = [1, 1]} : vector<4x512xf32> to vector<2x512xf32>
    %338 = arith.addf %334, %337 : vector<2x512xf32>
    %339 = vector.extract_strided_slice %338 {offsets = [0, 0], sizes = [2, 128], strides = [1, 1]} : vector<2x512xf32> to vector<2x128xf32>
    %340 = arith.negf %339 : vector<2x128xf32>
    %341 = math.exp %340 : vector<2x128xf32>
    %cst_72 = arith.constant 1.000000e+00 : f32
    %342 = vector.broadcast %cst_72 : f32 to vector<2x128xf32>
    %343 = arith.addf %342, %341 : vector<2x128xf32>
    %344 = arith.divf %342, %343 : vector<2x128xf32>
    %345 = vector.extract_strided_slice %338 {offsets = [0, 128], sizes = [2, 128], strides = [1, 1]} : vector<2x512xf32> to vector<2x128xf32>
    %346 = arith.negf %345 : vector<2x128xf32>
    %347 = math.exp %346 : vector<2x128xf32>
    %cst_73 = arith.constant 1.000000e+00 : f32
    %348 = vector.broadcast %cst_73 : f32 to vector<2x128xf32>
    %349 = arith.addf %348, %347 : vector<2x128xf32>
    %350 = arith.divf %348, %349 : vector<2x128xf32>
    %351 = vector.extract_strided_slice %338 {offsets = [0, 256], sizes = [2, 128], strides = [1, 1]} : vector<2x512xf32> to vector<2x128xf32>
    %352 = math.tanh %351 : vector<2x128xf32>
    %353 = vector.extract_strided_slice %338 {offsets = [0, 384], sizes = [2, 128], strides = [1, 1]} : vector<2x512xf32> to vector<2x128xf32>
    %354 = arith.negf %353 : vector<2x128xf32>
    %355 = math.exp %354 : vector<2x128xf32>
    %cst_74 = arith.constant 1.000000e+00 : f32
    %356 = vector.broadcast %cst_74 : f32 to vector<2x128xf32>
    %357 = arith.addf %356, %355 : vector<2x128xf32>
    %358 = arith.divf %356, %357 : vector<2x128xf32>
    %359 = arith.mulf %350, %297 : vector<2x128xf32>
    %360 = arith.mulf %344, %352 : vector<2x128xf32>
    %361 = arith.addf %359, %360 : vector<2x128xf32>
    %362 = math.tanh %361 : vector<2x128xf32>
    %363 = arith.mulf %358, %362 : vector<2x128xf32>
    %cst_75 = arith.constant dense<0.000000e+00> : vector<2x512xf32>
    %364 = tpu.matmul %363, %3, %cst_75 {dimension_numbers = #tpu.dot_dimension_numbers<[1], [0], [0], [1], [0, 0, 1, 1], [], []>} : vector<2x128xf32>, vector<128x512xf32>, vector<2x512xf32> -> vector<2x512xf32>
    %365 = arith.addf %364, %7 : vector<2x512xf32>
    %366 = vector.extract_strided_slice %336 {offsets = [2, 0], sizes = [2, 512], strides = [1, 1]} : vector<4x512xf32> to vector<2x512xf32>
    %367 = arith.addf %365, %366 : vector<2x512xf32>
    %368 = vector.extract_strided_slice %367 {offsets = [0, 0], sizes = [2, 128], strides = [1, 1]} : vector<2x512xf32> to vector<2x128xf32>
    %369 = arith.negf %368 : vector<2x128xf32>
    %370 = math.exp %369 : vector<2x128xf32>
    %cst_76 = arith.constant 1.000000e+00 : f32
    %371 = vector.broadcast %cst_76 : f32 to vector<2x128xf32>
    %372 = arith.addf %371, %370 : vector<2x128xf32>
    %373 = arith.divf %371, %372 : vector<2x128xf32>
    %374 = vector.extract_strided_slice %367 {offsets = [0, 128], sizes = [2, 128], strides = [1, 1]} : vector<2x512xf32> to vector<2x128xf32>
    %375 = arith.negf %374 : vector<2x128xf32>
    %376 = math.exp %375 : vector<2x128xf32>
    %cst_77 = arith.constant 1.000000e+00 : f32
    %377 = vector.broadcast %cst_77 : f32 to vector<2x128xf32>
    %378 = arith.addf %377, %376 : vector<2x128xf32>
    %379 = arith.divf %377, %378 : vector<2x128xf32>
    %380 = vector.extract_strided_slice %367 {offsets = [0, 256], sizes = [2, 128], strides = [1, 1]} : vector<2x512xf32> to vector<2x128xf32>
    %381 = math.tanh %380 : vector<2x128xf32>
    %382 = vector.extract_strided_slice %367 {offsets = [0, 384], sizes = [2, 128], strides = [1, 1]} : vector<2x512xf32> to vector<2x128xf32>
    %383 = arith.negf %382 : vector<2x128xf32>
    %384 = math.exp %383 : vector<2x128xf32>
    %cst_78 = arith.constant 1.000000e+00 : f32
    %385 = vector.broadcast %cst_78 : f32 to vector<2x128xf32>
    %386 = arith.addf %385, %384 : vector<2x128xf32>
    %387 = arith.divf %385, %386 : vector<2x128xf32>
    %388 = arith.mulf %379, %326 : vector<2x128xf32>
    %389 = arith.mulf %373, %381 : vector<2x128xf32>
    %390 = arith.addf %388, %389 : vector<2x128xf32>
    %391 = math.tanh %390 : vector<2x128xf32>
    %392 = arith.mulf %387, %391 : vector<2x128xf32>
    %393 = vector.extract_strided_slice %392 {offsets = [1, 0], sizes = [1, 128], strides = [1, 1]} : vector<2x128xf32> to vector<1x128xf32>
    %394 = arith.index_cast %c5_i32 : i32 to index
    %c0_79 = arith.constant 0 : index
    %395 = vector.load %arg12[%394, %c0_79] : memref<8x128xf32, #tpu.memory_space<vmem>>, vector<1x128xf32>
    tpu.vector_store %arg12[%394, %c0_79], %393 {strides = array<i32>} : memref<8x128xf32, #tpu.memory_space<vmem>>, vector<1x128xf32>,
    %c6_i32 = arith.constant 6 : i32
    %396 = arith.index_cast %c6_i32 : i32 to index
    %c0_80 = arith.constant 0 : index
    %c0_81 = arith.constant 0 : index
    %397 = vector.load %arg1[%396, %c0_80, %c0_81] : memref<8x2x512xf32, #tpu.memory_space<vmem>>, vector<1x2x512xf32>
    %398 = vector.shape_cast %397 : vector<1x2x512xf32> to vector<2x512xf32>
    %399 = tpu.concatenate %363, %392 in 0 : vector<2x128xf32>, vector<2x128xf32> -> vector<4x128xf32>
    %cst_82 = arith.constant dense<0.000000e+00> : vector<4x512xf32>
    %400 = tpu.matmul %399, %4, %cst_82 {dimension_numbers = #tpu.dot_dimension_numbers<[1], [0], [0], [1], [0, 0, 1, 1], [], []>} : vector<4x128xf32>, vector<128x512xf32>, vector<4x512xf32> -> vector<4x512xf32>
    %401 = vector.extract_strided_slice %400 {offsets = [0, 0], sizes = [2, 512], strides = [1, 1]} : vector<4x512xf32> to vector<2x512xf32>
    %402 = arith.addf %398, %401 : vector<2x512xf32>
    %403 = vector.extract_strided_slice %402 {offsets = [0, 0], sizes = [2, 128], strides = [1, 1]} : vector<2x512xf32> to vector<2x128xf32>
    %404 = arith.negf %403 : vector<2x128xf32>
    %405 = math.exp %404 : vector<2x128xf32>
    %cst_83 = arith.constant 1.000000e+00 : f32
    %406 = vector.broadcast %cst_83 : f32 to vector<2x128xf32>
    %407 = arith.addf %406, %405 : vector<2x128xf32>
    %408 = arith.divf %406, %407 : vector<2x128xf32>
    %409 = vector.extract_strided_slice %402 {offsets = [0, 128], sizes = [2, 128], strides = [1, 1]} : vector<2x512xf32> to vector<2x128xf32>
    %410 = arith.negf %409 : vector<2x128xf32>
    %411 = math.exp %410 : vector<2x128xf32>
    %cst_84 = arith.constant 1.000000e+00 : f32
    %412 = vector.broadcast %cst_84 : f32 to vector<2x128xf32>
    %413 = arith.addf %412, %411 : vector<2x128xf32>
    %414 = arith.divf %412, %413 : vector<2x128xf32>
    %415 = vector.extract_strided_slice %402 {offsets = [0, 256], sizes = [2, 128], strides = [1, 1]} : vector<2x512xf32> to vector<2x128xf32>
    %416 = math.tanh %415 : vector<2x128xf32>
    %417 = vector.extract_strided_slice %402 {offsets = [0, 384], sizes = [2, 128], strides = [1, 1]} : vector<2x512xf32> to vector<2x128xf32>
    %418 = arith.negf %417 : vector<2x128xf32>
    %419 = math.exp %418 : vector<2x128xf32>
    %cst_85 = arith.constant 1.000000e+00 : f32
    %420 = vector.broadcast %cst_85 : f32 to vector<2x128xf32>
    %421 = arith.addf %420, %419 : vector<2x128xf32>
    %422 = arith.divf %420, %421 : vector<2x128xf32>
    %423 = arith.mulf %414, %361 : vector<2x128xf32>
    %424 = arith.mulf %408, %416 : vector<2x128xf32>
    %425 = arith.addf %423, %424 : vector<2x128xf32>
    %426 = math.tanh %425 : vector<2x128xf32>
    %427 = arith.mulf %422, %426 : vector<2x128xf32>
    %cst_86 = arith.constant dense<0.000000e+00> : vector<2x512xf32>
    %428 = tpu.matmul %427, %3, %cst_86 {dimension_numbers = #tpu.dot_dimension_numbers<[1], [0], [0], [1], [0, 0, 1, 1], [], []>} : vector<2x128xf32>, vector<128x512xf32>, vector<2x512xf32> -> vector<2x512xf32>
    %429 = arith.addf %428, %7 : vector<2x512xf32>
    %430 = vector.extract_strided_slice %400 {offsets = [2, 0], sizes = [2, 512], strides = [1, 1]} : vector<4x512xf32> to vector<2x512xf32>
    %431 = arith.addf %429, %430 : vector<2x512xf32>
    %432 = vector.extract_strided_slice %431 {offsets = [0, 0], sizes = [2, 128], strides = [1, 1]} : vector<2x512xf32> to vector<2x128xf32>
    %433 = arith.negf %432 : vector<2x128xf32>
    %434 = math.exp %433 : vector<2x128xf32>
    %cst_87 = arith.constant 1.000000e+00 : f32
    %435 = vector.broadcast %cst_87 : f32 to vector<2x128xf32>
    %436 = arith.addf %435, %434 : vector<2x128xf32>
    %437 = arith.divf %435, %436 : vector<2x128xf32>
    %438 = vector.extract_strided_slice %431 {offsets = [0, 128], sizes = [2, 128], strides = [1, 1]} : vector<2x512xf32> to vector<2x128xf32>
    %439 = arith.negf %438 : vector<2x128xf32>
    %440 = math.exp %439 : vector<2x128xf32>
    %cst_88 = arith.constant 1.000000e+00 : f32
    %441 = vector.broadcast %cst_88 : f32 to vector<2x128xf32>
    %442 = arith.addf %441, %440 : vector<2x128xf32>
    %443 = arith.divf %441, %442 : vector<2x128xf32>
    %444 = vector.extract_strided_slice %431 {offsets = [0, 256], sizes = [2, 128], strides = [1, 1]} : vector<2x512xf32> to vector<2x128xf32>
    %445 = math.tanh %444 : vector<2x128xf32>
    %446 = vector.extract_strided_slice %431 {offsets = [0, 384], sizes = [2, 128], strides = [1, 1]} : vector<2x512xf32> to vector<2x128xf32>
    %447 = arith.negf %446 : vector<2x128xf32>
    %448 = math.exp %447 : vector<2x128xf32>
    %cst_89 = arith.constant 1.000000e+00 : f32
    %449 = vector.broadcast %cst_89 : f32 to vector<2x128xf32>
    %450 = arith.addf %449, %448 : vector<2x128xf32>
    %451 = arith.divf %449, %450 : vector<2x128xf32>
    %452 = arith.mulf %443, %390 : vector<2x128xf32>
    %453 = arith.mulf %437, %445 : vector<2x128xf32>
    %454 = arith.addf %452, %453 : vector<2x128xf32>
    %455 = math.tanh %454 : vector<2x128xf32>
    %456 = arith.mulf %451, %455 : vector<2x128xf32>
    %457 = vector.extract_strided_slice %456 {offsets = [1, 0], sizes = [1, 128], strides = [1, 1]} : vector<2x128xf32> to vector<1x128xf32>
    %458 = arith.index_cast %c6_i32 : i32 to index
    %c0_90 = arith.constant 0 : index
    %459 = vector.load %arg12[%458, %c0_90] : memref<8x128xf32, #tpu.memory_space<vmem>>, vector<1x128xf32>
    tpu.vector_store %arg12[%458, %c0_90], %457 {strides = array<i32>} : memref<8x128xf32, #tpu.memory_space<vmem>>, vector<1x128xf32>,
    %c7_i32 = arith.constant 7 : i32
    %460 = arith.index_cast %c7_i32 : i32 to index
    %c0_91 = arith.constant 0 : index
    %c0_92 = arith.constant 0 : index
    %461 = vector.load %arg1[%460, %c0_91, %c0_92] : memref<8x2x512xf32, #tpu.memory_space<vmem>>, vector<1x2x512xf32>
    %462 = vector.shape_cast %461 : vector<1x2x512xf32> to vector<2x512xf32>
    %463 = tpu.concatenate %427, %456 in 0 : vector<2x128xf32>, vector<2x128xf32> -> vector<4x128xf32>
    %cst_93 = arith.constant dense<0.000000e+00> : vector<4x512xf32>
    %464 = tpu.matmul %463, %4, %cst_93 {dimension_numbers = #tpu.dot_dimension_numbers<[1], [0], [0], [1], [0, 0, 1, 1], [], []>} : vector<4x128xf32>, vector<128x512xf32>, vector<4x512xf32> -> vector<4x512xf32>
    %465 = vector.extract_strided_slice %464 {offsets = [0, 0], sizes = [2, 512], strides = [1, 1]} : vector<4x512xf32> to vector<2x512xf32>
    %466 = arith.addf %462, %465 : vector<2x512xf32>
    %467 = vector.extract_strided_slice %466 {offsets = [0, 0], sizes = [2, 128], strides = [1, 1]} : vector<2x512xf32> to vector<2x128xf32>
    %468 = arith.negf %467 : vector<2x128xf32>
    %469 = math.exp %468 : vector<2x128xf32>
    %cst_94 = arith.constant 1.000000e+00 : f32
    %470 = vector.broadcast %cst_94 : f32 to vector<2x128xf32>
    %471 = arith.addf %470, %469 : vector<2x128xf32>
    %472 = arith.divf %470, %471 : vector<2x128xf32>
    %473 = vector.extract_strided_slice %466 {offsets = [0, 128], sizes = [2, 128], strides = [1, 1]} : vector<2x512xf32> to vector<2x128xf32>
    %474 = arith.negf %473 : vector<2x128xf32>
    %475 = math.exp %474 : vector<2x128xf32>
    %cst_95 = arith.constant 1.000000e+00 : f32
    %476 = vector.broadcast %cst_95 : f32 to vector<2x128xf32>
    %477 = arith.addf %476, %475 : vector<2x128xf32>
    %478 = arith.divf %476, %477 : vector<2x128xf32>
    %479 = vector.extract_strided_slice %466 {offsets = [0, 256], sizes = [2, 128], strides = [1, 1]} : vector<2x512xf32> to vector<2x128xf32>
    %480 = math.tanh %479 : vector<2x128xf32>
    %481 = vector.extract_strided_slice %466 {offsets = [0, 384], sizes = [2, 128], strides = [1, 1]} : vector<2x512xf32> to vector<2x128xf32>
    %482 = arith.negf %481 : vector<2x128xf32>
    %483 = math.exp %482 : vector<2x128xf32>
    %cst_96 = arith.constant 1.000000e+00 : f32
    %484 = vector.broadcast %cst_96 : f32 to vector<2x128xf32>
    %485 = arith.addf %484, %483 : vector<2x128xf32>
    %486 = arith.divf %484, %485 : vector<2x128xf32>
    %487 = arith.mulf %478, %425 : vector<2x128xf32>
    %488 = arith.mulf %472, %480 : vector<2x128xf32>
    %489 = arith.addf %487, %488 : vector<2x128xf32>
    %490 = math.tanh %489 : vector<2x128xf32>
    %491 = arith.mulf %486, %490 : vector<2x128xf32>
    %cst_97 = arith.constant dense<0.000000e+00> : vector<2x512xf32>
    %492 = tpu.matmul %491, %3, %cst_97 {dimension_numbers = #tpu.dot_dimension_numbers<[1], [0], [0], [1], [0, 0, 1, 1], [], []>} : vector<2x128xf32>, vector<128x512xf32>, vector<2x512xf32> -> vector<2x512xf32>
    %493 = arith.addf %492, %7 : vector<2x512xf32>
    %494 = vector.extract_strided_slice %464 {offsets = [2, 0], sizes = [2, 512], strides = [1, 1]} : vector<4x512xf32> to vector<2x512xf32>
    %495 = arith.addf %493, %494 : vector<2x512xf32>
    %496 = vector.extract_strided_slice %495 {offsets = [0, 0], sizes = [2, 128], strides = [1, 1]} : vector<2x512xf32> to vector<2x128xf32>
    %497 = arith.negf %496 : vector<2x128xf32>
    %498 = math.exp %497 : vector<2x128xf32>
    %cst_98 = arith.constant 1.000000e+00 : f32
    %499 = vector.broadcast %cst_98 : f32 to vector<2x128xf32>
    %500 = arith.addf %499, %498 : vector<2x128xf32>
    %501 = arith.divf %499, %500 : vector<2x128xf32>
    %502 = vector.extract_strided_slice %495 {offsets = [0, 128], sizes = [2, 128], strides = [1, 1]} : vector<2x512xf32> to vector<2x128xf32>
    %503 = arith.negf %502 : vector<2x128xf32>
    %504 = math.exp %503 : vector<2x128xf32>
    %cst_99 = arith.constant 1.000000e+00 : f32
    %505 = vector.broadcast %cst_99 : f32 to vector<2x128xf32>
    %506 = arith.addf %505, %504 : vector<2x128xf32>
    %507 = arith.divf %505, %506 : vector<2x128xf32>
    %508 = vector.extract_strided_slice %495 {offsets = [0, 256], sizes = [2, 128], strides = [1, 1]} : vector<2x512xf32> to vector<2x128xf32>
    %509 = math.tanh %508 : vector<2x128xf32>
    %510 = vector.extract_strided_slice %495 {offsets = [0, 384], sizes = [2, 128], strides = [1, 1]} : vector<2x512xf32> to vector<2x128xf32>
    %511 = arith.negf %510 : vector<2x128xf32>
    %512 = math.exp %511 : vector<2x128xf32>
    %cst_100 = arith.constant 1.000000e+00 : f32
    %513 = vector.broadcast %cst_100 : f32 to vector<2x128xf32>
    %514 = arith.addf %513, %512 : vector<2x128xf32>
    %515 = arith.divf %513, %514 : vector<2x128xf32>
    %516 = arith.mulf %507, %454 : vector<2x128xf32>
    %517 = arith.mulf %501, %509 : vector<2x128xf32>
    %518 = arith.addf %516, %517 : vector<2x128xf32>
    %519 = math.tanh %518 : vector<2x128xf32>
    %520 = arith.mulf %515, %519 : vector<2x128xf32>
    %521 = vector.extract_strided_slice %520 {offsets = [1, 0], sizes = [1, 128], strides = [1, 1]} : vector<2x128xf32> to vector<1x128xf32>
    %522 = arith.index_cast %c7_i32 : i32 to index
    %c0_101 = arith.constant 0 : index
    %523 = vector.load %arg12[%522, %c0_101] : memref<8x128xf32, #tpu.memory_space<vmem>>, vector<1x128xf32>
    tpu.vector_store %arg12[%522, %c0_101], %521 {strides = array<i32>} : memref<8x128xf32, #tpu.memory_space<vmem>>, vector<1x128xf32>,
    %c8_i32 = arith.constant 8 : i32
    %c0_102 = arith.constant 0 : index
    %c0_103 = arith.constant 0 : index
    %524 = vector.load %arg8[%c0_102, %c0_103] : memref<2x128xf32, #tpu.memory_space<vmem>>, vector<2x128xf32>
    tpu.vector_store %arg8[%c0_102, %c0_103], %491 {strides = array<i32>} : memref<2x128xf32, #tpu.memory_space<vmem>>, vector<2x128xf32>,
    %c0_104 = arith.constant 0 : index
    %c0_105 = arith.constant 0 : index
    %525 = vector.load %arg9[%c0_104, %c0_105] : memref<2x128xf32, #tpu.memory_space<vmem>>, vector<2x128xf32>
    tpu.vector_store %arg9[%c0_104, %c0_105], %489 {strides = array<i32>} : memref<2x128xf32, #tpu.memory_space<vmem>>, vector<2x128xf32>,
    %c0_106 = arith.constant 0 : index
    %c0_107 = arith.constant 0 : index
    %526 = vector.load %arg10[%c0_106, %c0_107] : memref<2x128xf32, #tpu.memory_space<vmem>>, vector<2x128xf32>
    tpu.vector_store %arg10[%c0_106, %c0_107], %520 {strides = array<i32>} : memref<2x128xf32, #tpu.memory_space<vmem>>, vector<2x128xf32>,
    %c0_108 = arith.constant 0 : index
    %c0_109 = arith.constant 0 : index
    %527 = vector.load %arg11[%c0_108, %c0_109] : memref<2x128xf32, #tpu.memory_space<vmem>>, vector<2x128xf32>
    tpu.vector_store %arg11[%c0_108, %c0_109], %518 {strides = array<i32>} : memref<2x128xf32, #tpu.memory_space<vmem>>, vector<2x128xf32>,
    %c0_110 = arith.constant 0 : index
    %c0_111 = arith.constant 0 : index
    %528 = vector.load %arg12[%c0_110, %c0_111] : memref<8x128xf32, #tpu.memory_space<vmem>>, vector<8x128xf32>
    %c0_112 = arith.constant 0 : index
    %c0_113 = arith.constant 0 : index
    %529 = vector.load %arg5[%c0_112, %c0_113] : memref<128x128xf32, #tpu.memory_space<vmem>>, vector<128x128xf32>
    %cst_114 = arith.constant dense<0.000000e+00> : vector<8x128xf32>
    %530 = tpu.matmul %528, %529, %cst_114 {dimension_numbers = #tpu.dot_dimension_numbers<[1], [0], [0], [1], [0, 0, 1, 1], [], []>} : vector<8x128xf32>, vector<128x128xf32>, vector<8x128xf32> -> vector<8x128xf32>
    %c0_115 = arith.constant 0 : index
    %c0_116 = arith.constant 0 : index
    %531 = vector.load %arg6[%c0_115, %c0_116] : memref<1x128xf32, #tpu.memory_space<vmem>>, vector<1x128xf32>
    %532 = vector.broadcast %531 : vector<1x128xf32> to vector<8x128xf32>
    %533 = arith.addf %530, %532 : vector<8x128xf32>
    %c0_117 = arith.constant 0 : index
    %c0_118 = arith.constant 0 : index
    %534 = vector.load %arg7[%c0_117, %c0_118] : memref<8x128xf32, #tpu.memory_space<vmem>>, vector<8x128xf32>
    tpu.vector_store %arg7[%c0_117, %c0_118], %533 {strides = array<i32>} : memref<8x128xf32, #tpu.memory_space<vmem>>, vector<8x128xf32>,
    return
  }
  func.func @transform_0(%arg0: i32) -> (i32, i32, i32) {
    %c0_i32 = arith.constant 0 : i32
    %c0_i32_0 = arith.constant 0 : i32
    %c0_i32_1 = arith.constant 0 : i32
    return %arg0, %c0_i32, %c0_i32_0 : i32, i32, i32
  }
  func.func @transform_1(%arg0: i32) -> (i32, i32) {
    %c0_i32 = arith.constant 0 : i32
    %c0_i32_0 = arith.constant 0 : i32
    %c0_i32_1 = arith.constant 0 : i32
    return %c0_i32, %c0_i32_0 : i32, i32
  }
  func.func @transform_2(%arg0: i32) -> (i32, i32) {
    %c0_i32 = arith.constant 0 : i32
    %c0_i32_0 = arith.constant 0 : i32
    %c0_i32_1 = arith.constant 0 : i32
    return %c0_i32, %c0_i32_0 : i32, i32
  }
  func.func @transform_3(%arg0: i32) -> (i32, i32) {
    %c0_i32 = arith.constant 0 : i32
    %c0_i32_0 = arith.constant 0 : i32
    %c0_i32_1 = arith.constant 0 : i32
    return %c0_i32, %c0_i32_0 : i32, i32
  }
  func.func @transform_4(%arg0: i32) -> (i32, i32) {
    %c0_i32 = arith.constant 0 : i32
    %c0_i32_0 = arith.constant 0 : i32
    %c0_i32_1 = arith.constant 0 : i32
    return %c0_i32, %c0_i32_0 : i32, i32
  }
  func.func @transform_5(%arg0: i32) -> (i32, i32) {
    %c0_i32 = arith.constant 0 : i32
    %c0_i32_0 = arith.constant 0 : i32
    %c0_i32_1 = arith.constant 0 : i32
    return %c0_i32, %c0_i32_0 : i32, i32
  }
  func.func @transform_6(%arg0: i32) -> (i32, i32) {
    %c0_i32 = arith.constant 0 : i32
    %c0_i32_0 = arith.constant 0 : i32
    return %arg0, %c0_i32 : i32, i32
  }
}

</mosaic_0001>

<bundles_post_ra>
// kernel: _forward_impl.1
= control target key start
LH: loop header
LB: loop body
LE: loop exit
PB: predicated region body
PF: predicated region fallthrough
CT: control target
= control target key end

     0   :  { %s5103_s21 = smov 0   ;;  %s6536_s0 = inlined_call_operand.vmem [shape: f32[16,2,512], index: 0, kind: input, shape index: {}]   ;;  %s6537_s1 = inlined_call_operand.vmem [shape: f32[128,512], index: 1, kind: input, shape index: {}]   ;;  %s6538_s2 = inlined_call_operand.vmem [shape: f32[128,512], index: 2, kind: input, shape index: {}]   ;;  %s6539_s3 = inlined_call_operand.vmem [shape: f32[1,512], index: 3, kind: input, shape index: {}]   ;;  %s6540_s4 = inlined_call_operand.vmem [shape: f32[128,128], index: 4, kind: input, shape index: {}]   ;;  %s6541_s5 = inlined_call_operand.vmem [shape: f32[1,128], index: 5, kind: input, shape index: {}]   ;;  %s6542_s6 = inlined_call_operand.vmem [shape: f32[16,128], index: 6, kind: output, shape index: {}]  }
   0x1 LB: > { %s3617_s22 = sadd.s32 4294967295, %s5061_s21   ;;  %p3621_p0 = scmp.ge.s32.totalorder %s5061_s21, 1  ;;  %s5061_s21 = sphi %s5103_s21, %s16_s21  }
   0x2   : > { %p214_p1 = scmp.lt.s32.totalorder %s5061_s21, 3 }
   0x4   : > { %p215_p2 = pnand %p3621_p0, %p214_p1 }
   0x6   : > { %218 = sbr.rel (%p215_p2) target bundleno = 4512 (0x11a0), region = 44 }
   0xd   : > { %s3622_s23 = sshll.u32 %s3617_s22, 3  ;;  %p251_p3 = scmp.lt.s32.totalorder %s3617_s22, 1 }
   0xe   : > { %p245_p4 = scmp.lt.s32.totalorder %s3622_s23, 15  ;;  %p3626_p5 = scmp.ne.s32.totalorder %s3617_s22, 0 }
   0xf   : > { %s252_s24 = scalar_select %p251_p3, %s3617_s22, 1 }
  0x10   : > { %s6860_s23 = smov (!%p245_p4, %s3622_s23), 15  ;;  %258 = sbr.rel (%p3626_p5) target bundleno = 23 (0x17), region = 48 }
  0x11   : > { %s3625_s25 = sshll.u32 %s252_s24, 3  ;;  %s3685_s26 = sshll.u32 %s6860_s23, 3  ;;  %v5063_v0 = vmov (!%p3626_p5), 0.0  }
  0x12   : > { %s5114_s29 = scalar_lea.vmem %s6542_s6, %s3625_s25  ;;  %s5119_s8 = scalar_lea.vmem %s6536_s0, %s3685_s26  ;;  %259 = vst [vmem:[#allocation2] sm:$0x3] (!%p3626_p5), %v5063_v0  ;;  %260 = vst [vmem:[#allocation3] sm:$0x3] (!%p3626_p5), %v5063_v0 }
  0x13   : > { %261 = vst [vmem:[#allocation4] sm:$0x3] (!%p3626_p5), %v5063_v0  ;;  %262 = vst [vmem:[#allocation5] sm:$0x3] (!%p3626_p5), %v5063_v0 }
  0x17 PF: > { %v328_v1 = vld [vmem:[%s6538_s2 + $0x8] sm:$0xff]  ;;  %v330_v3 = vld [vmem:[%s6538_s2 + $0x18] sm:$0xff]  ;;  %v327_v6 = vld [vmem:[%s6538_s2] sm:$0xff]  ;;  %v6543_v8 = vmov 0.0   ;;  %vm421_vm0 = vcmask 1041408   ;;  %vm5067_vm1 = vmmov 0  }
  0x18   : > { %v332_v2 = vld [vmem:[%s6538_s2 + $0x28] sm:$0xff]  ;;  %v334_v5 = vld [vmem:[%s6538_s2 + $0x38] sm:$0xff]  ;;  %v331_v7 = vld [vmem:[%s6538_s2 + $0x20] sm:$0xff]  ;;  %487 = vmatprep.mubr.f32.mxu0 %v6543_v8  ;;  %558 = vmatprep.mubr.f32.mxu1 %v6543_v8 }
  0x19   : > { %v5130_v4 = vpack.c.bf16 %v332_v2, %v328_v1  ;;  %v5143_v9 = vpack.c.bf16 %v334_v5, %v330_v3  ;;  %v5145_v10 = vpack.c.bf16 %v331_v7, %v327_v6  ;;  %v329_v11 = vld [vmem:[%s6538_s2 + $0x10] sm:$0xff]  ;;  %v336_v13 = vld [vmem:[%s6538_s2 + $0x48] sm:$0xff]  ;;  %v338_v16 = vld [vmem:[%s6538_s2 + $0x58] sm:$0xff] }
  0x1a   : > { %v333_v12 = vld [vmem:[%s6538_s2 + $0x30] sm:$0xff]  ;;  %v340_v15 = vld [vmem:[%s6538_s2 + $0x68] sm:$0xff]  ;;  %v342_v17 = vld [vmem:[%s6538_s2 + $0x78] sm:$0xff] }
  0x1b   : > { %6623 = vst [vmem:[#allocation7_spill] sm:$0xff] %v5130_v4  ;;  %6624 = vst [vmem:[#allocation8_spill] sm:$0xff] %v5143_v9  ;;  %3739 = vmatprep.subr.bf16.mxu0 %v5130_v4  ;;  %v5157_v14 = vpack.c.bf16 %v333_v12, %v329_v11  ;;  %3771 = vmatprep.subr.bf16.mxu1 %v5143_v9  ;;  %v5170_v18 = vpack.c.bf16 %v340_v15, %v336_v13  ;;  %v335_v20 = vld [vmem:[%s6538_s2 + $0x40] sm:$0xff]  ;;  %v337_v22 = vld [vmem:[%s6538_s2 + $0x50] sm:$0xff] }
  0x1c   : > { %3741 = vmatpush1.bf16.msra.mxu0 %v5145_v10  ;;  %v5172_v19 = vpack.c.bf16 %v342_v17, %v338_v16  ;;  %v339_v21 = vld [vmem:[%s6538_s2 + $0x60] sm:$0xff]  ;;  %v341_v24 = vld [vmem:[%s6538_s2 + $0x70] sm:$0xff]  ;;  %v344_v25 = vld [vmem:[%s6538_s2 + $0x88] sm:$0xff] }
  0x1d   : > { %3773 = vmatpush1.bf16.msra.mxu1 %v5157_v14  ;;  %v5184_v23 = vpack.c.bf16 %v339_v21, %v335_v20  ;;  %v348_v26 = vld [vmem:[%s6538_s2 + $0xa8] sm:$0xff]  ;;  %3743 = vmatprep.subr.bf16.mxu0 %v5170_v18  ;;  %v5197_v27 = vpack.c.bf16 %v341_v24, %v337_v22  ;;  %v346_v29 = vld [vmem:[%s6538_s2 + $0x98] sm:$0xff]  ;;  %v343_v31 = vld [vmem:[%s6538_s2 + $0x80] sm:$0xff] }
  0x1e   : > { %3775 = vmatprep.subr.bf16.mxu1 %v5172_v19  ;;  %v5199_v28 = vpack.c.bf16 %v348_v26, %v344_v25  ;;  %v350_v30 = vld [vmem:[%s6538_s2 + $0xb8] sm:$0xff]  ;;  %v347_v33 = vld [vmem:[%s6538_s2 + $0xa0] sm:$0xff]  ;;  %v345_v34 = vld [vmem:[%s6538_s2 + $0x90] sm:$0xff] }
  0x1f   : > { %v5210_v32 = vpack.c.bf16 %v350_v30, %v346_v29  ;;  %v349_v35 = vld [vmem:[%s6538_s2 + $0xb0] sm:$0xff]  ;;  %v5222_v36 = vpack.c.bf16 %v347_v33, %v343_v31  ;;  %v352_v37 = vld [vmem:[%s6538_s2 + $0xc8] sm:$0xff]  ;;  %v354_v39 = vld [vmem:[%s6538_s2 + $0xd8] sm:$0xff] }
  0x20   : > { %3745 = vmatpush1.bf16.msra.mxu0 %v5184_v23  ;;  %v356_v38 = vld [vmem:[%s6538_s2 + $0xe8] sm:$0xff]  ;;  %v5235_v40 = vpack.c.bf16 %v349_v35, %v345_v34  ;;  %v358_v42 = vld [vmem:[%s6538_s2 + $0xf8] sm:$0xff]  ;;  %v351_v43 = vld [vmem:[%s6538_s2 + $0xc0] sm:$0xff] }
  0x21   : > { %3777 = vmatpush1.bf16.msra.mxu1 %v5197_v27  ;;  %3747 = vmatprep.subr.bf16.mxu0 %v5199_v28  ;;  %v5237_v41 = vpack.c.bf16 %v356_v38, %v352_v37  ;;  %v355_v44 = vld [vmem:[%s6538_s2 + $0xe0] sm:$0xff]  ;;  %v5249_v45 = vpack.c.bf16 %v358_v42, %v354_v39  ;;  %v353_v46 = vld [vmem:[%s6538_s2 + $0xd0] sm:$0xff]  ;;  %v360_v48 = vld [vmem:[%s6538_s2 + $0x108] sm:$0xff] }
  0x22   : > { %3779 = vmatprep.subr.bf16.mxu1 %v5210_v32  ;;  %v357_v47 = vld [vmem:[%s6538_s2 + $0xf0] sm:$0xff]  ;;  %v364_v49 = vld [vmem:[%s6538_s2 + $0x128] sm:$0xff]  ;;  %v362_v50 = vld [vmem:[%s6538_s2 + $0x118] sm:$0xff]  ;;  %v5270_v52 = vpack.c.bf16 %v355_v44, %v351_v43 }
  0x23   : > { %v366_v51 = vld [vmem:[%s6538_s2 + $0x138] sm:$0xff]  ;;  %v5274_v53 = vpack.c.bf16 %v357_v47, %v353_v46  ;;  %v5276_v54 = vpack.c.bf16 %v364_v49, %v360_v48  ;;  %v359_v55 = vld [vmem:[%s6538_s2 + $0x100] sm:$0xff]  ;;  %v361_v57 = vld [vmem:[%s6538_s2 + $0x110] sm:$0xff] }
  0x24   : > { %3749 = vmatpush1.bf16.msra.mxu0 %v5222_v36  ;;  %v363_v56 = vld [vmem:[%s6538_s2 + $0x120] sm:$0xff]  ;;  %v5288_v58 = vpack.c.bf16 %v366_v51, %v362_v50  ;;  %v365_v59 = vld [vmem:[%s6538_s2 + $0x130] sm:$0xff]  ;;  %v368_v60 = vld [vmem:[%s6538_s2 + $0x148] sm:$0xff] }
  0x25   : > { %3781 = vmatpush1.bf16.msra.mxu1 %v5235_v40  ;;  %3751 = vmatprep.subr.bf16.mxu0 %v5237_v41  ;;  %v372_v61 = vld [vmem:[%s6538_s2 + $0x168] sm:$0xff]  ;;  %v370_v62 = vld [vmem:[%s6538_s2 + $0x158] sm:$0xff]  ;;  %v5306_v0 = vpack.c.bf16 %v363_v56, %v359_v55  ;;  %v5310_v1 = vpack.c.bf16 %v365_v59, %v361_v57  ;;  %v367_v3 = vld [vmem:[%s6538_s2 + $0x140] sm:$0xff] }
  0x26   : > { %3783 = vmatprep.subr.bf16.mxu1 %v5249_v45  ;;  %v374_v63 = vld [vmem:[%s6538_s2 + $0x178] sm:$0xff]  ;;  %v5312_v2 = vpack.c.bf16 %v372_v61, %v368_v60  ;;  %v371_v5 = vld [vmem:[%s6538_s2 + $0x160] sm:$0xff]  ;;  %v369_v6 = vld [vmem:[%s6538_s2 + $0x150] sm:$0xff] }
  0x27   : > { %6625 = vst [vmem:[#allocation9_spill] sm:$0xff] %v5310_v1  ;;  %v5324_v7 = vpack.c.bf16 %v374_v63, %v370_v62  ;;  %v373_v11 = vld [vmem:[%s6538_s2 + $0x170] sm:$0xff]  ;;  %v376_v12 = vld [vmem:[%s6538_s2 + $0x188] sm:$0xff]  ;;  %v378_v15 = vld [vmem:[%s6538_s2 + $0x198] sm:$0xff]  ;;  %v5342_v17 = vpack.c.bf16 %v371_v5, %v367_v3 }
  0x28   : > { %3753 = vmatpush1.bf16.msra.mxu0 %v5270_v52  ;;  %6626 = vst [vmem:[#allocation10_spill] sm:$0xff] %v5312_v2  ;;  %v380_v13 = vld [vmem:[%s6538_s2 + $0x1a8] sm:$0xff]  ;;  %v382_v16 = vld [vmem:[%s6538_s2 + $0x1b8] sm:$0xff]  ;;  %v5346_v20 = vpack.c.bf16 %v373_v11, %v369_v6  ;;  %v375_v22 = vld [vmem:[%s6538_s2 + $0x180] sm:$0xff] }
  0x29   : > { %3785 = vmatpush1.bf16.msra.mxu1 %v5274_v53  ;;  %3755 = vmatprep.subr.bf16.mxu0 %v5276_v54  ;;  %6627 = vst [vmem:[#allocation11_spill] sm:$0xff] %v5324_v7  ;;  %6628 = vst [vmem:[#allocation12_spill] sm:$0xff] %v5342_v17  ;;  %v5348_v21 = vpack.c.bf16 %v380_v13, %v376_v12  ;;  %v379_v24 = vld [vmem:[%s6538_s2 + $0x1a0] sm:$0xff]  ;;  %v377_v25 = vld [vmem:[%s6538_s2 + $0x190] sm:$0xff]  ;;  %v5360_v26 = vpack.c.bf16 %v382_v16, %v378_v15 }
  0x2a   : > { %3787 = vmatprep.subr.bf16.mxu1 %v5288_v58  ;;  %6629 = vst [vmem:[#allocation13_spill] sm:$0xff] %v5346_v20  ;;  %v381_v29 = vld [vmem:[%s6538_s2 + $0x1b0] sm:$0xff]  ;;  %v384_v30 = vld [vmem:[%s6538_s2 + $0x1c8] sm:$0xff]  ;;  %v386_v33 = vld [vmem:[%s6538_s2 + $0x1d8] sm:$0xff]  ;;  %v5378_v35 = vpack.c.bf16 %v379_v24, %v375_v22 }
  0x2b   : > { %6630 = vst [vmem:[#allocation14_spill] sm:$0xff] %v5348_v21  ;;  %6631 = vst [vmem:[#allocation15_spill] sm:$0xff] %v5360_v26  ;;  %v388_v31 = vld [vmem:[%s6538_s2 + $0x1e8] sm:$0xff]  ;;  %v390_v34 = vld [vmem:[%s6538_s2 + $0x1f8] sm:$0xff]  ;;  %v5382_v37 = vpack.c.bf16 %v381_v29, %v377_v25 }
  0x2c   : > { %3757 = vmatpush1.bf16.msra.mxu0 %v5306_v0  ;;  %6632 = vst [vmem:[#allocation16_spill] sm:$0xff] %v5378_v35  ;;  %v5384_v38 = vpack.c.bf16 %v388_v31, %v384_v30  ;;  %v383_v39 = vld [vmem:[%s6538_s2 + $0x1c0] sm:$0xff]  ;;  %v5393_v44 = vpack.c.bf16 %v390_v34, %v386_v33  ;;  %v385_v46 = vld [vmem:[%s6538_s2 + $0x1d0] sm:$0xff]  ;;  %v264_v56 = vld [vmem:[%s6537_s1 + $0x8] sm:$0xff] }
  0x2d   : > { %3789 = vmatpush1.bf16.msra.mxu1 %v5310_v1  ;;  %3759 = vmatprep.subr.bf16.mxu0 %v5312_v2  ;;  %6633 = vst [vmem:[#allocation17_spill] sm:$0xff] %v5382_v37  ;;  %v387_v42 = vld [vmem:[%s6538_s2 + $0x1e0] sm:$0xff]  ;;  %v389_v47 = vld [vmem:[%s6538_s2 + $0x1f0] sm:$0xff]  ;;  %v268_v57 = vld [vmem:[%s6537_s1 + $0x28] sm:$0xff] }
  0x2e   : > { %3791 = vmatprep.subr.bf16.mxu1 %v5324_v7  ;;  %6634 = vst [vmem:[#allocation18_spill] sm:$0xff] %v5384_v38  ;;  %v415_v43 = vld [vmem:[#allocation4] sm:$0x3]  ;;  %6635 = vst [vmem:[#allocation19_spill] sm:$0xff] %v5393_v44  ;;  %v5402_v48 = vpack.c.bf16 %v387_v42, %v383_v39  ;;  %v5406_v50 = vpack.c.bf16 %v389_v47, %v385_v46  ;;  %v413_v51 = vld [vmem:[#allocation2] sm:$0x3]  ;;  %v5423_v60 = vpack.c.bf16 %v268_v57, %v264_v56 }
  0x2f   : > { %v419_v49 = vrot.slane %v415_v43, 6  ;;  %v266_v59 = vld [vmem:[%s6537_s1 + $0x18] sm:$0xff]  ;;  %v263_v62 = vld [vmem:[%s6537_s1] sm:$0xff]  ;;  %v265_v6 = vld [vmem:[%s6537_s1 + $0x10] sm:$0xff] }
  0x30   : > { %3761 = vmatpush1.bf16.msra.mxu0 %v5342_v17  ;;  %6636 = vst [vmem:[#allocation20_spill] sm:$0xff] %v5402_v48  ;;  %6637 = vst [vmem:[#allocation21_spill] sm:$0xff] %v5406_v50  ;;  %v270_v61 = vld [vmem:[%s6537_s1 + $0x38] sm:$0xff]  ;;  %v267_v63 = vld [vmem:[%s6537_s1 + $0x20] sm:$0xff] }
  0x31   : > { %3793 = vmatpush1.bf16.msra.mxu1 %v5346_v20  ;;  %3763 = vmatprep.subr.bf16.mxu0 %v5348_v21  ;;  %v422_v55 = vsel %vm421_vm0, %v413_v51, %v419_v49  ;;  %6638 = vst [vmem:[#allocation22_spill] sm:$0xff] %v5423_v60  ;;  %v5434_v3 = vpack.c.bf16 %v270_v61, %v266_v59  ;;  %v269_v11 = vld [vmem:[%s6537_s1 + $0x30] sm:$0xff]  ;;  %v272_v13 = vld [vmem:[%s6537_s1 + $0x48] sm:$0xff]  ;;  %v274_v16 = vld [vmem:[%s6537_s1 + $0x58] sm:$0xff] }
  0x32   : > { %3795 = vmatprep.subr.bf16.mxu1 %v5360_v26  ;;  %v5436_v5 = vpack.c.bf16 %v267_v63, %v263_v62  ;;  %v5445_v12 = vpack.c.bf16 %v269_v11, %v265_v6  ;;  %v276_v15 = vld [vmem:[%s6537_s1 + $0x68] sm:$0xff]  ;;  %v278_v24 = vld [vmem:[%s6537_s1 + $0x78] sm:$0xff]  ;;  %v271_v25 = vld [vmem:[%s6537_s1 + $0x40] sm:$0xff] }
  0x33   : > { %6639 = vst [vmem:[#allocation23_spill] sm:$0xff] %v5434_v3  ;;  %v5459_v22 = vpack.c.bf16 %v276_v15, %v272_v13  ;;  %v275_v29 = vld [vmem:[%s6537_s1 + $0x60] sm:$0xff]  ;;  %v5470_v30 = vpack.c.bf16 %v278_v24, %v274_v16  ;;  %v273_v33 = vld [vmem:[%s6537_s1 + $0x50] sm:$0xff]  ;;  %v280_v39 = vld [vmem:[%s6537_s1 + $0x88] sm:$0xff] }
  0x34   : > { %3765 = vmatpush1.bf16.msra.mxu0 %v5378_v35  ;;  %v5472_v31 = vpack.c.bf16 %v275_v29, %v271_v25  ;;  %v277_v34 = vld [vmem:[%s6537_s1 + $0x70] sm:$0xff]  ;;  %v284_v43 = vld [vmem:[%s6537_s1 + $0xa8] sm:$0xff]  ;;  %v282_v46 = vld [vmem:[%s6537_s1 + $0x98] sm:$0xff] }
  0x35   : > { %3797 = vmatpush1.bf16.msra.mxu1 %v5382_v37  ;;  %3767 = vmatprep.subr.bf16.mxu0 %v5384_v38  ;;  %v5484_v42 = vpack.c.bf16 %v277_v34, %v273_v33  ;;  %v286_v47 = vld [vmem:[%s6537_s1 + $0xb8] sm:$0xff]  ;;  %v5497_v49 = vpack.c.bf16 %v284_v43, %v280_v39  ;;  %v283_v56 = vld [vmem:[%s6537_s1 + $0xa0] sm:$0xff]  ;;  %v281_v57 = vld [vmem:[%s6537_s1 + $0x90] sm:$0xff] }
  0x36   : > { %3799 = vmatprep.subr.bf16.mxu1 %v5393_v44  ;;  %v5499_v51 = vpack.c.bf16 %v286_v47, %v282_v46  ;;  %v285_v61 = vld [vmem:[%s6537_s1 + $0xb0] sm:$0xff]  ;;  %v288_v62 = vld [vmem:[%s6537_s1 + $0xc8] sm:$0xff]  ;;  %v290_v13 = vld [vmem:[%s6537_s1 + $0xd8] sm:$0xff] }
  0x37   : > { %v292_v63 = vld [vmem:[%s6537_s1 + $0xe8] sm:$0xff]  ;;  %v5524_v6 = vpack.c.bf16 %v285_v61, %v281_v57  ;;  %v294_v15 = vld [vmem:[%s6537_s1 + $0xf8] sm:$0xff]  ;;  %v287_v16 = vld [vmem:[%s6537_s1 + $0xc0] sm:$0xff] }
  0x38   : > { %3769 = vmatpush1.bf16.msra.mxu0 %v5402_v48  ;;  %v5526_v11 = vpack.c.bf16 %v292_v63, %v288_v62  ;;  %v5537_v24 = vpack.c.bf16 %v294_v15, %v290_v13  ;;  %v291_v25 = vld [vmem:[%s6537_s1 + $0xe0] sm:$0xff]  ;;  %v289_v29 = vld [vmem:[%s6537_s1 + $0xd0] sm:$0xff]  ;;  %v296_v39 = vld [vmem:[%s6537_s1 + $0x108] sm:$0xff] }
  0x39   : > { %3801 = vmatpush1.bf16.msra.mxu1 %v5406_v50  ;;  %3803 = vmatprep.subr.bf16.mxu0 %v5423_v60  ;;  %6640 = vst [vmem:[#allocation24_spill] sm:$0xff] %v5524_v6  ;;  %v293_v33 = vld [vmem:[%s6537_s1 + $0xf0] sm:$0xff]  ;;  %v5549_v34 = vpack.c.bf16 %v291_v25, %v287_v16  ;;  %v300_v43 = vld [vmem:[%s6537_s1 + $0x128] sm:$0xff]  ;;  %v298_v46 = vld [vmem:[%s6537_s1 + $0x118] sm:$0xff] }
  0x3a   : > { %3835 = vmatprep.subr.bf16.mxu1 %v5434_v3  ;;  %6641 = vst [vmem:[#allocation25_spill] sm:$0xff] %v5526_v11  ;;  %6642 = vst [vmem:[#allocation26_spill] sm:$0xff] %v5537_v24  ;;  %v5562_v47 = vpack.c.bf16 %v293_v33, %v289_v29  ;;  %v295_v57 = vld [vmem:[%s6537_s1 + $0x100] sm:$0xff]  ;;  %v297_v63 = vld [vmem:[%s6537_s1 + $0x110] sm:$0xff] }
  0x3b   : > { %488 = vmatmul.mubr.f32.vlgmr.msra.gmra.mrb[0].mxu0 %v422_v55  ;;  %6643 = vst [vmem:[#allocation27_spill] sm:$0xff] %v5549_v34  ;;  %v299_v61 = vld [vmem:[%s6537_s1 + $0x120] sm:$0xff]  ;;  %v301_v13 = vld [vmem:[%s6537_s1 + $0x130] sm:$0xff]  ;;  %v304_v15 = vld [vmem:[%s6537_s1 + $0x148] sm:$0xff] }
  0x3c   : > { %559 = vmatmul.mubr.f32.vlgmr.msra.gmra.mrb[0].mxu1 %v422_v55  ;;  %683 = vmatprep.mubr.f32.mxu0 %v6543_v8  ;;  %v279_v55 = vld [vmem:[%s6537_s1 + $0x80] sm:$0xff]  ;;  %6644 = vst [vmem:[#allocation28_spill] sm:$0xff] %v5562_v47  ;;  %v308_v16 = vld [vmem:[%s6537_s1 + $0x168] sm:$0xff]  ;;  %v306_v25 = vld [vmem:[%s6537_s1 + $0x158] sm:$0xff]  ;;  %v5597_v33 = vpack.c.bf16 %v299_v61, %v295_v57 }
  0x3d   : > { %754 = vmatprep.mubr.f32.mxu1 %v6543_v8  ;;  %3805 = vmatpush1.bf16.msra.mxu0 %v5436_v5  ;;  %v5511_v59 = vpack.c.bf16 %v283_v56, %v279_v55  ;;  %v5564_v55 = vpack.c.bf16 %v300_v43, %v296_v39  ;;  %v302_v56 = vld [vmem:[%s6537_s1 + $0x138] sm:$0xff]  ;;  %v5601_v39 = vpack.c.bf16 %v301_v13, %v297_v63  ;;  %v305_v57 = vld [vmem:[%s6537_s1 + $0x150] sm:$0xff]  ;;  %v312_v13 = vld [vmem:[%s6537_s1 + $0x188] sm:$0xff] }
  0x3e   : > { %3837 = vmatpush1.bf16.msra.mxu1 %v5445_v12  ;;  %3807 = vmatprep.subr.bf16.mxu0 %v5459_v22  ;;  %v5576_v62 = vpack.c.bf16 %v302_v56, %v298_v46  ;;  %v310_v29 = vld [vmem:[%s6537_s1 + $0x178] sm:$0xff]  ;;  %6647 = vst [vmem:[#allocation31_spill] sm:$0xff] %v5597_v33  ;;  %v5603_v43 = vpack.c.bf16 %v308_v16, %v304_v15  ;;  %v303_v46 = vld [vmem:[%s6537_s1 + $0x140] sm:$0xff]  ;;  %v309_v63 = vld [vmem:[%s6537_s1 + $0x170] sm:$0xff] }
  0x3f   : > { %3839 = vmatprep.subr.bf16.mxu1 %v5470_v30  ;;  %6645 = vst [vmem:[#allocation29_spill] sm:$0xff] %v5564_v55  ;;  %6648 = vst [vmem:[#allocation32_spill] sm:$0xff] %v5601_v39  ;;  %v307_v56 = vld [vmem:[%s6537_s1 + $0x160] sm:$0xff]  ;;  %v5615_v61 = vpack.c.bf16 %v310_v29, %v306_v25  ;;  %v316_v15 = vld [vmem:[%s6537_s1 + $0x1a8] sm:$0xff]  ;;  %v5637_v8 = vpack.c.bf16 %v309_v63, %v305_v57 }
  0x40   : > { %6646 = vst [vmem:[#allocation30_spill] sm:$0xff] %v5576_v62  ;;  %6649 = vst [vmem:[#allocation33_spill] sm:$0xff] %v5603_v43  ;;  %v314_v16 = vld [vmem:[%s6537_s1 + $0x198] sm:$0xff]  ;;  %v5633_v29 = vpack.c.bf16 %v307_v56, %v303_v46  ;;  %v313_v46 = vld [vmem:[%s6537_s1 + $0x190] sm:$0xff] }
  0x41   : > { %3809 = vmatpush1.bf16.msra.mxu0 %v5472_v31  ;;  %6650 = vst [vmem:[#allocation34_spill] sm:$0xff] %v5615_v61  ;;  %v318_v25 = vld [vmem:[%s6537_s1 + $0x1b8] sm:$0xff]  ;;  %6652 = vst [vmem:[#allocation36_spill] sm:$0xff] %v5637_v8  ;;  %v317_v57 = vld [vmem:[%s6537_s1 + $0x1b0] sm:$0xff] }
  0x42   : > { %3841 = vmatpush1.bf16.msra.mxu1 %v5484_v42  ;;  %3811 = vmatprep.subr.bf16.mxu0 %v5497_v49  ;;  %6651 = vst [vmem:[#allocation35_spill] sm:$0xff] %v5633_v29  ;;  %v5651_v56 = vpack.c.bf16 %v318_v25, %v314_v16  ;;  %v320_v63 = vld [vmem:[%s6537_s1 + $0x1c8] sm:$0xff]  ;;  %v326_v16 = vld [vmem:[%s6537_s1 + $0x1f8] sm:$0xff] }
  0x43   : > { %3843 = vmatprep.subr.bf16.mxu1 %v5499_v51 }
  0x44   : > { %6654 = vst [vmem:[#allocation38_spill] sm:$0xff] %v5651_v56 }
  0x45   : > { %3813 = vmatpush1.bf16.msra.mxu0 %v5511_v59 }
  0x46   : > { %3845 = vmatpush1.bf16.msra.mxu1 %v5524_v6  ;;  %3815 = vmatprep.subr.bf16.mxu0 %v5526_v11 }
  0x47   : > { %3847 = vmatprep.subr.bf16.mxu1 %v5537_v24 }
  0x49   : > { %3817 = vmatpush1.bf16.msra.mxu0 %v5549_v34 }
  0x4a   : > { %3849 = vmatpush1.bf16.msra.mxu1 %v5562_v47  ;;  %3819 = vmatprep.subr.bf16.mxu0 %v5564_v55  ;;  %v311_v55 = vld [vmem:[%s6537_s1 + $0x180] sm:$0xff] }
  0x4b   : > { %3851 = vmatprep.subr.bf16.mxu1 %v5576_v62  ;;  %v5639_v62 = vpack.c.bf16 %v316_v15, %v312_v13  ;;  %v315_v47 = vld [vmem:[%s6537_s1 + $0x1a0] sm:$0xff]  ;;  %v324_v13 = vld [vmem:[%s6537_s1 + $0x1e8] sm:$0xff]  ;;  %v322_v15 = vld [vmem:[%s6537_s1 + $0x1d8] sm:$0xff] }
  0x4c   : > { %v5669_v25 = vpack.c.bf16 %v315_v47, %v311_v55  ;;  %v5684_v47 = vpack.c.bf16 %v326_v16, %v322_v15  ;;  %v321_v55 = vld [vmem:[%s6537_s1 + $0x1d0] sm:$0xff] }
  0x4d   : > { %3821 = vmatpush1.bf16.msra.mxu0 %v5597_v33  ;;  %6653 = vst [vmem:[#allocation37_spill] sm:$0xff] %v5639_v62  ;;  %v323_v33 = vld [vmem:[%s6537_s1 + $0x1e0] sm:$0xff] }
  0x4e   : > { %3853 = vmatpush1.bf16.msra.mxu1 %v5601_v39  ;;  %3823 = vmatprep.subr.bf16.mxu0 %v5603_v43  ;;  %6655 = vst [vmem:[#allocation39_spill] sm:$0xff] %v5669_v25  ;;  %v5675_v43 = vpack.c.bf16 %v324_v13, %v320_v63  ;;  %v319_v39 = vld [vmem:[%s6537_s1 + $0x1c0] sm:$0xff]  ;;  %6658 = vst [vmem:[#allocation42_spill] sm:$0xff] %v5684_v47  ;;  %v393_v13 = vlaneseq }
  0x4f   : > { %3855 = vmatprep.subr.bf16.mxu1 %v5615_v61  ;;  %v5673_v61 = vpack.c.bf16 %v317_v57, %v313_v46  ;;  %v325_v46 = vld [vmem:[%s6537_s1 + $0x1f0] sm:$0xff]  ;;  %v5693_v57 = vpack.c.bf16 %v323_v33, %v319_v39  ;;  %v5065_v33 = vmov 1983009808  }
  0x50   : > { %6657 = vst [vmem:[#allocation41_spill] sm:$0xff] %v5675_v43  ;;  %v5697_v63 = vpack.c.bf16 %v325_v46, %v321_v55  ;;  %v572_v39 = vunpack.c.l.s4 %v5065_v33  ;;  %v5704_v15 = vshrl.u32 %v393_v13, 7 }
  0x51   : > { %3825 = vmatpush1.bf16.msra.mxu0 %v5633_v29  ;;  %6656 = vst [vmem:[#allocation40_spill] sm:$0xff] %v5673_v61  ;;  %6659 = vst [vmem:[#allocation43_spill] sm:$0xff] %v5693_v57 }
  0x52   : > { %3857 = vmatpush1.bf16.msra.mxu1 %v5637_v8  ;;  %3827 = vmatprep.subr.bf16.mxu0 %v5639_v62  ;;  %6660 = vst [vmem:[#allocation44_spill] sm:$0xff] %v5697_v63  ;;  %v573_v16 = vunpack.c.0.s8 %v572_v39 }
  0x53   : > { %3859 = vmatprep.subr.bf16.mxu1 %v5651_v56 }
  0x54   : > { %v5709_v55 = vsub.s32 %v573_v16, %v5704_v15 }
  0x55   : > { %3829 = vmatpush1.bf16.msra.mxu0 %v5669_v25 }
  0x56   : > { %3861 = vmatpush1.bf16.msra.mxu1 %v5673_v61  ;;  %3831 = vmatprep.subr.bf16.mxu0 %v5675_v43 }
  0x57   : > { %3863 = vmatprep.subr.bf16.mxu1 %v5684_v47 }
  0x59   : > { %3833 = vmatpush1.bf16.msra.mxu0 %v5693_v57 }
  0x5a   : > { %3865 = vmatpush1.bf16.msra.mxu1 %v5697_v63  ;;  %3867 = vmatprep.subr.bf16.mxu0 %v5130_v4 }
  0x5b   : > { %3899 = vmatprep.subr.bf16.mxu1 %v5143_v9  ;;  %v417_v9 = vld [vmem:[%s5119_s8] sm:$0xff] }
 0x10e   : > { %v5706_v43 = vpop.f32.mrb[0].mxu0 }
 0x10f   : > { %v5711_v46 = vpop.f32.mrb[0].mxu1  ;;  %v5713_v57 = vpop.f32.mrb[1].mxu0 }
 0x110   : > { %v569_v4 = vcombine.low %v5706_v43, %v5713_v57  ;;  %v5717_v63 = vpop.f32.mrb[1].mxu1 }
 0x111   : > { %v570_v33 = vcombine.low %v5711_v46, %v5717_v63 }
 0x112   : > { %v577_v13 = vrot.slane %v569_v4, %v5709_v55 }
 0x113   : > { %v584_v39 = vrot.slane %v570_v33, %v5709_v55 }
 0x115   : > { %v585_v47 = vcombine.low %v577_v13, %v584_v39  ;;  %v414_v13 = vld [vmem:[#allocation3] sm:$0x3] }
 0x117   : > { %v587_v16 = vadd.f32 %v585_v47, %v417_v9 }
 0x119   : > { %v3627_v61 = vmul.f32 -1.442695, %v587_v16  ;;  %v595_v25 = vrot.slane %v587_v16, 2  ;;  %v606_v62 = vrot.slane %v587_v16, 6  ;;  %v603_v34 = vrot.slane %v587_v16, 4 }
 0x11a   : > { %v399_v16 = vsub.s32 1, %v5704_v15 }
 0x11b   : > { %4799 = vpow2.f32 %v3627_v61  ;;  %v3628_v56 = vmul.f32 -1.442695, %v595_v25  ;;  %v3629_v8 = vmul.f32 -1.442695, %v606_v62 }
 0x11d   : > { %4801 = vpow2.f32 %v3628_v56 }
 0x11e   : > { %4803 = vpow2.f32 %v3629_v8 }
 0x125   : > { %v4800_v29 = vpop.eup %4799 }
 0x126   : > { %v591_v24 = vadd.f32 1.0, %v4800_v29 }
 0x127   : > { %v4802_v11 = vpop.eup %4801 }
 0x128   : > { %4805 = vrcp.f32 %v591_v24  ;;  %v600_v6 = vadd.f32 1.0, %v4802_v11  ;;  %v4804_v4 = vpop.eup %4803  ;;  %v395_v11 = vsub.s32 0, %v5704_v15  ;;  %v403_v24 = vsub.s32 2, %v5704_v15 }
 0x129   : > { %4807 = vtanh.f32 %v603_v34  ;;  %v611_v39 = vadd.f32 1.0, %v4804_v4  ;;  %v391_v34 = vld [vmem:[%s6539_s3] sm:$0xf]  ;;  %v407_v4 = vsub.s32 3, %v5704_v15 }
 0x12a   : > { %4809 = vrcp.f32 %v600_v6  ;;  %v6661_v6 = vmov 0.0  }
 0x12b   : > { %4811 = vrcp.f32 %v611_v39 }
 0x132   : > { %v4806_v33 = vpop.eup %4805 }
 0x133   : > { %v4808_v9 = vpop.eup %4807 }
 0x134   : > { %v4810_v47 = vpop.eup %4809  ;;  %v615_v25 = vmul.f32 %v4808_v9, %v4806_v33  ;;  %v5772_v33 = vrot.slane %v391_v34, %v395_v11  ;;  %v5776_v9 = vrot.slane %v391_v34, %v399_v16  ;;  %v762_v11 = vrot.slane %v5713_v57, 2 }
 0x135   : > { %v614_v61 = vmul.f32 %v4810_v47, %v414_v13  ;;  %v4812_v62 = vpop.eup %4811  ;;  %v5774_v13 = vrot.slane %v391_v34, %v403_v24  ;;  %v5778_v47 = vrot.slane %v391_v34, %v407_v4  ;;  %v764_v24 = vrot.slane %v5717_v63, 2 }
 0x136   : > { %6662 = vst [vmem:[#allocation45_spill] sm:$0xff] %v5772_v33 }
 0x137   : > { %v5724_v56 = vadd.f32 %v615_v25, %v614_v61  ;;  %6663 = vst [vmem:[#allocation46_spill] sm:$0xff] %v5774_v13  ;;  %v761_v25 = vrot.slane %v5706_v43, 2 }
 0x139   : > { %4813 = vtanh.f32 %v5724_v56 }
 0x143   : > { %v4814_v29 = vpop.eup %4813 }
 0x144   : > { %v5727_v8 = vmul.f32 %v4814_v29, %v4812_v62  ;;  %v763_v62 = vrot.slane %v5711_v46, 2 }
 0x146   : > { %684 = vmatmul.mubr.f32.vlgmr.msra.gmra.mrb[2].mxu0 %v5727_v8  ;;  %755 = vmatmul.mubr.f32.vlgmr.msra.gmra.mrb[2].mxu1 %v5727_v8 }
 0x147   : > { %3869 = vmatpush1.bf16.msra.mxu0 %v5145_v10  ;;  %3901 = vmatpush1.bf16.msra.mxu1 %v5157_v14 }
 0x148   : > { %3871 = vmatprep.subr.bf16.mxu0 %v5170_v18  ;;  %3903 = vmatprep.subr.bf16.mxu1 %v5172_v19 }
 0x149   : > { %868 = vmatprep.mubr.f32.mxu0 %v6661_v6  ;;  %939 = vmatprep.mubr.f32.mxu1 %v6661_v6 }
 0x14b   : > { %3873 = vmatpush1.bf16.msra.mxu0 %v5184_v23  ;;  %3905 = vmatpush1.bf16.msra.mxu1 %v5197_v27 }
 0x14c   : > { %3875 = vmatprep.subr.bf16.mxu0 %v5199_v28  ;;  %3907 = vmatprep.subr.bf16.mxu1 %v5210_v32 }
 0x14f   : > { %3877 = vmatpush1.bf16.msra.mxu0 %v5222_v36  ;;  %3909 = vmatpush1.bf16.msra.mxu1 %v5235_v40 }
 0x150   : > { %3879 = vmatprep.subr.bf16.mxu0 %v5237_v41  ;;  %3911 = vmatprep.subr.bf16.mxu1 %v5249_v45 }
 0x153   : > { %3881 = vmatpush1.bf16.msra.mxu0 %v5270_v52  ;;  %3913 = vmatpush1.bf16.msra.mxu1 %v5274_v53 }
 0x154   : > { %3883 = vmatprep.subr.bf16.mxu0 %v5276_v54  ;;  %3915 = vmatprep.subr.bf16.mxu1 %v5288_v58 }
 0x157   : > { %3885 = vmatpush1.bf16.msra.mxu0 %v5306_v0  ;;  %3917 = vmatpush1.bf16.msra.mxu1 %v5310_v1 }
 0x158   : > { %3887 = vmatprep.subr.bf16.mxu0 %v5312_v2  ;;  %3919 = vmatprep.subr.bf16.mxu1 %v5324_v7 }
 0x15b   : > { %3889 = vmatpush1.bf16.msra.mxu0 %v5342_v17  ;;  %3921 = vmatpush1.bf16.msra.mxu1 %v5346_v20 }
 0x15c   : > { %3891 = vmatprep.subr.bf16.mxu0 %v5348_v21  ;;  %3923 = vmatprep.subr.bf16.mxu1 %v5360_v26 }
 0x15f   : > { %3893 = vmatpush1.bf16.msra.mxu0 %v5378_v35  ;;  %3925 = vmatpush1.bf16.msra.mxu1 %v5382_v37 }
 0x160   : > { %3895 = vmatprep.subr.bf16.mxu0 %v5384_v38  ;;  %3927 = vmatprep.subr.bf16.mxu1 %v5393_v44 }
 0x163   : > { %3897 = vmatpush1.bf16.msra.mxu0 %v5402_v48  ;;  %3929 = vmatpush1.bf16.msra.mxu1 %v5406_v50 }
 0x164   : > { %3931 = vmatprep.subr.bf16.mxu0 %v5423_v60  ;;  %3963 = vmatprep.subr.bf16.mxu1 %v5434_v3 }
 0x219   : > { %v685_v39 = vpop.f32.mrb[2].mxu0  ;;  %v756_v61 = vpop.f32.mrb[2].mxu1 }
 0x21a   : > { %v686_v29 = vadd.f32 %v685_v39, %v5772_v33  ;;  %v757_v3 = vadd.f32 %v756_v61, %v5774_v13  ;;  %v687_v60 = vpop.f32.mrb[3].mxu0  ;;  %v758_v15 = vpop.f32.mrb[3].mxu1 }
 0x21b   : > { %v688_v16 = vadd.f32 %v687_v60, %v5776_v9  ;;  %v759_v34 = vadd.f32 %v758_v15, %v5778_v47  ;;  %v416_v15 = vld [vmem:[#allocation5] sm:$0x3] }
 0x21c   : > { %v769_v4 = vadd.f32 %v761_v25, %v686_v29  ;;  %v771_v50 = vadd.f32 %v763_v62, %v757_v3 }
 0x21d   : > { %v770_v48 = vadd.f32 %v762_v11, %v688_v16  ;;  %v772_v43 = vadd.f32 %v764_v24, %v759_v34  ;;  %v6666_v34 = vld [vmem:[#allocation26_spill] sm:$0xff] }
 0x21e   : > { %v3630_v44 = vmul.f32 -1.442695, %v769_v4  ;;  %v6667_v4 = vld [vmem:[#allocation27_spill] sm:$0xff] }
 0x21f   : > { %v3631_v46 = vmul.f32 -1.442695, %v770_v48  ;;  %v3632_v39 = vmul.f32 -1.442695, %v772_v43  ;;  %v6668_v43 = vld [vmem:[#allocation28_spill] sm:$0xff] }
 0x220   : > { %4815 = vpow2.f32 %v3630_v44 }
 0x221   : > { %4817 = vpow2.f32 %v3631_v46  ;;  %v6669_v46 = vld [vmem:[#allocation29_spill] sm:$0xff] }
 0x222   : > { %4819 = vpow2.f32 %v3632_v39  ;;  %v6670_v39 = vld [vmem:[#allocation30_spill] sm:$0xff] }
 0x223   : > { %4821 = vtanh.f32 %v771_v50 }
 0x22a   : > { %v4816_v61 = vpop.eup %4815 }
 0x22b   : > { %v4818_v13 = vpop.eup %4817  ;;  %v776_v33 = vadd.f32 1.0, %v4816_v61  ;;  %v6671_v61 = vld [vmem:[#allocation31_spill] sm:$0xff] }
 0x22c   : > { %v782_v57 = vadd.f32 1.0, %v4818_v13  ;;  %v4820_v60 = vpop.eup %4819  ;;  %v6665_v13 = vld [vmem:[#allocation25_spill] sm:$0xff] }
 0x22d   : > { %4823 = vrcp.f32 %v776_v33  ;;  %v4822_v63 = vpop.eup %4821  ;;  %v789_v29 = vadd.f32 1.0, %v4820_v60  ;;  %v6673_v60 = vld [vmem:[#allocation33_spill] sm:$0xff] }
 0x22e   : > { %4825 = vrcp.f32 %v782_v57  ;;  %v6672_v57 = vld [vmem:[#allocation32_spill] sm:$0xff] }
 0x22f   : > { %4827 = vrcp.f32 %v789_v29  ;;  %v6679_v29 = vld [vmem:[#allocation39_spill] sm:$0xff] }
 0x237   : > { %v4824_v25 = vpop.eup %4823 }
 0x238   : > { %v4826_v3 = vpop.eup %4825  ;;  %v793_v62 = vmul.f32 %v4824_v25, %v4822_v63  ;;  %v6674_v63 = vld [vmem:[#allocation34_spill] sm:$0xff]  ;;  %v6676_v25 = vld [vmem:[#allocation36_spill] sm:$0xff] }
 0x239   : > { %v792_v11 = vmul.f32 %v4826_v3, %v416_v15  ;;  %v4828_v44 = vpop.eup %4827  ;;  %v6675_v15 = vld [vmem:[#allocation35_spill] sm:$0xff]  ;;  %v6677_v3 = vld [vmem:[#allocation37_spill] sm:$0xff] }
 0x23b   : > { %v5788_v48 = vadd.f32 %v793_v62, %v792_v11  ;;  %v6678_v62 = vld [vmem:[#allocation38_spill] sm:$0xff]  ;;  %v6680_v11 = vld [vmem:[#allocation40_spill] sm:$0xff] }
 0x23d   : > { %4829 = vtanh.f32 %v5788_v48 }
 0x247   : > { %v4830_v24 = vpop.eup %4829 }
 0x248   : > { %v796_v16 = vmul.f32 %v4830_v24, %v4828_v44  ;;  %v6681_v44 = vld [vmem:[#allocation41_spill] sm:$0xff]  ;;  %v6682_v24 = vld [vmem:[#allocation42_spill] sm:$0xff] }
 0x24a   : > { %797 = vst [vmem:[#allocation6 - $0x1] sm:$0x2] %v796_v16  ;;  %v801_v50 = vrot.slane %v796_v16, 6  ;;  %v6683_v16 = vld [vmem:[#allocation43_spill] sm:$0xff] }
 0x24c   : > { %v803_v33 = vsel %vm421_vm0, %v5727_v8, %v801_v50  ;;  %v6664_v8 = vld [vmem:[#allocation24_spill] sm:$0xff] }
 0x24d   : > { %869 = vmatmul.mubr.f32.vlgmr.msra.gmra.mrb[4].mxu0 %v803_v33  ;;  %940 = vmatmul.mubr.f32.vlgmr.msra.gmra.mrb[4].mxu1 %v803_v33  ;;  %v6684_v50 = vld [vmem:[#allocation44_spill] sm:$0xff]  ;;  %v6685_v33 = vld [vmem:[#allocation7_spill] sm:$0xff] }
 0x24e   : > { %3933 = vmatpush1.bf16.msra.mxu0 %v5436_v5  ;;  %3965 = vmatpush1.bf16.msra.mxu1 %v5445_v12 }
 0x24f   : > { %3935 = vmatprep.subr.bf16.mxu0 %v5459_v22  ;;  %3967 = vmatprep.subr.bf16.mxu1 %v5470_v30 }
 0x250   : > { %1064 = vmatprep.mubr.f32.mxu0 %v6661_v6  ;;  %1135 = vmatprep.mubr.f32.mxu1 %v6661_v6 }
 0x252   : > { %3937 = vmatpush1.bf16.msra.mxu0 %v5472_v31  ;;  %3969 = vmatpush1.bf16.msra.mxu1 %v5484_v42 }
 0x253   : > { %3939 = vmatprep.subr.bf16.mxu0 %v5497_v49  ;;  %3971 = vmatprep.subr.bf16.mxu1 %v5499_v51 }
 0x256   : > { %3941 = vmatpush1.bf16.msra.mxu0 %v5511_v59  ;;  %3973 = vmatpush1.bf16.msra.mxu1 %v6664_v8 }
 0x257   : > { %3943 = vmatprep.subr.bf16.mxu0 %v6665_v13  ;;  %3975 = vmatprep.subr.bf16.mxu1 %v6666_v34 }
 0x25a   : > { %3945 = vmatpush1.bf16.msra.mxu0 %v6667_v4  ;;  %3977 = vmatpush1.bf16.msra.mxu1 %v6668_v43 }
 0x25b   : > { %3947 = vmatprep.subr.bf16.mxu0 %v6669_v46  ;;  %3979 = vmatprep.subr.bf16.mxu1 %v6670_v39 }
 0x25e   : > { %3949 = vmatpush1.bf16.msra.mxu0 %v6671_v61  ;;  %3981 = vmatpush1.bf16.msra.mxu1 %v6672_v57 }
 0x25f   : > { %3951 = vmatprep.subr.bf16.mxu0 %v6673_v60  ;;  %3983 = vmatprep.subr.bf16.mxu1 %v6674_v63 }
 0x262   : > { %3953 = vmatpush1.bf16.msra.mxu0 %v6675_v15  ;;  %3985 = vmatpush1.bf16.msra.mxu1 %v6676_v25  ;;  %v6686_v25 = vld [vmem:[#allocation8_spill] sm:$0xff] }
 0x263   : > { %3955 = vmatprep.subr.bf16.mxu0 %v6677_v3  ;;  %3987 = vmatprep.subr.bf16.mxu1 %v6678_v62 }
 0x266   : > { %3957 = vmatpush1.bf16.msra.mxu0 %v6679_v29  ;;  %3989 = vmatpush1.bf16.msra.mxu1 %v6680_v11 }
 0x267   : > { %3959 = vmatprep.subr.bf16.mxu0 %v6681_v44  ;;  %3991 = vmatprep.subr.bf16.mxu1 %v6682_v24  ;;  %v3633_v24 = vld [vmem:[%s5119_s8 + $0x8] sm:$0xff] }
 0x26a   : > { %3961 = vmatpush1.bf16.msra.mxu0 %v6683_v16  ;;  %3993 = vmatpush1.bf16.msra.mxu1 %v6684_v50 }
 0x26b   : > { %3995 = vmatprep.subr.bf16.mxu0 %v6685_v33  ;;  %4027 = vmatprep.subr.bf16.mxu1 %v6686_v25 }
 0x320   : > { %v5827_v3 = vpop.f32.mrb[4].mxu0  ;;  %v5829_v62 = vpop.f32.mrb[4].mxu1 }
 0x321   : > { %v5831_v29 = vpop.f32.mrb[5].mxu0  ;;  %v5833_v15 = vpop.f32.mrb[5].mxu1 }
 0x322   : > { %v950_v44 = vcombine.low %v5827_v3, %v5831_v29  ;;  %v951_v16 = vcombine.low %v5829_v62, %v5833_v15 }
 0x324   : > { %v958_v50 = vrot.slane %v950_v44, %v5709_v55  ;;  %v965_v33 = vrot.slane %v951_v16, %v5709_v55 }
 0x326   : > { %v966_v25 = vcombine.low %v958_v50, %v965_v33 }
 0x328   : > { %v968_v11 = vadd.f32 %v3633_v24, %v966_v25 }
 0x32a   : > { %v3634_v63 = vmul.f32 -1.442695, %v968_v11  ;;  %v976_v60 = vrot.slane %v968_v11, 2  ;;  %v987_v61 = vrot.slane %v968_v11, 6  ;;  %v984_v43 = vrot.slane %v968_v11, 4 }
 0x32c   : > { %4831 = vpow2.f32 %v3634_v63  ;;  %v3635_v57 = vmul.f32 -1.442695, %v976_v60  ;;  %v3636_v39 = vmul.f32 -1.442695, %v987_v61 }
 0x32e   : > { %4833 = vpow2.f32 %v3635_v57 }
 0x32f   : > { %4835 = vpow2.f32 %v3636_v39 }
 0x336   : > { %v4832_v46 = vpop.eup %4831 }
 0x337   : > { %v972_v4 = vadd.f32 1.0, %v4832_v46 }
 0x338   : > { %v4834_v34 = vpop.eup %4833 }
 0x339   : > { %4837 = vrcp.f32 %v972_v4  ;;  %v981_v13 = vadd.f32 1.0, %v4834_v34  ;;  %v4836_v44 = vpop.eup %4835  ;;  %v6689_v34 = vld [vmem:[#allocation21_spill] sm:$0xff]  ;;  %v6690_v4 = vld [vmem:[#allocation22_spill] sm:$0xff] }
 0x33a   : > { %4839 = vtanh.f32 %v984_v43  ;;  %v992_v24 = vadd.f32 1.0, %v4836_v44  ;;  %v6691_v43 = vld [vmem:[#allocation23_spill] sm:$0xff]  ;;  %v1142_v44 = vrot.slane %v5827_v3, 2 }
 0x33b   : > { %4841 = vrcp.f32 %v981_v13  ;;  %v6688_v13 = vld [vmem:[#allocation20_spill] sm:$0xff] }
 0x33c   : > { %4843 = vrcp.f32 %v992_v24  ;;  %v6693_v24 = vld [vmem:[#allocation46_spill] sm:$0xff] }
 0x343   : > { %v4838_v16 = vpop.eup %4837 }
 0x344   : > { %v4840_v50 = vpop.eup %4839 }
 0x345   : > { %v4842_v25 = vpop.eup %4841  ;;  %v996_v60 = vmul.f32 %v4840_v50, %v4838_v16  ;;  %v1144_v16 = vrot.slane %v5829_v62, 2  ;;  %v6692_v50 = vld [vmem:[#allocation45_spill] sm:$0xff] }
 0x346   : > { %v995_v63 = vmul.f32 %v4842_v25, %v5724_v56  ;;  %v4844_v46 = vpop.eup %4843  ;;  %v6687_v56 = vld [vmem:[#allocation19_spill] sm:$0xff] }
 0x348   : > { %v5843_v57 = vadd.f32 %v996_v60, %v995_v63 }
 0x34a   : > { %4845 = vtanh.f32 %v5843_v57 }
 0x354   : > { %v4846_v61 = vpop.eup %4845 }
 0x355   : > { %v5846_v39 = vmul.f32 %v4846_v61, %v4844_v46  ;;  %v1143_v61 = vrot.slane %v5831_v29, 2 }
 0x357   : > { %1065 = vmatmul.mubr.f32.vlgmr.msra.gmra.mrb[6].mxu0 %v5846_v39  ;;  %1136 = vmatmul.mubr.f32.vlgmr.msra.gmra.mrb[6].mxu1 %v5846_v39 }
 0x358   : > { %3997 = vmatpush1.bf16.msra.mxu0 %v5145_v10  ;;  %4029 = vmatpush1.bf16.msra.mxu1 %v5157_v14 }
 0x359   : > { %3999 = vmatprep.subr.bf16.mxu0 %v5170_v18  ;;  %4031 = vmatprep.subr.bf16.mxu1 %v5172_v19 }
 0x35a   : > { %1249 = vmatprep.mubr.f32.mxu0 %v6661_v6  ;;  %1320 = vmatprep.mubr.f32.mxu1 %v6661_v6 }
 0x35c   : > { %4001 = vmatpush1.bf16.msra.mxu0 %v5184_v23  ;;  %4033 = vmatpush1.bf16.msra.mxu1 %v5197_v27 }
 0x35d   : > { %4003 = vmatprep.subr.bf16.mxu0 %v5199_v28  ;;  %4035 = vmatprep.subr.bf16.mxu1 %v5210_v32 }
 0x360   : > { %4005 = vmatpush1.bf16.msra.mxu0 %v5222_v36  ;;  %4037 = vmatpush1.bf16.msra.mxu1 %v5235_v40 }
 0x361   : > { %4007 = vmatprep.subr.bf16.mxu0 %v5237_v41  ;;  %4039 = vmatprep.subr.bf16.mxu1 %v5249_v45 }
 0x364   : > { %4009 = vmatpush1.bf16.msra.mxu0 %v5270_v52  ;;  %4041 = vmatpush1.bf16.msra.mxu1 %v5274_v53 }
 0x365   : > { %4011 = vmatprep.subr.bf16.mxu0 %v5276_v54  ;;  %4043 = vmatprep.subr.bf16.mxu1 %v5288_v58 }
 0x368   : > { %4013 = vmatpush1.bf16.msra.mxu0 %v5306_v0  ;;  %4045 = vmatpush1.bf16.msra.mxu1 %v5310_v1 }
 0x369   : > { %4015 = vmatprep.subr.bf16.mxu0 %v5312_v2  ;;  %4047 = vmatprep.subr.bf16.mxu1 %v5324_v7 }
 0x36c   : > { %4017 = vmatpush1.bf16.msra.mxu0 %v5342_v17  ;;  %4049 = vmatpush1.bf16.msra.mxu1 %v5346_v20 }
 0x36d   : > { %4019 = vmatprep.subr.bf16.mxu0 %v5348_v21  ;;  %4051 = vmatprep.subr.bf16.mxu1 %v5360_v26 }
 0x370   : > { %4021 = vmatpush1.bf16.msra.mxu0 %v5378_v35  ;;  %4053 = vmatpush1.bf16.msra.mxu1 %v5382_v37 }
 0x371   : > { %4023 = vmatprep.subr.bf16.mxu0 %v5384_v38  ;;  %4055 = vmatprep.subr.bf16.mxu1 %v6687_v56 }
 0x374   : > { %4025 = vmatpush1.bf16.msra.mxu0 %v6688_v13  ;;  %4057 = vmatpush1.bf16.msra.mxu1 %v6689_v34  ;;  %v1145_v34 = vrot.slane %v5833_v15, 2 }
 0x375   : > { %4059 = vmatprep.subr.bf16.mxu0 %v6690_v4  ;;  %4091 = vmatprep.subr.bf16.mxu1 %v6691_v43 }
 0x42a   : > { %v1066_v11 = vpop.f32.mrb[6].mxu0  ;;  %v1137_v33 = vpop.f32.mrb[6].mxu1 }
 0x42b   : > { %v1067_v25 = vadd.f32 %v1066_v11, %v6692_v50  ;;  %v1138_v63 = vadd.f32 %v1137_v33, %v6693_v24  ;;  %v1068_v60 = vpop.f32.mrb[7].mxu0  ;;  %v1139_v46 = vpop.f32.mrb[7].mxu1 }
 0x42c   : > { %v1069_v4 = vadd.f32 %v1068_v60, %v5776_v9  ;;  %v1140_v43 = vadd.f32 %v1139_v46, %v5778_v47 }
 0x42d   : > { %v1150_v13 = vadd.f32 %v1142_v44, %v1067_v25  ;;  %v1152_v56 = vadd.f32 %v1144_v16, %v1138_v63  ;;  %v6696_v25 = vld [vmem:[#allocation27_spill] sm:$0xff]  ;;  %v6698_v63 = vld [vmem:[#allocation29_spill] sm:$0xff] }
 0x42e   : > { %v1151_v38 = vadd.f32 %v1143_v61, %v1069_v4  ;;  %v1153_v3 = vadd.f32 %v1145_v34, %v1140_v43  ;;  %v6699_v61 = vld [vmem:[#allocation30_spill] sm:$0xff] }
 0x42f   : > { %v3637_v37 = vmul.f32 -1.442695, %v1150_v13 }
 0x430   : > { %v3638_v62 = vmul.f32 -1.442695, %v1151_v38  ;;  %v3639_v11 = vmul.f32 -1.442695, %v1153_v3  ;;  %v6700_v3 = vld [vmem:[#allocation31_spill] sm:$0xff] }
 0x431   : > { %4847 = vpow2.f32 %v3637_v37 }
 0x432   : > { %4849 = vpow2.f32 %v3638_v62  ;;  %v6701_v62 = vld [vmem:[#allocation32_spill] sm:$0xff] }
 0x433   : > { %4851 = vpow2.f32 %v3639_v11  ;;  %v6702_v11 = vld [vmem:[#allocation33_spill] sm:$0xff] }
 0x434   : > { %4853 = vtanh.f32 %v1152_v56 }
 0x43b   : > { %v4848_v33 = vpop.eup %4847 }
 0x43c   : > { %v4850_v24 = vpop.eup %4849  ;;  %v1157_v50 = vadd.f32 1.0, %v4848_v33  ;;  %v6703_v33 = vld [vmem:[#allocation34_spill] sm:$0xff] }
 0x43d   : > { %v1163_v29 = vadd.f32 1.0, %v4850_v24  ;;  %v4852_v15 = vpop.eup %4851  ;;  %v6697_v24 = vld [vmem:[#allocation28_spill] sm:$0xff] }
 0x43e   : > { %4855 = vrcp.f32 %v1157_v50  ;;  %v4854_v60 = vpop.eup %4853  ;;  %v1170_v4 = vadd.f32 1.0, %v4852_v15  ;;  %v6705_v15 = vld [vmem:[#allocation36_spill] sm:$0xff] }
 0x43f   : > { %4857 = vrcp.f32 %v1163_v29  ;;  %v6704_v29 = vld [vmem:[#allocation35_spill] sm:$0xff] }
 0x440   : > { %4859 = vrcp.f32 %v1170_v4  ;;  %v6710_v4 = vld [vmem:[#allocation41_spill] sm:$0xff] }
 0x448   : > { %v4856_v46 = vpop.eup %4855 }
 0x449   : > { %v4858_v44 = vpop.eup %4857  ;;  %v1174_v16 = vmul.f32 %v4856_v46, %v4854_v60  ;;  %v6706_v60 = vld [vmem:[#allocation37_spill] sm:$0xff]  ;;  %v6707_v46 = vld [vmem:[#allocation38_spill] sm:$0xff] }
 0x44a   : > { %v1173_v13 = vmul.f32 %v4858_v44, %v5788_v48  ;;  %v4860_v37 = vpop.eup %4859  ;;  %v6694_v48 = vld [vmem:[#allocation25_spill] sm:$0xff]  ;;  %v6708_v44 = vld [vmem:[#allocation39_spill] sm:$0xff] }
 0x44c   : > { %v5893_v38 = vadd.f32 %v1174_v16, %v1173_v13  ;;  %v6709_v16 = vld [vmem:[#allocation40_spill] sm:$0xff]  ;;  %v6711_v13 = vld [vmem:[#allocation42_spill] sm:$0xff] }
 0x44e   : > { %4861 = vtanh.f32 %v5893_v38 }
 0x458   : > { %v4862_v34 = vpop.eup %4861 }
 0x459   : > { %v1177_v43 = vmul.f32 %v4862_v34, %v4860_v37  ;;  %v6712_v37 = vld [vmem:[#allocation43_spill] sm:$0xff]  ;;  %v6713_v34 = vld [vmem:[#allocation44_spill] sm:$0xff] }
 0x45b   : > { %1178 = vst [vmem:[#allocation6] sm:$0x2] %v1177_v43  ;;  %v1182_v56 = vrot.slane %v1177_v43, 6  ;;  %v6714_v43 = vld [vmem:[#allocation7_spill] sm:$0xff] }
 0x45d   : > { %v1184_v50 = vsel %vm421_vm0, %v5846_v39, %v1182_v56  ;;  %v6695_v39 = vld [vmem:[#allocation26_spill] sm:$0xff]  ;;  %v6715_v56 = vld [vmem:[#allocation8_spill] sm:$0xff] }
 0x45e   : > { %1250 = vmatmul.mubr.f32.vlgmr.msra.gmra.mrb[8].mxu0 %v1184_v50  ;;  %1321 = vmatmul.mubr.f32.vlgmr.msra.gmra.mrb[8].mxu1 %v1184_v50 }
 0x45f   : > { %4061 = vmatpush1.bf16.msra.mxu0 %v5436_v5  ;;  %4093 = vmatpush1.bf16.msra.mxu1 %v5445_v12 }
 0x460   : > { %4063 = vmatprep.subr.bf16.mxu0 %v5459_v22  ;;  %4095 = vmatprep.subr.bf16.mxu1 %v5470_v30 }
 0x461   : > { %1445 = vmatprep.mubr.f32.mxu0 %v6661_v6  ;;  %1516 = vmatprep.mubr.f32.mxu1 %v6661_v6 }
 0x463   : > { %4065 = vmatpush1.bf16.msra.mxu0 %v5472_v31  ;;  %4097 = vmatpush1.bf16.msra.mxu1 %v5484_v42 }
 0x464   : > { %4067 = vmatprep.subr.bf16.mxu0 %v5497_v49  ;;  %4099 = vmatprep.subr.bf16.mxu1 %v5499_v51 }
 0x467   : > { %4069 = vmatpush1.bf16.msra.mxu0 %v5511_v59  ;;  %4101 = vmatpush1.bf16.msra.mxu1 %v6664_v8 }
 0x468   : > { %4071 = vmatprep.subr.bf16.mxu0 %v6694_v48  ;;  %4103 = vmatprep.subr.bf16.mxu1 %v6695_v39 }
 0x46b   : > { %4073 = vmatpush1.bf16.msra.mxu0 %v6696_v25  ;;  %4105 = vmatpush1.bf16.msra.mxu1 %v6697_v24 }
 0x46c   : > { %4075 = vmatprep.subr.bf16.mxu0 %v6698_v63  ;;  %4107 = vmatprep.subr.bf16.mxu1 %v6699_v61 }
 0x46f   : > { %4077 = vmatpush1.bf16.msra.mxu0 %v6700_v3  ;;  %4109 = vmatpush1.bf16.msra.mxu1 %v6701_v62 }
 0x470   : > { %4079 = vmatprep.subr.bf16.mxu0 %v6702_v11  ;;  %4111 = vmatprep.subr.bf16.mxu1 %v6703_v33 }
 0x473   : > { %4081 = vmatpush1.bf16.msra.mxu0 %v6704_v29  ;;  %4113 = vmatpush1.bf16.msra.mxu1 %v6705_v15 }
 0x474   : > { %4083 = vmatprep.subr.bf16.mxu0 %v6706_v60  ;;  %4115 = vmatprep.subr.bf16.mxu1 %v6707_v46 }
 0x477   : > { %4085 = vmatpush1.bf16.msra.mxu0 %v6708_v44  ;;  %4117 = vmatpush1.bf16.msra.mxu1 %v6709_v16 }
 0x478   : > { %4087 = vmatprep.subr.bf16.mxu0 %v6710_v4  ;;  %4119 = vmatprep.subr.bf16.mxu1 %v6711_v13  ;;  %v3640_v13 = vld [vmem:[%s5119_s8 + $0x10] sm:$0xff] }
 0x47b   : > { %4089 = vmatpush1.bf16.msra.mxu0 %v6712_v37  ;;  %4121 = vmatpush1.bf16.msra.mxu1 %v6713_v34 }
 0x47c   : > { %4123 = vmatprep.subr.bf16.mxu0 %v6714_v43  ;;  %4155 = vmatprep.subr.bf16.mxu1 %v6715_v56 }
 0x531   : > { %v5932_v50 = vpop.f32.mrb[8].mxu0  ;;  %v5934_v46 = vpop.f32.mrb[8].mxu1 }
 0x532   : > { %v5936_v44 = vpop.f32.mrb[9].mxu0  ;;  %v5938_v60 = vpop.f32.mrb[9].mxu1 }
 0x533   : > { %v1331_v4 = vcombine.low %v5932_v50, %v5936_v44  ;;  %v1332_v37 = vcombine.low %v5934_v46, %v5938_v60 }
 0x535   : > { %v1339_v34 = vrot.slane %v1331_v4, %v5709_v55  ;;  %v1346_v43 = vrot.slane %v1332_v37, %v5709_v55 }
 0x537   : > { %v1347_v56 = vcombine.low %v1339_v34, %v1346_v43 }
 0x539   : > { %v1349_v16 = vadd.f32 %v3640_v13, %v1347_v56  ;;  %v6722_v56 = vld [vmem:[#allocation23_spill] sm:$0xff] }
 0x53b   : > { %v3641_v15 = vmul.f32 -1.442695, %v1349_v16  ;;  %v1357_v29 = vrot.slane %v1349_v16, 2  ;;  %v1368_v11 = vrot.slane %v1349_v16, 6  ;;  %v1365_v61 = vrot.slane %v1349_v16, 4  ;;  %v6721_v16 = vld [vmem:[#allocation22_spill] sm:$0xff] }
 0x53d   : > { %4863 = vpow2.f32 %v3641_v15  ;;  %v3642_v33 = vmul.f32 -1.442695, %v1357_v29  ;;  %v3643_v62 = vmul.f32 -1.442695, %v1368_v11 }
 0x53f   : > { %4865 = vpow2.f32 %v3642_v33 }
 0x540   : > { %4867 = vpow2.f32 %v3643_v62 }
 0x547   : > { %v4864_v3 = vpop.eup %4863 }
 0x548   : > { %v1353_v63 = vadd.f32 1.0, %v4864_v3 }
 0x549   : > { %v4866_v24 = vpop.eup %4865 }
 0x54a   : > { %4869 = vrcp.f32 %v1353_v63  ;;  %v1362_v25 = vadd.f32 1.0, %v4866_v24  ;;  %v4868_v4 = vpop.eup %4867  ;;  %v6718_v24 = vld [vmem:[#allocation19_spill] sm:$0xff]  ;;  %v6719_v63 = vld [vmem:[#allocation20_spill] sm:$0xff] }
 0x54b   : > { %4871 = vtanh.f32 %v1365_v61  ;;  %v1373_v43 = vadd.f32 1.0, %v4868_v4  ;;  %v6720_v61 = vld [vmem:[#allocation21_spill] sm:$0xff] }
 0x54c   : > { %4873 = vrcp.f32 %v1362_v25  ;;  %v6717_v25 = vld [vmem:[#allocation18_spill] sm:$0xff] }
 0x54d   : > { %4875 = vrcp.f32 %v1373_v43  ;;  %v6723_v43 = vld [vmem:[#allocation45_spill] sm:$0xff] }
 0x554   : > { %v4870_v37 = vpop.eup %4869 }
 0x555   : > { %v4872_v34 = vpop.eup %4871 }
 0x556   : > { %v4874_v13 = vpop.eup %4873  ;;  %v1377_v29 = vmul.f32 %v4872_v34, %v4870_v37  ;;  %v1523_v34 = vrot.slane %v5932_v50, 2 }
 0x557   : > { %v1376_v15 = vmul.f32 %v4874_v13, %v5843_v57  ;;  %v4876_v3 = vpop.eup %4875  ;;  %v6716_v57 = vld [vmem:[#allocation17_spill] sm:$0xff]  ;;  %v1525_v13 = vrot.slane %v5934_v46, 2 }
 0x559   : > { %v5948_v33 = vadd.f32 %v1377_v29, %v1376_v15  ;;  %v6724_v29 = vld [vmem:[#allocation46_spill] sm:$0xff] }
 0x55b   : > { %4877 = vtanh.f32 %v5948_v33 }
 0x565   : > { %v4878_v11 = vpop.eup %4877 }
 0x566   : > { %v5951_v62 = vmul.f32 %v4878_v11, %v4876_v3 }
 0x568   : > { %1446 = vmatmul.mubr.f32.vlgmr.msra.gmra.mrb[10].mxu0 %v5951_v62  ;;  %1517 = vmatmul.mubr.f32.vlgmr.msra.gmra.mrb[10].mxu1 %v5951_v62 }
 0x569   : > { %4125 = vmatpush1.bf16.msra.mxu0 %v5145_v10  ;;  %4157 = vmatpush1.bf16.msra.mxu1 %v5157_v14 }
 0x56a   : > { %4127 = vmatprep.subr.bf16.mxu0 %v5170_v18  ;;  %4159 = vmatprep.subr.bf16.mxu1 %v5172_v19 }
 0x56b   : > { %1630 = vmatprep.mubr.f32.mxu0 %v6661_v6  ;;  %1701 = vmatprep.mubr.f32.mxu1 %v6661_v6 }
 0x56d   : > { %4129 = vmatpush1.bf16.msra.mxu0 %v5184_v23  ;;  %4161 = vmatpush1.bf16.msra.mxu1 %v5197_v27 }
 0x56e   : > { %4131 = vmatprep.subr.bf16.mxu0 %v5199_v28  ;;  %4163 = vmatprep.subr.bf16.mxu1 %v5210_v32 }
 0x571   : > { %4133 = vmatpush1.bf16.msra.mxu0 %v5222_v36  ;;  %4165 = vmatpush1.bf16.msra.mxu1 %v5235_v40 }
 0x572   : > { %4135 = vmatprep.subr.bf16.mxu0 %v5237_v41  ;;  %4167 = vmatprep.subr.bf16.mxu1 %v5249_v45 }
 0x575   : > { %4137 = vmatpush1.bf16.msra.mxu0 %v5270_v52  ;;  %4169 = vmatpush1.bf16.msra.mxu1 %v5274_v53 }
 0x576   : > { %4139 = vmatprep.subr.bf16.mxu0 %v5276_v54  ;;  %4171 = vmatprep.subr.bf16.mxu1 %v5288_v58 }
 0x579   : > { %4141 = vmatpush1.bf16.msra.mxu0 %v5306_v0  ;;  %4173 = vmatpush1.bf16.msra.mxu1 %v5310_v1 }
 0x57a   : > { %4143 = vmatprep.subr.bf16.mxu0 %v5312_v2  ;;  %4175 = vmatprep.subr.bf16.mxu1 %v5324_v7 }
 0x57d   : > { %4145 = vmatpush1.bf16.msra.mxu0 %v5342_v17  ;;  %4177 = vmatpush1.bf16.msra.mxu1 %v5346_v20 }
 0x57e   : > { %4147 = vmatprep.subr.bf16.mxu0 %v5348_v21  ;;  %4179 = vmatprep.subr.bf16.mxu1 %v5360_v26 }
 0x581   : > { %4149 = vmatpush1.bf16.msra.mxu0 %v5378_v35  ;;  %4181 = vmatpush1.bf16.msra.mxu1 %v6716_v57 }
 0x582   : > { %4151 = vmatprep.subr.bf16.mxu0 %v6717_v25  ;;  %4183 = vmatprep.subr.bf16.mxu1 %v6718_v24 }
 0x585   : > { %4153 = vmatpush1.bf16.msra.mxu0 %v6719_v63  ;;  %4185 = vmatpush1.bf16.msra.mxu1 %v6720_v61  ;;  %v1524_v63 = vrot.slane %v5936_v44, 2  ;;  %v1526_v61 = vrot.slane %v5938_v60, 2 }
 0x586   : > { %4187 = vmatprep.subr.bf16.mxu0 %v6721_v16  ;;  %4219 = vmatprep.subr.bf16.mxu1 %v6722_v56 }
 0x63b   : > { %v1447_v4 = vpop.f32.mrb[10].mxu0  ;;  %v1518_v37 = vpop.f32.mrb[10].mxu1 }
 0x63c   : > { %v1448_v15 = vadd.f32 %v1447_v4, %v6723_v43  ;;  %v1519_v3 = vadd.f32 %v1518_v37, %v6724_v29  ;;  %v1449_v11 = vpop.f32.mrb[11].mxu0  ;;  %v1520_v24 = vpop.f32.mrb[11].mxu1 }
 0x63d   : > { %v1450_v16 = vadd.f32 %v1449_v11, %v5776_v9  ;;  %v1521_v56 = vadd.f32 %v1520_v24, %v5778_v47 }
 0x63e   : > { %v1531_v25 = vadd.f32 %v1523_v34, %v1448_v15  ;;  %v1533_v57 = vadd.f32 %v1525_v13, %v1519_v3  ;;  %v6728_v15 = vld [vmem:[#allocation30_spill] sm:$0xff]  ;;  %v6730_v3 = vld [vmem:[#allocation32_spill] sm:$0xff] }
 0x63f   : > { %v1532_v35 = vadd.f32 %v1524_v63, %v1450_v16  ;;  %v1534_v50 = vadd.f32 %v1526_v61, %v1521_v56 }
 0x640   : > { %v3644_v26 = vmul.f32 -1.442695, %v1531_v25 }
 0x641   : > { %v3645_v46 = vmul.f32 -1.442695, %v1532_v35  ;;  %v3646_v4 = vmul.f32 -1.442695, %v1534_v50  ;;  %v6731_v50 = vld [vmem:[#allocation33_spill] sm:$0xff] }
 0x642   : > { %4879 = vpow2.f32 %v3644_v26 }
 0x643   : > { %4881 = vpow2.f32 %v3645_v46  ;;  %v6732_v46 = vld [vmem:[#allocation34_spill] sm:$0xff] }
 0x644   : > { %4883 = vpow2.f32 %v3646_v4  ;;  %v6733_v4 = vld [vmem:[#allocation35_spill] sm:$0xff] }
 0x645   : > { %4885 = vtanh.f32 %v1533_v57 }
 0x64c   : > { %v4880_v37 = vpop.eup %4879 }
 0x64d   : > { %v4882_v29 = vpop.eup %4881  ;;  %v1538_v43 = vadd.f32 1.0, %v4880_v37  ;;  %v6734_v37 = vld [vmem:[#allocation36_spill] sm:$0xff] }
 0x64e   : > { %v1544_v44 = vadd.f32 1.0, %v4882_v29  ;;  %v4884_v60 = vpop.eup %4883  ;;  %v6729_v29 = vld [vmem:[#allocation31_spill] sm:$0xff] }
 0x64f   : > { %4887 = vrcp.f32 %v1538_v43  ;;  %v4886_v11 = vpop.eup %4885  ;;  %v1551_v63 = vadd.f32 1.0, %v4884_v60  ;;  %v6727_v43 = vld [vmem:[#allocation29_spill] sm:$0xff]  ;;  %v6736_v60 = vld [vmem:[#allocation38_spill] sm:$0xff] }
 0x650   : > { %4889 = vrcp.f32 %v1544_v44  ;;  %v6735_v44 = vld [vmem:[#allocation37_spill] sm:$0xff] }
 0x651   : > { %4891 = vrcp.f32 %v1551_v63  ;;  %v6741_v63 = vld [vmem:[#allocation43_spill] sm:$0xff] }
 0x659   : > { %v4888_v24 = vpop.eup %4887 }
 0x65a   : > { %v4890_v34 = vpop.eup %4889  ;;  %v1555_v13 = vmul.f32 %v4888_v24, %v4886_v11  ;;  %v6737_v11 = vld [vmem:[#allocation39_spill] sm:$0xff]  ;;  %v6738_v24 = vld [vmem:[#allocation40_spill] sm:$0xff] }
 0x65b   : > { %v1554_v25 = vmul.f32 %v4890_v34, %v5893_v38  ;;  %v4892_v26 = vpop.eup %4891  ;;  %v6725_v38 = vld [vmem:[#allocation27_spill] sm:$0xff]  ;;  %v6739_v34 = vld [vmem:[#allocation41_spill] sm:$0xff] }
 0x65d   : > { %v5998_v35 = vadd.f32 %v1555_v13, %v1554_v25  ;;  %v6740_v13 = vld [vmem:[#allocation42_spill] sm:$0xff]  ;;  %v6742_v25 = vld [vmem:[#allocation44_spill] sm:$0xff] }
 0x65f   : > { %4893 = vtanh.f32 %v5998_v35 }
 0x669   : > { %v4894_v61 = vpop.eup %4893 }
 0x66a   : > { %v1558_v16 = vmul.f32 %v4894_v61, %v4892_v26  ;;  %v6743_v26 = vld [vmem:[#allocation7_spill] sm:$0xff]  ;;  %v6744_v61 = vld [vmem:[#allocation8_spill] sm:$0xff] }
 0x66c   : > { %1559 = vst [vmem:[#allocation6 + $0x1] sm:$0x2] %v1558_v16  ;;  %v1563_v57 = vrot.slane %v1558_v16, 6 }
 0x66e   : > { %v1565_v56 = vsel %vm421_vm0, %v5951_v62, %v1563_v57  ;;  %v6726_v62 = vld [vmem:[#allocation28_spill] sm:$0xff] }
 0x66f   : > { %1631 = vmatmul.mubr.f32.vlgmr.msra.gmra.mrb[12].mxu0 %v1565_v56  ;;  %1702 = vmatmul.mubr.f32.vlgmr.msra.gmra.mrb[12].mxu1 %v1565_v56 }
 0x670   : > { %4189 = vmatpush1.bf16.msra.mxu0 %v5436_v5  ;;  %4221 = vmatpush1.bf16.msra.mxu1 %v5445_v12 }
 0x671   : > { %4191 = vmatprep.subr.bf16.mxu0 %v5459_v22  ;;  %4223 = vmatprep.subr.bf16.mxu1 %v5470_v30 }
 0x672   : > { %1826 = vmatprep.mubr.f32.mxu0 %v6661_v6  ;;  %1897 = vmatprep.mubr.f32.mxu1 %v6661_v6 }
 0x674   : > { %4193 = vmatpush1.bf16.msra.mxu0 %v5472_v31  ;;  %4225 = vmatpush1.bf16.msra.mxu1 %v5484_v42 }
 0x675   : > { %4195 = vmatprep.subr.bf16.mxu0 %v5497_v49  ;;  %4227 = vmatprep.subr.bf16.mxu1 %v5499_v51 }
 0x678   : > { %4197 = vmatpush1.bf16.msra.mxu0 %v5511_v59  ;;  %4229 = vmatpush1.bf16.msra.mxu1 %v6664_v8 }
 0x679   : > { %4199 = vmatprep.subr.bf16.mxu0 %v6694_v48  ;;  %4231 = vmatprep.subr.bf16.mxu1 %v6695_v39 }
 0x67c   : > { %4201 = vmatpush1.bf16.msra.mxu0 %v6725_v38  ;;  %4233 = vmatpush1.bf16.msra.mxu1 %v6726_v62 }
 0x67d   : > { %4203 = vmatprep.subr.bf16.mxu0 %v6727_v43  ;;  %4235 = vmatprep.subr.bf16.mxu1 %v6728_v15 }
 0x680   : > { %4205 = vmatpush1.bf16.msra.mxu0 %v6729_v29  ;;  %4237 = vmatpush1.bf16.msra.mxu1 %v6730_v3 }
 0x681   : > { %4207 = vmatprep.subr.bf16.mxu0 %v6731_v50  ;;  %4239 = vmatprep.subr.bf16.mxu1 %v6732_v46 }
 0x684   : > { %4209 = vmatpush1.bf16.msra.mxu0 %v6733_v4  ;;  %4241 = vmatpush1.bf16.msra.mxu1 %v6734_v37 }
 0x685   : > { %4211 = vmatprep.subr.bf16.mxu0 %v6735_v44  ;;  %4243 = vmatprep.subr.bf16.mxu1 %v6736_v60 }
 0x688   : > { %4213 = vmatpush1.bf16.msra.mxu0 %v6737_v11  ;;  %4245 = vmatpush1.bf16.msra.mxu1 %v6738_v24 }
 0x689   : > { %4215 = vmatprep.subr.bf16.mxu0 %v6739_v34  ;;  %4247 = vmatprep.subr.bf16.mxu1 %v6740_v13  ;;  %v3647_v13 = vld [vmem:[%s5119_s8 + $0x18] sm:$0xff] }
 0x68c   : > { %4217 = vmatpush1.bf16.msra.mxu0 %v6741_v63  ;;  %4249 = vmatpush1.bf16.msra.mxu1 %v6742_v25 }
 0x68d   : > { %4251 = vmatprep.subr.bf16.mxu0 %v6743_v26  ;;  %4283 = vmatprep.subr.bf16.mxu1 %v6744_v61 }
 0x742   : > { %v6037_v16 = vpop.f32.mrb[12].mxu0  ;;  %v6039_v57 = vpop.f32.mrb[12].mxu1 }
 0x743   : > { %v6041_v56 = vpop.f32.mrb[13].mxu0  ;;  %v6043_v11 = vpop.f32.mrb[13].mxu1 }
 0x744   : > { %v1712_v34 = vcombine.low %v6037_v16, %v6041_v56  ;;  %v1713_v63 = vcombine.low %v6039_v57, %v6043_v11 }
 0x746   : > { %v1720_v25 = vrot.slane %v1712_v34, %v5709_v55  ;;  %v1727_v26 = vrot.slane %v1713_v63, %v5709_v55 }
 0x748   : > { %v1728_v61 = vcombine.low %v1720_v25, %v1727_v26 }
 0x74a   : > { %v1730_v24 = vadd.f32 %v3647_v13, %v1728_v61  ;;  %v6751_v61 = vld [vmem:[#allocation21_spill] sm:$0xff] }
 0x74c   : > { %v3648_v60 = vmul.f32 -1.442695, %v1730_v24  ;;  %v1738_v44 = vrot.slane %v1730_v24, 2  ;;  %v1749_v4 = vrot.slane %v1730_v24, 6  ;;  %v1746_v3 = vrot.slane %v1730_v24, 4  ;;  %v6750_v24 = vld [vmem:[#allocation20_spill] sm:$0xff] }
 0x74e   : > { %4895 = vpow2.f32 %v3648_v60  ;;  %v3649_v37 = vmul.f32 -1.442695, %v1738_v44  ;;  %v3650_v46 = vmul.f32 -1.442695, %v1749_v4 }
 0x750   : > { %4897 = vpow2.f32 %v3649_v37 }
 0x751   : > { %4899 = vpow2.f32 %v3650_v46 }
 0x758   : > { %v4896_v50 = vpop.eup %4895 }
 0x759   : > { %v1734_v29 = vadd.f32 1.0, %v4896_v50 }
 0x75a   : > { %v4898_v15 = vpop.eup %4897 }
 0x75b   : > { %4901 = vrcp.f32 %v1734_v29  ;;  %v1743_v43 = vadd.f32 1.0, %v4898_v15  ;;  %v4900_v34 = vpop.eup %4899  ;;  %v6747_v15 = vld [vmem:[#allocation17_spill] sm:$0xff]  ;;  %v6748_v29 = vld [vmem:[#allocation18_spill] sm:$0xff] }
 0x75c   : > { %4903 = vtanh.f32 %v1746_v3  ;;  %v1754_v26 = vadd.f32 1.0, %v4900_v34  ;;  %v6749_v3 = vld [vmem:[#allocation19_spill] sm:$0xff]  ;;  %v6752_v34 = vld [vmem:[#allocation22_spill] sm:$0xff] }
 0x75d   : > { %4905 = vrcp.f32 %v1743_v43  ;;  %v6746_v43 = vld [vmem:[#allocation16_spill] sm:$0xff] }
 0x75e   : > { %4907 = vrcp.f32 %v1754_v26  ;;  %v1904_v26 = vrot.slane %v6037_v16, 2 }
 0x765   : > { %v4902_v63 = vpop.eup %4901 }
 0x766   : > { %v4904_v25 = vpop.eup %4903 }
 0x767   : > { %v4906_v13 = vpop.eup %4905  ;;  %v1758_v44 = vmul.f32 %v4904_v25, %v4902_v63  ;;  %v6753_v63 = vld [vmem:[#allocation23_spill] sm:$0xff] }
 0x768   : > { %v1757_v60 = vmul.f32 %v4906_v13, %v5948_v33  ;;  %v4908_v50 = vpop.eup %4907  ;;  %v6745_v33 = vld [vmem:[#allocation15_spill] sm:$0xff] }
 0x76a   : > { %v6053_v37 = vadd.f32 %v1758_v44, %v1757_v60  ;;  %v1906_v60 = vrot.slane %v6039_v57, 2  ;;  %v6754_v44 = vld [vmem:[#allocation45_spill] sm:$0xff] }
 0x76c   : > { %4909 = vtanh.f32 %v6053_v37 }
 0x776   : > { %v4910_v4 = vpop.eup %4909 }
 0x777   : > { %v6056_v46 = vmul.f32 %v4910_v4, %v4908_v50  ;;  %v6755_v4 = vld [vmem:[#allocation46_spill] sm:$0xff] }
 0x779   : > { %1827 = vmatmul.mubr.f32.vlgmr.msra.gmra.mrb[14].mxu0 %v6056_v46  ;;  %1898 = vmatmul.mubr.f32.vlgmr.msra.gmra.mrb[14].mxu1 %v6056_v46 }
 0x77a   : > { %4253 = vmatpush1.bf16.msra.mxu0 %v5145_v10  ;;  %4285 = vmatpush1.bf16.msra.mxu1 %v5157_v14 }
 0x77b   : > { %4255 = vmatprep.subr.bf16.mxu0 %v5170_v18  ;;  %4287 = vmatprep.subr.bf16.mxu1 %v5172_v19 }
 0x77c   : > { %2011 = vmatprep.mubr.f32.mxu0 %v6661_v6  ;;  %2082 = vmatprep.mubr.f32.mxu1 %v6661_v6 }
 0x77e   : > { %4257 = vmatpush1.bf16.msra.mxu0 %v5184_v23  ;;  %4289 = vmatpush1.bf16.msra.mxu1 %v5197_v27 }
 0x77f   : > { %4259 = vmatprep.subr.bf16.mxu0 %v5199_v28  ;;  %4291 = vmatprep.subr.bf16.mxu1 %v5210_v32 }
 0x782   : > { %4261 = vmatpush1.bf16.msra.mxu0 %v5222_v36  ;;  %4293 = vmatpush1.bf16.msra.mxu1 %v5235_v40 }
 0x783   : > { %4263 = vmatprep.subr.bf16.mxu0 %v5237_v41  ;;  %4295 = vmatprep.subr.bf16.mxu1 %v5249_v45 }
 0x786   : > { %4265 = vmatpush1.bf16.msra.mxu0 %v5270_v52  ;;  %4297 = vmatpush1.bf16.msra.mxu1 %v5274_v53 }
 0x787   : > { %4267 = vmatprep.subr.bf16.mxu0 %v5276_v54  ;;  %4299 = vmatprep.subr.bf16.mxu1 %v5288_v58 }
 0x78a   : > { %4269 = vmatpush1.bf16.msra.mxu0 %v5306_v0  ;;  %4301 = vmatpush1.bf16.msra.mxu1 %v5310_v1 }
 0x78b   : > { %4271 = vmatprep.subr.bf16.mxu0 %v5312_v2  ;;  %4303 = vmatprep.subr.bf16.mxu1 %v5324_v7 }
 0x78e   : > { %4273 = vmatpush1.bf16.msra.mxu0 %v5342_v17  ;;  %4305 = vmatpush1.bf16.msra.mxu1 %v5346_v20 }
 0x78f   : > { %4275 = vmatprep.subr.bf16.mxu0 %v5348_v21  ;;  %4307 = vmatprep.subr.bf16.mxu1 %v6745_v33 }
 0x792   : > { %4277 = vmatpush1.bf16.msra.mxu0 %v6746_v43  ;;  %4309 = vmatpush1.bf16.msra.mxu1 %v6747_v15 }
 0x793   : > { %4279 = vmatprep.subr.bf16.mxu0 %v6748_v29  ;;  %4311 = vmatprep.subr.bf16.mxu1 %v6749_v3 }
 0x796   : > { %4281 = vmatpush1.bf16.msra.mxu0 %v6750_v24  ;;  %4313 = vmatpush1.bf16.msra.mxu1 %v6751_v61  ;;  %v1905_v24 = vrot.slane %v6041_v56, 2  ;;  %v1907_v61 = vrot.slane %v6043_v11, 2 }
 0x797   : > { %4315 = vmatprep.subr.bf16.mxu0 %v6752_v34  ;;  %4347 = vmatprep.subr.bf16.mxu1 %v6753_v63 }
 0x84c   : > { %v1828_v25 = vpop.f32.mrb[14].mxu0  ;;  %v1899_v13 = vpop.f32.mrb[14].mxu1 }
 0x84d   : > { %v1829_v50 = vadd.f32 %v1828_v25, %v6754_v44  ;;  %v1900_v29 = vadd.f32 %v1899_v13, %v6755_v4  ;;  %v1830_v15 = vpop.f32.mrb[15].mxu0  ;;  %v1901_v3 = vpop.f32.mrb[15].mxu1 }
 0x84e   : > { %v1831_v34 = vadd.f32 %v1830_v15, %v5776_v9  ;;  %v1902_v63 = vadd.f32 %v1901_v3, %v5778_v47 }
 0x84f   : > { %v1912_v43 = vadd.f32 %v1904_v26, %v1829_v50  ;;  %v1914_v33 = vadd.f32 %v1906_v60, %v1900_v29  ;;  %v6758_v60 = vld [vmem:[#allocation31_spill] sm:$0xff]  ;;  %v6760_v50 = vld [vmem:[#allocation33_spill] sm:$0xff] }
 0x850   : > { %v1913_v21 = vadd.f32 %v1905_v24, %v1831_v34  ;;  %v1915_v16 = vadd.f32 %v1907_v61, %v1902_v63 }
 0x851   : > { %v3651_v20 = vmul.f32 -1.442695, %v1912_v43 }
 0x852   : > { %v3652_v57 = vmul.f32 -1.442695, %v1913_v21  ;;  %v3653_v25 = vmul.f32 -1.442695, %v1915_v16  ;;  %v6762_v16 = vld [vmem:[#allocation35_spill] sm:$0xff] }
 0x853   : > { %4911 = vpow2.f32 %v3651_v20 }
 0x854   : > { %4913 = vpow2.f32 %v3652_v57  ;;  %v6763_v57 = vld [vmem:[#allocation36_spill] sm:$0xff] }
 0x855   : > { %4915 = vpow2.f32 %v3653_v25  ;;  %v6764_v25 = vld [vmem:[#allocation37_spill] sm:$0xff] }
 0x856   : > { %4917 = vtanh.f32 %v1914_v33 }
 0x85d   : > { %v4912_v13 = vpop.eup %4911 }
 0x85e   : > { %v4914_v4 = vpop.eup %4913  ;;  %v1919_v44 = vadd.f32 1.0, %v4912_v13  ;;  %v6765_v13 = vld [vmem:[#allocation38_spill] sm:$0xff] }
 0x85f   : > { %v1925_v56 = vadd.f32 1.0, %v4914_v4  ;;  %v4916_v11 = vpop.eup %4915  ;;  %v6761_v4 = vld [vmem:[#allocation34_spill] sm:$0xff] }
 0x860   : > { %4919 = vrcp.f32 %v1919_v44  ;;  %v4918_v15 = vpop.eup %4917  ;;  %v1932_v24 = vadd.f32 1.0, %v4916_v11  ;;  %v6759_v44 = vld [vmem:[#allocation32_spill] sm:$0xff] }
 0x861   : > { %4921 = vrcp.f32 %v1925_v56  ;;  %v6766_v56 = vld [vmem:[#allocation39_spill] sm:$0xff]  ;;  %v6767_v11 = vld [vmem:[#allocation40_spill] sm:$0xff] }
 0x862   : > { %4923 = vrcp.f32 %v1932_v24  ;;  %v6772_v24 = vld [vmem:[#allocation7_spill] sm:$0xff] }
 0x86a   : > { %v4920_v3 = vpop.eup %4919 }
 0x86b   : > { %v4922_v26 = vpop.eup %4921  ;;  %v1936_v29 = vmul.f32 %v4920_v3, %v4918_v15  ;;  %v6768_v15 = vld [vmem:[#allocation41_spill] sm:$0xff]  ;;  %v6769_v3 = vld [vmem:[#allocation42_spill] sm:$0xff] }
 0x86c   : > { %v1935_v43 = vmul.f32 %v4922_v26, %v5998_v35  ;;  %v4924_v20 = vpop.eup %4923  ;;  %v6756_v35 = vld [vmem:[#allocation29_spill] sm:$0xff]  ;;  %v6770_v26 = vld [vmem:[#allocation43_spill] sm:$0xff] }
 0x86e   : > { %v6103_v21 = vadd.f32 %v1936_v29, %v1935_v43  ;;  %v6771_v29 = vld [vmem:[#allocation44_spill] sm:$0xff] }
 0x86f   : > { %v6773_v43 = vld [vmem:[#allocation8_spill] sm:$0xff] }
 0x870   : > { %4925 = vtanh.f32 %v6103_v21 }
 0x87a   : > { %v4926_v61 = vpop.eup %4925 }
 0x87b   : > { %v1939_v34 = vmul.f32 %v4926_v61, %v4924_v20 }
 0x87d   : > { %1940 = vst [vmem:[#allocation6 + $0x2] sm:$0x2] %v1939_v34  ;;  %v1944_v33 = vrot.slane %v1939_v34, 6 }
 0x87f   : > { %v1946_v63 = vsel %vm421_vm0, %v6056_v46, %v1944_v33  ;;  %v6757_v46 = vld [vmem:[#allocation30_spill] sm:$0xff] }
 0x880   : > { %2012 = vmatmul.mubr.f32.vlgmr.msra.gmra.mrb[16].mxu0 %v1946_v63  ;;  %2083 = vmatmul.mubr.f32.vlgmr.msra.gmra.mrb[16].mxu1 %v1946_v63 }
 0x881   : > { %4317 = vmatpush1.bf16.msra.mxu0 %v5436_v5  ;;  %4349 = vmatpush1.bf16.msra.mxu1 %v5445_v12 }
 0x882   : > { %4319 = vmatprep.subr.bf16.mxu0 %v5459_v22  ;;  %4351 = vmatprep.subr.bf16.mxu1 %v5470_v30 }
 0x883   : > { %2207 = vmatprep.mubr.f32.mxu0 %v6661_v6  ;;  %2278 = vmatprep.mubr.f32.mxu1 %v6661_v6 }
 0x885   : > { %4321 = vmatpush1.bf16.msra.mxu0 %v5472_v31  ;;  %4353 = vmatpush1.bf16.msra.mxu1 %v5484_v42 }
 0x886   : > { %4323 = vmatprep.subr.bf16.mxu0 %v5497_v49  ;;  %4355 = vmatprep.subr.bf16.mxu1 %v5499_v51 }
 0x889   : > { %4325 = vmatpush1.bf16.msra.mxu0 %v5511_v59  ;;  %4357 = vmatpush1.bf16.msra.mxu1 %v6664_v8 }
 0x88a   : > { %4327 = vmatprep.subr.bf16.mxu0 %v6694_v48  ;;  %4359 = vmatprep.subr.bf16.mxu1 %v6695_v39 }
 0x88d   : > { %4329 = vmatpush1.bf16.msra.mxu0 %v6725_v38  ;;  %4361 = vmatpush1.bf16.msra.mxu1 %v6726_v62 }
 0x88e   : > { %4331 = vmatprep.subr.bf16.mxu0 %v6756_v35  ;;  %4363 = vmatprep.subr.bf16.mxu1 %v6757_v46 }
 0x891   : > { %4333 = vmatpush1.bf16.msra.mxu0 %v6758_v60  ;;  %4365 = vmatpush1.bf16.msra.mxu1 %v6759_v44 }
 0x892   : > { %4335 = vmatprep.subr.bf16.mxu0 %v6760_v50  ;;  %4367 = vmatprep.subr.bf16.mxu1 %v6761_v4 }
 0x895   : > { %4337 = vmatpush1.bf16.msra.mxu0 %v6762_v16  ;;  %4369 = vmatpush1.bf16.msra.mxu1 %v6763_v57 }
 0x896   : > { %4339 = vmatprep.subr.bf16.mxu0 %v6764_v25  ;;  %4371 = vmatprep.subr.bf16.mxu1 %v6765_v13 }
 0x899   : > { %4341 = vmatpush1.bf16.msra.mxu0 %v6766_v56  ;;  %4373 = vmatpush1.bf16.msra.mxu1 %v6767_v11 }
 0x89a   : > { %4343 = vmatprep.subr.bf16.mxu0 %v6768_v15  ;;  %4375 = vmatprep.subr.bf16.mxu1 %v6769_v3  ;;  %v3654_v3 = vld [vmem:[%s5119_s8 + $0x20] sm:$0xff] }
 0x89d   : > { %4345 = vmatpush1.bf16.msra.mxu0 %v6770_v26  ;;  %4377 = vmatpush1.bf16.msra.mxu1 %v6771_v29 }
 0x89e   : > { %4379 = vmatprep.subr.bf16.mxu0 %v6772_v24  ;;  %4411 = vmatprep.subr.bf16.mxu1 %v6773_v43 }
 0x953   : > { %v6142_v20 = vpop.f32.mrb[16].mxu0  ;;  %v6144_v61 = vpop.f32.mrb[16].mxu1 }
 0x954   : > { %v6146_v34 = vpop.f32.mrb[17].mxu0  ;;  %v6148_v33 = vpop.f32.mrb[17].mxu1 }
 0x955   : > { %v2093_v63 = vcombine.low %v6142_v20, %v6146_v34  ;;  %v2094_v26 = vcombine.low %v6144_v61, %v6148_v33 }
 0x957   : > { %v2101_v29 = vrot.slane %v2093_v63, %v5709_v55  ;;  %v2108_v24 = vrot.slane %v2094_v26, %v5709_v55 }
 0x959   : > { %v2109_v43 = vcombine.low %v2101_v29, %v2108_v24 }
 0x95b   : > { %v2111_v15 = vadd.f32 %v3654_v3, %v2109_v43  ;;  %v6780_v43 = vld [vmem:[#allocation19_spill] sm:$0xff] }
 0x95d   : > { %v3655_v11 = vmul.f32 -1.442695, %v2111_v15  ;;  %v2119_v56 = vrot.slane %v2111_v15, 2  ;;  %v2130_v25 = vrot.slane %v2111_v15, 6  ;;  %v2127_v4 = vrot.slane %v2111_v15, 4  ;;  %v6779_v15 = vld [vmem:[#allocation18_spill] sm:$0xff] }
 0x95f   : > { %4927 = vpow2.f32 %v3655_v11  ;;  %v3656_v13 = vmul.f32 -1.442695, %v2119_v56  ;;  %v3657_v57 = vmul.f32 -1.442695, %v2130_v25 }
 0x961   : > { %4929 = vpow2.f32 %v3656_v13 }
 0x962   : > { %4931 = vpow2.f32 %v3657_v57 }
 0x969   : > { %v4928_v16 = vpop.eup %4927 }
 0x96a   : > { %v2115_v50 = vadd.f32 1.0, %v4928_v16 }
 0x96b   : > { %v4930_v44 = vpop.eup %4929 }
 0x96c   : > { %4933 = vrcp.f32 %v2115_v50  ;;  %v2124_v60 = vadd.f32 1.0, %v4930_v44  ;;  %v4932_v26 = vpop.eup %4931  ;;  %v6776_v44 = vld [vmem:[#allocation15_spill] sm:$0xff]  ;;  %v6777_v50 = vld [vmem:[#allocation16_spill] sm:$0xff] }
 0x96d   : > { %4935 = vtanh.f32 %v2127_v4  ;;  %v2135_v24 = vadd.f32 1.0, %v4932_v26  ;;  %v6778_v4 = vld [vmem:[#allocation17_spill] sm:$0xff]  ;;  %v6781_v26 = vld [vmem:[#allocation20_spill] sm:$0xff] }
 0x96e   : > { %4937 = vrcp.f32 %v2124_v60  ;;  %v6775_v60 = vld [vmem:[#allocation14_spill] sm:$0xff] }
 0x96f   : > { %4939 = vrcp.f32 %v2135_v24 }
 0x976   : > { %v4934_v63 = vpop.eup %4933 }
 0x977   : > { %v4936_v29 = vpop.eup %4935 }
 0x978   : > { %v4938_v3 = vpop.eup %4937  ;;  %v2139_v56 = vmul.f32 %v4936_v29, %v4934_v63  ;;  %v6782_v63 = vld [vmem:[#allocation21_spill] sm:$0xff]  ;;  %v6783_v29 = vld [vmem:[#allocation22_spill] sm:$0xff] }
 0x979   : > { %v2138_v11 = vmul.f32 %v4938_v3, %v6053_v37  ;;  %v4940_v16 = vpop.eup %4939  ;;  %v6774_v37 = vld [vmem:[#allocation13_spill] sm:$0xff]  ;;  %v6784_v3 = vld [vmem:[#allocation23_spill] sm:$0xff] }
 0x97b   : > { %v6158_v13 = vadd.f32 %v2139_v56, %v2138_v11  ;;  %v2285_v56 = vrot.slane %v6142_v20, 2 }
 0x97d   : > { %4941 = vtanh.f32 %v6158_v13 }
 0x987   : > { %v4942_v25 = vpop.eup %4941 }
 0x988   : > { %v6161_v57 = vmul.f32 %v4942_v25, %v4940_v16  ;;  %v2287_v16 = vrot.slane %v6144_v61, 2  ;;  %v6785_v25 = vld [vmem:[#allocation45_spill] sm:$0xff] }
 0x98a   : > { %2208 = vmatmul.mubr.f32.vlgmr.msra.gmra.mrb[18].mxu0 %v6161_v57  ;;  %2279 = vmatmul.mubr.f32.vlgmr.msra.gmra.mrb[18].mxu1 %v6161_v57 }
 0x98b   : > { %4381 = vmatpush1.bf16.msra.mxu0 %v5145_v10  ;;  %4413 = vmatpush1.bf16.msra.mxu1 %v5157_v14 }
 0x98c   : > { %4383 = vmatprep.subr.bf16.mxu0 %v5170_v18  ;;  %4415 = vmatprep.subr.bf16.mxu1 %v5172_v19 }
 0x98d   : > { %2392 = vmatprep.mubr.f32.mxu0 %v6661_v6  ;;  %2463 = vmatprep.mubr.f32.mxu1 %v6661_v6 }
 0x98f   : > { %4385 = vmatpush1.bf16.msra.mxu0 %v5184_v23  ;;  %4417 = vmatpush1.bf16.msra.mxu1 %v5197_v27 }
 0x990   : > { %4387 = vmatprep.subr.bf16.mxu0 %v5199_v28  ;;  %4419 = vmatprep.subr.bf16.mxu1 %v5210_v32 }
 0x993   : > { %4389 = vmatpush1.bf16.msra.mxu0 %v5222_v36  ;;  %4421 = vmatpush1.bf16.msra.mxu1 %v5235_v40 }
 0x994   : > { %4391 = vmatprep.subr.bf16.mxu0 %v5237_v41  ;;  %4423 = vmatprep.subr.bf16.mxu1 %v5249_v45 }
 0x997   : > { %4393 = vmatpush1.bf16.msra.mxu0 %v5270_v52  ;;  %4425 = vmatpush1.bf16.msra.mxu1 %v5274_v53 }
 0x998   : > { %4395 = vmatprep.subr.bf16.mxu0 %v5276_v54  ;;  %4427 = vmatprep.subr.bf16.mxu1 %v5288_v58 }
 0x99b   : > { %4397 = vmatpush1.bf16.msra.mxu0 %v5306_v0  ;;  %4429 = vmatpush1.bf16.msra.mxu1 %v5310_v1 }
 0x99c   : > { %4399 = vmatprep.subr.bf16.mxu0 %v5312_v2  ;;  %4431 = vmatprep.subr.bf16.mxu1 %v5324_v7 }
 0x99f   : > { %4401 = vmatpush1.bf16.msra.mxu0 %v5342_v17  ;;  %4433 = vmatpush1.bf16.msra.mxu1 %v6774_v37 }
 0x9a0   : > { %4403 = vmatprep.subr.bf16.mxu0 %v6775_v60  ;;  %4435 = vmatprep.subr.bf16.mxu1 %v6776_v44 }
 0x9a3   : > { %4405 = vmatpush1.bf16.msra.mxu0 %v6777_v50  ;;  %4437 = vmatpush1.bf16.msra.mxu1 %v6778_v4  ;;  %v6786_v50 = vld [vmem:[#allocation46_spill] sm:$0xff] }
 0x9a4   : > { %4407 = vmatprep.subr.bf16.mxu0 %v6779_v15  ;;  %4439 = vmatprep.subr.bf16.mxu1 %v6780_v43 }
 0x9a7   : > { %4409 = vmatpush1.bf16.msra.mxu0 %v6781_v26  ;;  %4441 = vmatpush1.bf16.msra.mxu1 %v6782_v63  ;;  %v2286_v26 = vrot.slane %v6146_v34, 2  ;;  %v2288_v63 = vrot.slane %v6148_v33, 2 }
 0x9a8   : > { %4443 = vmatprep.subr.bf16.mxu0 %v6783_v29  ;;  %4475 = vmatprep.subr.bf16.mxu1 %v6784_v3 }
 0xa5d   : > { %v2209_v24 = vpop.f32.mrb[18].mxu0  ;;  %v2280_v11 = vpop.f32.mrb[18].mxu1 }
 0xa5e   : > { %v2210_v4 = vadd.f32 %v2209_v24, %v6785_v25  ;;  %v2281_v15 = vadd.f32 %v2280_v11, %v6786_v50  ;;  %v2211_v44 = vpop.f32.mrb[19].mxu0  ;;  %v2282_v43 = vpop.f32.mrb[19].mxu1 }
 0xa5f   : > { %v2212_v29 = vadd.f32 %v2211_v44, %v5776_v9  ;;  %v2283_v3 = vadd.f32 %v2282_v43, %v5778_v47 }
 0xa60   : > { %v2293_v60 = vadd.f32 %v2285_v56, %v2210_v4  ;;  %v2295_v37 = vadd.f32 %v2287_v16, %v2281_v15  ;;  %v6790_v56 = vld [vmem:[#allocation34_spill] sm:$0xff]  ;;  %v6791_v16 = vld [vmem:[#allocation35_spill] sm:$0xff] }
 0xa61   : > { %v2294_v17 = vadd.f32 %v2286_v26, %v2212_v29  ;;  %v2296_v20 = vadd.f32 %v2288_v63, %v2283_v3  ;;  %v6789_v3 = vld [vmem:[#allocation33_spill] sm:$0xff] }
 0xa62   : > { %v3658_v7 = vmul.f32 -1.442695, %v2293_v60 }
 0xa63   : > { %v3659_v61 = vmul.f32 -1.442695, %v2294_v17  ;;  %v3660_v24 = vmul.f32 -1.442695, %v2296_v20  ;;  %v6793_v20 = vld [vmem:[#allocation37_spill] sm:$0xff] }
 0xa64   : > { %4943 = vpow2.f32 %v3658_v7 }
 0xa65   : > { %4945 = vpow2.f32 %v3659_v61  ;;  %v6794_v61 = vld [vmem:[#allocation38_spill] sm:$0xff] }
 0xa66   : > { %4947 = vpow2.f32 %v3660_v24  ;;  %v6795_v24 = vld [vmem:[#allocation39_spill] sm:$0xff] }
 0xa67   : > { %4949 = vtanh.f32 %v2295_v37 }
 0xa6e   : > { %v4944_v11 = vpop.eup %4943 }
 0xa6f   : > { %v4946_v50 = vpop.eup %4945  ;;  %v2300_v25 = vadd.f32 1.0, %v4944_v11  ;;  %v6796_v11 = vld [vmem:[#allocation40_spill] sm:$0xff] }
 0xa70   : > { %v2306_v34 = vadd.f32 1.0, %v4946_v50  ;;  %v4948_v33 = vpop.eup %4947 }
 0xa71   : > { %4951 = vrcp.f32 %v2300_v25  ;;  %v4950_v44 = vpop.eup %4949  ;;  %v2313_v26 = vadd.f32 1.0, %v4948_v33  ;;  %v6792_v25 = vld [vmem:[#allocation36_spill] sm:$0xff]  ;;  %v6798_v33 = vld [vmem:[#allocation42_spill] sm:$0xff] }
 0xa72   : > { %4953 = vrcp.f32 %v2306_v34  ;;  %v6797_v34 = vld [vmem:[#allocation41_spill] sm:$0xff] }
 0xa73   : > { %4955 = vrcp.f32 %v2313_v26 }
 0xa7b   : > { %v4952_v43 = vpop.eup %4951 }
 0xa7c   : > { %v4954_v4 = vpop.eup %4953  ;;  %v2317_v15 = vmul.f32 %v4952_v43, %v4950_v44  ;;  %v6799_v44 = vld [vmem:[#allocation43_spill] sm:$0xff]  ;;  %v6800_v43 = vld [vmem:[#allocation44_spill] sm:$0xff] }
 0xa7d   : > { %v2316_v60 = vmul.f32 %v4954_v4, %v6103_v21  ;;  %v4956_v7 = vpop.eup %4955  ;;  %v6787_v21 = vld [vmem:[#allocation31_spill] sm:$0xff] }
 0xa7e   : > { %v6801_v4 = vld [vmem:[#allocation7_spill] sm:$0xff] }
 0xa7f   : > { %v6208_v17 = vadd.f32 %v2317_v15, %v2316_v60  ;;  %v6802_v15 = vld [vmem:[#allocation8_spill] sm:$0xff] }
 0xa81   : > { %4957 = vtanh.f32 %v6208_v17 }
 0xa8b   : > { %v4958_v63 = vpop.eup %4957 }
 0xa8c   : > { %v2320_v29 = vmul.f32 %v4958_v63, %v4956_v7 }
 0xa8e   : > { %2321 = vst [vmem:[#allocation6 + $0x3] sm:$0x2] %v2320_v29  ;;  %v2325_v37 = vrot.slane %v2320_v29, 6 }
 0xa90   : > { %v2327_v50 = vsel %vm421_vm0, %v6161_v57, %v2325_v37  ;;  %v6788_v57 = vld [vmem:[#allocation32_spill] sm:$0xff] }
 0xa91   : > { %2393 = vmatmul.mubr.f32.vlgmr.msra.gmra.mrb[20].mxu0 %v2327_v50  ;;  %2464 = vmatmul.mubr.f32.vlgmr.msra.gmra.mrb[20].mxu1 %v2327_v50 }
 0xa92   : > { %4445 = vmatpush1.bf16.msra.mxu0 %v5436_v5  ;;  %4477 = vmatpush1.bf16.msra.mxu1 %v5445_v12 }
 0xa93   : > { %4447 = vmatprep.subr.bf16.mxu0 %v5459_v22  ;;  %4479 = vmatprep.subr.bf16.mxu1 %v5470_v30 }
 0xa94   : > { %2588 = vmatprep.mubr.f32.mxu0 %v6661_v6  ;;  %2659 = vmatprep.mubr.f32.mxu1 %v6661_v6 }
 0xa96   : > { %4449 = vmatpush1.bf16.msra.mxu0 %v5472_v31  ;;  %4481 = vmatpush1.bf16.msra.mxu1 %v5484_v42 }
 0xa97   : > { %4451 = vmatprep.subr.bf16.mxu0 %v5497_v49  ;;  %4483 = vmatprep.subr.bf16.mxu1 %v5499_v51 }
 0xa9a   : > { %4453 = vmatpush1.bf16.msra.mxu0 %v5511_v59  ;;  %4485 = vmatpush1.bf16.msra.mxu1 %v6664_v8 }
 0xa9b   : > { %4455 = vmatprep.subr.bf16.mxu0 %v6694_v48  ;;  %4487 = vmatprep.subr.bf16.mxu1 %v6695_v39 }
 0xa9e   : > { %4457 = vmatpush1.bf16.msra.mxu0 %v6725_v38  ;;  %4489 = vmatpush1.bf16.msra.mxu1 %v6726_v62 }
 0xa9f   : > { %4459 = vmatprep.subr.bf16.mxu0 %v6756_v35  ;;  %4491 = vmatprep.subr.bf16.mxu1 %v6757_v46 }
 0xaa2   : > { %4461 = vmatpush1.bf16.msra.mxu0 %v6787_v21  ;;  %4493 = vmatpush1.bf16.msra.mxu1 %v6788_v57 }
 0xaa3   : > { %4463 = vmatprep.subr.bf16.mxu0 %v6789_v3  ;;  %4495 = vmatprep.subr.bf16.mxu1 %v6790_v56 }
 0xaa6   : > { %4465 = vmatpush1.bf16.msra.mxu0 %v6791_v16  ;;  %4497 = vmatpush1.bf16.msra.mxu1 %v6792_v25 }
 0xaa7   : > { %4467 = vmatprep.subr.bf16.mxu0 %v6793_v20  ;;  %4499 = vmatprep.subr.bf16.mxu1 %v6794_v61 }
 0xaaa   : > { %4469 = vmatpush1.bf16.msra.mxu0 %v6795_v24  ;;  %4501 = vmatpush1.bf16.msra.mxu1 %v6796_v11 }
 0xaab   : > { %4471 = vmatprep.subr.bf16.mxu0 %v6797_v34  ;;  %4503 = vmatprep.subr.bf16.mxu1 %v6798_v33 }
 0xaae   : > { %4473 = vmatpush1.bf16.msra.mxu0 %v6799_v44  ;;  %4505 = vmatpush1.bf16.msra.mxu1 %v6800_v43  ;;  %v3661_v43 = vld [vmem:[%s5119_s8 + $0x28] sm:$0xff] }
 0xaaf   : > { %4507 = vmatprep.subr.bf16.mxu0 %v6801_v4  ;;  %4539 = vmatprep.subr.bf16.mxu1 %v6802_v15 }
 0xb64   : > { %v6247_v26 = vpop.f32.mrb[20].mxu0  ;;  %v6249_v60 = vpop.f32.mrb[20].mxu1 }
 0xb65   : > { %v6251_v7 = vpop.f32.mrb[21].mxu0  ;;  %v6253_v63 = vpop.f32.mrb[21].mxu1 }
 0xb66   : > { %v2474_v29 = vcombine.low %v6247_v26, %v6251_v7  ;;  %v2475_v37 = vcombine.low %v6249_v60, %v6253_v63 }
 0xb68   : > { %v2482_v50 = vrot.slane %v2474_v29, %v5709_v55  ;;  %v2489_v4 = vrot.slane %v2475_v37, %v5709_v55 }
 0xb6a   : > { %v2490_v15 = vcombine.low %v2482_v50, %v2489_v4  ;;  %v6809_v50 = vld [vmem:[#allocation17_spill] sm:$0xff] }
 0xb6c   : > { %v2492_v44 = vadd.f32 %v3661_v43, %v2490_v15 }
 0xb6e   : > { %v3662_v33 = vmul.f32 -1.442695, %v2492_v44  ;;  %v2500_v34 = vrot.slane %v2492_v44, 2  ;;  %v2511_v24 = vrot.slane %v2492_v44, 6  ;;  %v2508_v25 = vrot.slane %v2492_v44, 4  ;;  %v6808_v44 = vld [vmem:[#allocation16_spill] sm:$0xff] }
 0xb70   : > { %4959 = vpow2.f32 %v3662_v33  ;;  %v3663_v11 = vmul.f32 -1.442695, %v2500_v34  ;;  %v3664_v61 = vmul.f32 -1.442695, %v2511_v24 }
 0xb72   : > { %4961 = vpow2.f32 %v3663_v11 }
 0xb73   : > { %4963 = vpow2.f32 %v3664_v61 }
 0xb7a   : > { %v4960_v20 = vpop.eup %4959 }
 0xb7b   : > { %v2496_v16 = vadd.f32 1.0, %v4960_v20 }
 0xb7c   : > { %v4962_v56 = vpop.eup %4961 }
 0xb7d   : > { %4965 = vrcp.f32 %v2496_v16  ;;  %v2505_v3 = vadd.f32 1.0, %v4962_v56  ;;  %v4964_v29 = vpop.eup %4963  ;;  %v6805_v56 = vld [vmem:[#allocation13_spill] sm:$0xff]  ;;  %v6806_v16 = vld [vmem:[#allocation14_spill] sm:$0xff] }
 0xb7e   : > { %4967 = vtanh.f32 %v2508_v25  ;;  %v2516_v15 = vadd.f32 1.0, %v4964_v29  ;;  %v6807_v25 = vld [vmem:[#allocation15_spill] sm:$0xff]  ;;  %v6810_v29 = vld [vmem:[#allocation18_spill] sm:$0xff] }
 0xb7f   : > { %4969 = vrcp.f32 %v2505_v3  ;;  %v6804_v3 = vld [vmem:[#allocation12_spill] sm:$0xff] }
 0xb80   : > { %4971 = vrcp.f32 %v2516_v15  ;;  %v6814_v15 = vld [vmem:[#allocation22_spill] sm:$0xff] }
 0xb87   : > { %v4966_v37 = vpop.eup %4965 }
 0xb88   : > { %v4968_v4 = vpop.eup %4967 }
 0xb89   : > { %v4970_v43 = vpop.eup %4969  ;;  %v2520_v34 = vmul.f32 %v4968_v4, %v4966_v37  ;;  %v6811_v37 = vld [vmem:[#allocation19_spill] sm:$0xff]  ;;  %v6812_v4 = vld [vmem:[#allocation20_spill] sm:$0xff] }
 0xb8a   : > { %v2519_v33 = vmul.f32 %v4970_v43, %v6158_v13  ;;  %v4972_v20 = vpop.eup %4971  ;;  %v6803_v13 = vld [vmem:[#allocation11_spill] sm:$0xff]  ;;  %v6813_v43 = vld [vmem:[#allocation21_spill] sm:$0xff] }
 0xb8c   : > { %v6263_v11 = vadd.f32 %v2520_v34, %v2519_v33  ;;  %v6815_v33 = vld [vmem:[#allocation23_spill] sm:$0xff] }
 0xb8e   : > { %4973 = vtanh.f32 %v6263_v11 }
 0xb98   : > { %v4974_v24 = vpop.eup %4973 }
 0xb99   : > { %v6266_v61 = vmul.f32 %v4974_v24, %v4972_v20  ;;  %v2666_v24 = vrot.slane %v6247_v26, 2 }
 0xb9b   : > { %2589 = vmatmul.mubr.f32.vlgmr.msra.gmra.mrb[22].mxu0 %v6266_v61  ;;  %2660 = vmatmul.mubr.f32.vlgmr.msra.gmra.mrb[22].mxu1 %v6266_v61 }
 0xb9c   : > { %4509 = vmatpush1.bf16.msra.mxu0 %v5145_v10  ;;  %4541 = vmatpush1.bf16.msra.mxu1 %v5157_v14 }
 0xb9d   : > { %4511 = vmatprep.subr.bf16.mxu0 %v5170_v18  ;;  %4543 = vmatprep.subr.bf16.mxu1 %v5172_v19 }
 0xb9e   : > { %2773 = vmatprep.mubr.f32.mxu0 %v6661_v6  ;;  %2844 = vmatprep.mubr.f32.mxu1 %v6661_v6 }
 0xba0   : > { %4513 = vmatpush1.bf16.msra.mxu0 %v5184_v23  ;;  %4545 = vmatpush1.bf16.msra.mxu1 %v5197_v27 }
 0xba1   : > { %4515 = vmatprep.subr.bf16.mxu0 %v5199_v28  ;;  %4547 = vmatprep.subr.bf16.mxu1 %v5210_v32 }
 0xba4   : > { %4517 = vmatpush1.bf16.msra.mxu0 %v5222_v36  ;;  %4549 = vmatpush1.bf16.msra.mxu1 %v5235_v40 }
 0xba5   : > { %4519 = vmatprep.subr.bf16.mxu0 %v5237_v41  ;;  %4551 = vmatprep.subr.bf16.mxu1 %v5249_v45 }
 0xba8   : > { %4521 = vmatpush1.bf16.msra.mxu0 %v5270_v52  ;;  %4553 = vmatpush1.bf16.msra.mxu1 %v5274_v53 }
 0xba9   : > { %4523 = vmatprep.subr.bf16.mxu0 %v5276_v54  ;;  %4555 = vmatprep.subr.bf16.mxu1 %v5288_v58 }
 0xbac   : > { %4525 = vmatpush1.bf16.msra.mxu0 %v5306_v0  ;;  %4557 = vmatpush1.bf16.msra.mxu1 %v5310_v1 }
 0xbad   : > { %4527 = vmatprep.subr.bf16.mxu0 %v5312_v2  ;;  %4559 = vmatprep.subr.bf16.mxu1 %v6803_v13 }
 0xbb0   : > { %4529 = vmatpush1.bf16.msra.mxu0 %v6804_v3  ;;  %4561 = vmatpush1.bf16.msra.mxu1 %v6805_v56 }
 0xbb1   : > { %4531 = vmatprep.subr.bf16.mxu0 %v6806_v16  ;;  %4563 = vmatprep.subr.bf16.mxu1 %v6807_v25  ;;  %v6816_v25 = vld [vmem:[#allocation45_spill] sm:$0xff]  ;;  %v6817_v16 = vld [vmem:[#allocation46_spill] sm:$0xff] }
 0xbb4   : > { %4533 = vmatpush1.bf16.msra.mxu0 %v6808_v44  ;;  %4565 = vmatpush1.bf16.msra.mxu1 %v6809_v50  ;;  %v2668_v44 = vrot.slane %v6249_v60, 2 }
 0xbb5   : > { %4535 = vmatprep.subr.bf16.mxu0 %v6810_v29  ;;  %4567 = vmatprep.subr.bf16.mxu1 %v6811_v37 }
 0xbb8   : > { %4537 = vmatpush1.bf16.msra.mxu0 %v6812_v4  ;;  %4569 = vmatpush1.bf16.msra.mxu1 %v6813_v43  ;;  %v2667_v4 = vrot.slane %v6251_v7, 2  ;;  %v2669_v43 = vrot.slane %v6253_v63, 2 }
 0xbb9   : > { %4571 = vmatprep.subr.bf16.mxu0 %v6814_v15  ;;  %4603 = vmatprep.subr.bf16.mxu1 %v6815_v33 }
 0xc6e   : > { %v2590_v34 = vpop.f32.mrb[22].mxu0  ;;  %v2661_v20 = vpop.f32.mrb[22].mxu1 }
 0xc6f   : > { %v2591_v50 = vadd.f32 %v2590_v34, %v6816_v25  ;;  %v2662_v29 = vadd.f32 %v2661_v20, %v6817_v16  ;;  %v2592_v56 = vpop.f32.mrb[23].mxu0  ;;  %v2663_v37 = vpop.f32.mrb[23].mxu1 }
 0xc70   : > { %v2593_v15 = vadd.f32 %v2592_v56, %v5776_v9  ;;  %v2664_v33 = vadd.f32 %v2663_v37, %v5778_v47 }
 0xc71   : > { %v2674_v3 = vadd.f32 %v2666_v24, %v2591_v50  ;;  %v2676_v13 = vadd.f32 %v2668_v44, %v2662_v29  ;;  %v6823_v24 = vld [vmem:[#allocation38_spill] sm:$0xff] }
 0xc72   : > { %v2675_v2 = vadd.f32 %v2667_v4, %v2593_v15  ;;  %v2677_v26 = vadd.f32 %v2669_v43, %v2664_v33  ;;  %v6821_v15 = vld [vmem:[#allocation36_spill] sm:$0xff]  ;;  %v6822_v33 = vld [vmem:[#allocation37_spill] sm:$0xff] }
 0xc73   : > { %v3665_v1 = vmul.f32 -1.442695, %v2674_v3 }
 0xc74   : > { %v3666_v60 = vmul.f32 -1.442695, %v2675_v2  ;;  %v3667_v34 = vmul.f32 -1.442695, %v2677_v26  ;;  %v6824_v26 = vld [vmem:[#allocation39_spill] sm:$0xff] }
 0xc75   : > { %4975 = vpow2.f32 %v3665_v1 }
 0xc76   : > { %4977 = vpow2.f32 %v3666_v60  ;;  %v6825_v60 = vld [vmem:[#allocation40_spill] sm:$0xff] }
 0xc77   : > { %4979 = vpow2.f32 %v3667_v34  ;;  %v6826_v34 = vld [vmem:[#allocation41_spill] sm:$0xff] }
 0xc78   : > { %4981 = vtanh.f32 %v2676_v13 }
 0xc7f   : > { %v4976_v20 = vpop.eup %4975 }
 0xc80   : > { %v4978_v16 = vpop.eup %4977  ;;  %v2681_v25 = vadd.f32 1.0, %v4976_v20  ;;  %v6827_v20 = vld [vmem:[#allocation42_spill] sm:$0xff] }
 0xc81   : > { %v2687_v7 = vadd.f32 1.0, %v4978_v16  ;;  %v4980_v63 = vpop.eup %4979 }
 0xc82   : > { %4983 = vrcp.f32 %v2681_v25  ;;  %v4982_v56 = vpop.eup %4981  ;;  %v2694_v29 = vadd.f32 1.0, %v4980_v63  ;;  %v6820_v25 = vld [vmem:[#allocation35_spill] sm:$0xff]  ;;  %v6829_v63 = vld [vmem:[#allocation44_spill] sm:$0xff] }
 0xc83   : > { %4985 = vrcp.f32 %v2687_v7  ;;  %v6828_v7 = vld [vmem:[#allocation43_spill] sm:$0xff] }
 0xc84   : > { %4987 = vrcp.f32 %v2694_v29 }
 0xc8c   : > { %v4984_v37 = vpop.eup %4983 }
 0xc8d   : > { %v4986_v50 = vpop.eup %4985  ;;  %v2698_v44 = vmul.f32 %v4984_v37, %v4982_v56  ;;  %v6830_v56 = vld [vmem:[#allocation7_spill] sm:$0xff]  ;;  %v6831_v37 = vld [vmem:[#allocation8_spill] sm:$0xff] }
 0xc8e   : > { %v2697_v3 = vmul.f32 %v4986_v50, %v6208_v17  ;;  %v4988_v1 = vpop.eup %4987  ;;  %v6818_v17 = vld [vmem:[#allocation33_spill] sm:$0xff] }
 0xc90   : > { %v6313_v2 = vadd.f32 %v2698_v44, %v2697_v3 }
 0xc92   : > { %4989 = vtanh.f32 %v6313_v2 }
 0xc9c   : > { %v4990_v4 = vpop.eup %4989 }
 0xc9d   : > { %v2701_v43 = vmul.f32 %v4990_v4, %v4988_v1 }
 0xc9f   : > { %2702 = vst [vmem:[#allocation6 + $0x4] sm:$0x2] %v2701_v43  ;;  %v2706_v13 = vrot.slane %v2701_v43, 6 }
 0xca1   : > { %v2708_v16 = vsel %vm421_vm0, %v6266_v61, %v2706_v13  ;;  %v6819_v61 = vld [vmem:[#allocation34_spill] sm:$0xff] }
 0xca2   : > { %2774 = vmatmul.mubr.f32.vlgmr.msra.gmra.mrb[24].mxu0 %v2708_v16  ;;  %2845 = vmatmul.mubr.f32.vlgmr.msra.gmra.mrb[24].mxu1 %v2708_v16  ;;  %v3668_v16 = vld [vmem:[%s5119_s8 + $0x30] sm:$0xff] }
 0xca3   : > { %4573 = vmatpush1.bf16.msra.mxu0 %v5436_v5  ;;  %4605 = vmatpush1.bf16.msra.mxu1 %v5445_v12 }
 0xca4   : > { %4575 = vmatprep.subr.bf16.mxu0 %v5459_v22  ;;  %4607 = vmatprep.subr.bf16.mxu1 %v5470_v30 }
 0xca5   : > { %2969 = vmatprep.mubr.f32.mxu0 %v6661_v6  ;;  %3040 = vmatprep.mubr.f32.mxu1 %v6661_v6 }
 0xca7   : > { %4577 = vmatpush1.bf16.msra.mxu0 %v5472_v31  ;;  %4609 = vmatpush1.bf16.msra.mxu1 %v5484_v42 }
 0xca8   : > { %4579 = vmatprep.subr.bf16.mxu0 %v5497_v49  ;;  %4611 = vmatprep.subr.bf16.mxu1 %v5499_v51 }
 0xcab   : > { %4581 = vmatpush1.bf16.msra.mxu0 %v5511_v59  ;;  %4613 = vmatpush1.bf16.msra.mxu1 %v6664_v8 }
 0xcac   : > { %4583 = vmatprep.subr.bf16.mxu0 %v6694_v48  ;;  %4615 = vmatprep.subr.bf16.mxu1 %v6695_v39 }
 0xcaf   : > { %4585 = vmatpush1.bf16.msra.mxu0 %v6725_v38  ;;  %4617 = vmatpush1.bf16.msra.mxu1 %v6726_v62 }
 0xcb0   : > { %4587 = vmatprep.subr.bf16.mxu0 %v6756_v35  ;;  %4619 = vmatprep.subr.bf16.mxu1 %v6757_v46 }
 0xcb3   : > { %4589 = vmatpush1.bf16.msra.mxu0 %v6787_v21  ;;  %4621 = vmatpush1.bf16.msra.mxu1 %v6788_v57 }
 0xcb4   : > { %4591 = vmatprep.subr.bf16.mxu0 %v6818_v17  ;;  %4623 = vmatprep.subr.bf16.mxu1 %v6819_v61 }
 0xcb7   : > { %4593 = vmatpush1.bf16.msra.mxu0 %v6820_v25  ;;  %4625 = vmatpush1.bf16.msra.mxu1 %v6821_v15 }
 0xcb8   : > { %4595 = vmatprep.subr.bf16.mxu0 %v6822_v33  ;;  %4627 = vmatprep.subr.bf16.mxu1 %v6823_v24 }
 0xcbb   : > { %4597 = vmatpush1.bf16.msra.mxu0 %v6824_v26  ;;  %4629 = vmatpush1.bf16.msra.mxu1 %v6825_v60 }
 0xcbc   : > { %4599 = vmatprep.subr.bf16.mxu0 %v6826_v34  ;;  %4631 = vmatprep.subr.bf16.mxu1 %v6827_v20 }
 0xcbf   : > { %4601 = vmatpush1.bf16.msra.mxu0 %v6828_v7  ;;  %4633 = vmatpush1.bf16.msra.mxu1 %v6829_v63 }
 0xcc0   : > { %4635 = vmatprep.subr.bf16.mxu0 %v6830_v56  ;;  %4667 = vmatprep.subr.bf16.mxu1 %v6831_v37 }
 0xd75   : > { %v6352_v50 = vpop.f32.mrb[24].mxu0  ;;  %v6354_v44 = vpop.f32.mrb[24].mxu1 }
 0xd76   : > { %v6356_v29 = vpop.f32.mrb[25].mxu0  ;;  %v6358_v3 = vpop.f32.mrb[25].mxu1 }
 0xd77   : > { %v2855_v1 = vcombine.low %v6352_v50, %v6356_v29  ;;  %v2856_v4 = vcombine.low %v6354_v44, %v6358_v3 }
 0xd79   : > { %v2863_v43 = vrot.slane %v2855_v1, %v5709_v55  ;;  %v2870_v13 = vrot.slane %v2856_v4, %v5709_v55 }
 0xd7b   : > { %v2871_v56 = vcombine.low %v2863_v43, %v2870_v13 }
 0xd7d   : > { %v2873_v37 = vadd.f32 %v3668_v16, %v2871_v56 }
 0xd7f   : > { %v3669_v63 = vmul.f32 -1.442695, %v2873_v37  ;;  %v2881_v7 = vrot.slane %v2873_v37, 2  ;;  %v2892_v34 = vrot.slane %v2873_v37, 6  ;;  %v2889_v24 = vrot.slane %v2873_v37, 4 }
 0xd81   : > { %4991 = vpow2.f32 %v3669_v63  ;;  %v3670_v20 = vmul.f32 -1.442695, %v2881_v7  ;;  %v3671_v60 = vmul.f32 -1.442695, %v2892_v34 }
 0xd83   : > { %4993 = vpow2.f32 %v3670_v20 }
 0xd84   : > { %4995 = vpow2.f32 %v3671_v60 }
 0xd8b   : > { %v4992_v26 = vpop.eup %4991 }
 0xd8c   : > { %v2877_v33 = vadd.f32 1.0, %v4992_v26 }
 0xd8d   : > { %v4994_v15 = vpop.eup %4993 }
 0xd8e   : > { %4997 = vrcp.f32 %v2877_v33  ;;  %v2886_v25 = vadd.f32 1.0, %v4994_v15  ;;  %v4996_v1 = vpop.eup %4995  ;;  %v6847_v15 = vld [vmem:[#allocation45_spill] sm:$0xff] }
 0xd8f   : > { %4999 = vtanh.f32 %v2889_v24  ;;  %v2897_v16 = vadd.f32 1.0, %v4996_v1  ;;  %v6848_v24 = vld [vmem:[#allocation46_spill] sm:$0xff] }
 0xd90   : > { %5001 = vrcp.f32 %v2886_v25  ;;  %v3049_v25 = vrot.slane %v6354_v44, 2 }
 0xd91   : > { %5003 = vrcp.f32 %v2897_v16 }
 0xd98   : > { %v4998_v4 = vpop.eup %4997 }
 0xd99   : > { %v5000_v43 = vpop.eup %4999 }
 0xd9a   : > { %v5002_v13 = vpop.eup %5001  ;;  %v2901_v7 = vmul.f32 %v5000_v43, %v4998_v4  ;;  %v3048_v4 = vrot.slane %v6356_v29, 2  ;;  %v3050_v43 = vrot.slane %v6358_v3, 2 }
 0xd9b   : > { %v2900_v63 = vmul.f32 %v5002_v13, %v6263_v11  ;;  %v5004_v26 = vpop.eup %5003  ;;  %v3047_v11 = vrot.slane %v6352_v50, 2 }
 0xd9d   : > { %v6368_v20 = vadd.f32 %v2901_v7, %v2900_v63 }
 0xd9f   : > { %5005 = vtanh.f32 %v6368_v20 }
 0xda9   : > { %v5006_v34 = vpop.eup %5005 }
 0xdaa   : > { %v6371_v60 = vmul.f32 %v5006_v34, %v5004_v26 }
 0xdac   : > { %2970 = vmatmul.mubr.f32.vlgmr.msra.gmra.mrb[26].mxu0 %v6371_v60  ;;  %3041 = vmatmul.mubr.f32.vlgmr.msra.gmra.mrb[26].mxu1 %v6371_v60 }
 0xdad   : > { %4637 = vmatpush1.bf16.msra.mxu0 %v5145_v10  ;;  %4669 = vmatpush1.bf16.msra.mxu1 %v5157_v14  ;;  %v6832_v10 = vld [vmem:[#allocation9_spill] sm:$0xff]  ;;  %v6833_v14 = vld [vmem:[#allocation10_spill] sm:$0xff] }
 0xdae   : > { %4639 = vmatprep.subr.bf16.mxu0 %v5170_v18  ;;  %4671 = vmatprep.subr.bf16.mxu1 %v5172_v19  ;;  %v6834_v18 = vld [vmem:[#allocation11_spill] sm:$0xff]  ;;  %v6835_v19 = vld [vmem:[#allocation12_spill] sm:$0xff] }
 0xdaf   : > { %3154 = vmatprep.mubr.f32.mxu0 %v6661_v6  ;;  %3225 = vmatprep.mubr.f32.mxu1 %v6661_v6 }
 0xdb1   : > { %4641 = vmatpush1.bf16.msra.mxu0 %v5184_v23  ;;  %4673 = vmatpush1.bf16.msra.mxu1 %v5197_v27  ;;  %v6836_v23 = vld [vmem:[#allocation13_spill] sm:$0xff]  ;;  %v6837_v27 = vld [vmem:[#allocation14_spill] sm:$0xff] }
 0xdb2   : > { %4643 = vmatprep.subr.bf16.mxu0 %v5199_v28  ;;  %4675 = vmatprep.subr.bf16.mxu1 %v5210_v32  ;;  %v6838_v28 = vld [vmem:[#allocation15_spill] sm:$0xff]  ;;  %v6839_v32 = vld [vmem:[#allocation16_spill] sm:$0xff] }
 0xdb5   : > { %4645 = vmatpush1.bf16.msra.mxu0 %v5222_v36  ;;  %4677 = vmatpush1.bf16.msra.mxu1 %v5235_v40  ;;  %v6840_v36 = vld [vmem:[#allocation17_spill] sm:$0xff]  ;;  %v6841_v40 = vld [vmem:[#allocation18_spill] sm:$0xff] }
 0xdb6   : > { %4647 = vmatprep.subr.bf16.mxu0 %v5237_v41  ;;  %4679 = vmatprep.subr.bf16.mxu1 %v5249_v45  ;;  %v6842_v41 = vld [vmem:[#allocation19_spill] sm:$0xff]  ;;  %v6843_v45 = vld [vmem:[#allocation20_spill] sm:$0xff] }
 0xdb9   : > { %4649 = vmatpush1.bf16.msra.mxu0 %v5270_v52  ;;  %4681 = vmatpush1.bf16.msra.mxu1 %v5274_v53  ;;  %v6844_v52 = vld [vmem:[#allocation21_spill] sm:$0xff]  ;;  %v6845_v53 = vld [vmem:[#allocation22_spill] sm:$0xff] }
 0xdba   : > { %4651 = vmatprep.subr.bf16.mxu0 %v5276_v54  ;;  %4683 = vmatprep.subr.bf16.mxu1 %v5288_v58  ;;  %v6846_v54 = vld [vmem:[#allocation23_spill] sm:$0xff] }
 0xdbd   : > { %4653 = vmatpush1.bf16.msra.mxu0 %v5306_v0  ;;  %4685 = vmatpush1.bf16.msra.mxu1 %v6832_v10 }
 0xdbe   : > { %4655 = vmatprep.subr.bf16.mxu0 %v6833_v14  ;;  %4687 = vmatprep.subr.bf16.mxu1 %v6834_v18 }
 0xdc1   : > { %4657 = vmatpush1.bf16.msra.mxu0 %v6835_v19  ;;  %4689 = vmatpush1.bf16.msra.mxu1 %v6836_v23 }
 0xdc2   : > { %4659 = vmatprep.subr.bf16.mxu0 %v6837_v27  ;;  %4691 = vmatprep.subr.bf16.mxu1 %v6838_v28 }
 0xdc5   : > { %4661 = vmatpush1.bf16.msra.mxu0 %v6839_v32  ;;  %4693 = vmatpush1.bf16.msra.mxu1 %v6840_v36 }
 0xdc6   : > { %4663 = vmatprep.subr.bf16.mxu0 %v6841_v40  ;;  %4695 = vmatprep.subr.bf16.mxu1 %v6842_v41 }
 0xdc9   : > { %4665 = vmatpush1.bf16.msra.mxu0 %v6843_v45  ;;  %4697 = vmatpush1.bf16.msra.mxu1 %v6844_v52 }
 0xdca   : > { %4699 = vmatprep.subr.bf16.mxu0 %v6845_v53  ;;  %4731 = vmatprep.subr.bf16.mxu1 %v6846_v54 }
 0xe7f   : > { %v2971_v58 = vpop.f32.mrb[26].mxu0  ;;  %v3042_v0 = vpop.f32.mrb[26].mxu1 }
 0xe80   : > { %v2972_v33 = vadd.f32 %v2971_v58, %v6847_v15  ;;  %v3043_v56 = vadd.f32 %v3042_v0, %v6848_v24  ;;  %v2973_v37 = vpop.f32.mrb[27].mxu0  ;;  %v3044_v1 = vpop.f32.mrb[27].mxu1 }
 0xe81   : > { %v2974_v13 = vadd.f32 %v2973_v37, %v5776_v9  ;;  %v3045_v16 = vadd.f32 %v3044_v1, %v5778_v47 }
 0xe82   : > { %v3055_v63 = vadd.f32 %v3047_v11, %v2972_v33  ;;  %v3057_v7 = vadd.f32 %v3049_v25, %v3043_v56 }
 0xe83   : > { %v3056_v26 = vadd.f32 %v3048_v4, %v2974_v13  ;;  %v3058_v50 = vadd.f32 %v3050_v43, %v3045_v16 }
 0xe84   : > { %v3672_v34 = vmul.f32 -1.442695, %v3055_v63 }
 0xe85   : > { %v3673_v44 = vmul.f32 -1.442695, %v3056_v26  ;;  %v3674_v10 = vmul.f32 -1.442695, %v3058_v50 }
 0xe86   : > { %5007 = vpow2.f32 %v3672_v34 }
 0xe87   : > { %5009 = vpow2.f32 %v3673_v44 }
 0xe88   : > { %5011 = vpow2.f32 %v3674_v10 }
 0xe89   : > { %5013 = vtanh.f32 %v3057_v7 }
 0xe90   : > { %v5008_v14 = vpop.eup %5007 }
 0xe91   : > { %v5010_v18 = vpop.eup %5009  ;;  %v3062_v19 = vadd.f32 1.0, %v5008_v14 }
 0xe92   : > { %v3068_v29 = vadd.f32 1.0, %v5010_v18  ;;  %v5012_v3 = vpop.eup %5011  ;;  %v3470_v18 = vld [vmem:[%s6540_s4] sm:$0xff] }
 0xe93   : > { %5015 = vrcp.f32 %v3062_v19  ;;  %v5014_v23 = vpop.eup %5013  ;;  %v3075_v36 = vadd.f32 1.0, %v5012_v3  ;;  %v3471_v19 = vld [vmem:[%s6540_s4 + $0x8] sm:$0xff]  ;;  %v3472_v3 = vld [vmem:[%s6540_s4 + $0x10] sm:$0xff] }
 0xe94   : > { %5017 = vrcp.f32 %v3068_v29  ;;  %v5066_v29 = vmov 0.0|0.0  }
 0xe95   : > { %5019 = vrcp.f32 %v3075_v36 }
 0xe9d   : > { %v5016_v27 = vpop.eup %5015 }
 0xe9e   : > { %v5018_v28 = vpop.eup %5017  ;;  %v3079_v32 = vmul.f32 %v5016_v27, %v5014_v23  ;;  %v3473_v23 = vld [vmem:[%s6540_s4 + $0x18] sm:$0xff] }
 0xe9f   : > { %v3078_v40 = vmul.f32 %v5018_v28, %v6313_v2  ;;  %v5020_v45 = vpop.eup %5019  ;;  %v3675_v2 = vld [vmem:[%s5119_s8 + $0x38] sm:$0xff]  ;;  %v4766_v27 = vpack.c.bf16 %v3473_v23, %v3472_v3  ;;  %v3474_v28 = vld [vmem:[%s6540_s4 + $0x20] sm:$0xff] }
 0xea1   : > { %v6418_v41 = vadd.f32 %v3079_v32, %v3078_v40  ;;  %v3475_v32 = vld [vmem:[%s6540_s4 + $0x28] sm:$0xff]  ;;  %v3476_v40 = vld [vmem:[%s6540_s4 + $0x30] sm:$0xff] }
 0xea2   : > { %v4769_v36 = vpack.c.bf16 %v3475_v32, %v3474_v28 }
 0xea3   : > { %5021 = vtanh.f32 %v6418_v41 }
 0xead   : > { %v5022_v52 = vpop.eup %5021 }
 0xeae   : > { %v3082_v53 = vmul.f32 %v5022_v52, %v5020_v45  ;;  %v3477_v45 = vld [vmem:[%s6540_s4 + $0x38] sm:$0xff] }
 0xeaf   : > { %v4772_v52 = vpack.c.bf16 %v3477_v45, %v3476_v40 }
 0xeb0   : > { %3083 = vst [vmem:[#allocation6 + $0x5] sm:$0x2] %v3082_v53  ;;  %v3087_v54 = vrot.slane %v3082_v53, 6  ;;  %v3478_v53 = vld [vmem:[%s6540_s4 + $0x40] sm:$0xff] }
 0xeb2   : > { %v3089_v58 = vsel %vm421_vm0, %v6371_v60, %v3087_v54  ;;  %v3479_v54 = vld [vmem:[%s6540_s4 + $0x48] sm:$0xff] }
 0xeb3   : > { %3155 = vmatmul.mubr.f32.vlgmr.msra.gmra.mrb[28].mxu0 %v3089_v58  ;;  %3226 = vmatmul.mubr.f32.vlgmr.msra.gmra.mrb[28].mxu1 %v3089_v58  ;;  %v4775_v58 = vpack.c.bf16 %v3479_v54, %v3478_v53 }
 0xeb4   : > { %4701 = vmatpush1.bf16.msra.mxu0 %v5436_v5  ;;  %4733 = vmatpush1.bf16.msra.mxu1 %v5445_v12  ;;  %v6849_v5 = vld [vmem:[#allocation35_spill] sm:$0xff]  ;;  %v6850_v12 = vld [vmem:[#allocation36_spill] sm:$0xff] }
 0xeb5   : > { %4703 = vmatprep.subr.bf16.mxu0 %v5459_v22  ;;  %4735 = vmatprep.subr.bf16.mxu1 %v5470_v30  ;;  %v6851_v22 = vld [vmem:[#allocation37_spill] sm:$0xff]  ;;  %v6852_v30 = vld [vmem:[#allocation38_spill] sm:$0xff] }
 0xeb6   : > { %3350 = vmatprep.mubr.f32.mxu0 %v6661_v6  ;;  %3421 = vmatprep.mubr.f32.mxu1 %v6661_v6 }
 0xeb8   : > { %4705 = vmatpush1.bf16.msra.mxu0 %v5472_v31  ;;  %4737 = vmatpush1.bf16.msra.mxu1 %v5484_v42  ;;  %v6853_v31 = vld [vmem:[#allocation39_spill] sm:$0xff]  ;;  %v6854_v42 = vld [vmem:[#allocation40_spill] sm:$0xff] }
 0xeb9   : > { %4707 = vmatprep.subr.bf16.mxu0 %v5497_v49  ;;  %4739 = vmatprep.subr.bf16.mxu1 %v5499_v51  ;;  %v6855_v49 = vld [vmem:[#allocation41_spill] sm:$0xff]  ;;  %v6856_v51 = vld [vmem:[#allocation42_spill] sm:$0xff] }
 0xebc   : > { %4709 = vmatpush1.bf16.msra.mxu0 %v5511_v59  ;;  %4741 = vmatpush1.bf16.msra.mxu1 %v6664_v8  ;;  %v6857_v59 = vld [vmem:[#allocation43_spill] sm:$0xff]  ;;  %v6858_v8 = vld [vmem:[#allocation44_spill] sm:$0xff] }
 0xebd   : > { %4711 = vmatprep.subr.bf16.mxu0 %v6694_v48  ;;  %4743 = vmatprep.subr.bf16.mxu1 %v6695_v39 }
 0xec0   : > { %4713 = vmatpush1.bf16.msra.mxu0 %v6725_v38  ;;  %4745 = vmatpush1.bf16.msra.mxu1 %v6726_v62 }
 0xec1   : > { %4715 = vmatprep.subr.bf16.mxu0 %v6756_v35  ;;  %4747 = vmatprep.subr.bf16.mxu1 %v6757_v46 }
 0xec4   : > { %4717 = vmatpush1.bf16.msra.mxu0 %v6787_v21  ;;  %4749 = vmatpush1.bf16.msra.mxu1 %v6788_v57 }
 0xec5   : > { %4719 = vmatprep.subr.bf16.mxu0 %v6818_v17  ;;  %4751 = vmatprep.subr.bf16.mxu1 %v6819_v61 }
 0xec8   : > { %4721 = vmatpush1.bf16.msra.mxu0 %v6849_v5  ;;  %4753 = vmatpush1.bf16.msra.mxu1 %v6850_v12  ;;  %v3480_v5 = vld [vmem:[%s6540_s4 + $0x50] sm:$0xff]  ;;  %v3481_v12 = vld [vmem:[%s6540_s4 + $0x58] sm:$0xff] }
 0xec9   : > { %4723 = vmatprep.subr.bf16.mxu0 %v6851_v22  ;;  %4755 = vmatprep.subr.bf16.mxu1 %v6852_v30  ;;  %v4778_v22 = vpack.c.bf16 %v3481_v12, %v3480_v5  ;;  %v3482_v30 = vld [vmem:[%s6540_s4 + $0x60] sm:$0xff] }
 0xecc   : > { %4725 = vmatpush1.bf16.msra.mxu0 %v6853_v31  ;;  %4757 = vmatpush1.bf16.msra.mxu1 %v6854_v42  ;;  %v3483_v31 = vld [vmem:[%s6540_s4 + $0x68] sm:$0xff] }
 0xecd   : > { %4727 = vmatprep.subr.bf16.mxu0 %v6855_v49  ;;  %4759 = vmatprep.subr.bf16.mxu1 %v6856_v51  ;;  %v4781_v42 = vpack.c.bf16 %v3483_v31, %v3482_v30  ;;  %v3484_v49 = vld [vmem:[%s6540_s4 + $0x70] sm:$0xff]  ;;  %v3485_v51 = vld [vmem:[%s6540_s4 + $0x78] sm:$0xff] }
 0xed0   : > { %4729 = vmatpush1.bf16.msra.mxu0 %v6857_v59  ;;  %4761 = vmatpush1.bf16.msra.mxu1 %v6858_v8  ;;  %v4784_v59 = vpack.c.bf16 %v3485_v51, %v3484_v49 }
 0xed1   : > { %4762 = vmatprep.subr.bf16.mxu0 %v5066_v29 }
 0xf86   : > { %v6455_v48 = vpop.f32.mrb[28].mxu0  ;;  %v6457_v39 = vpop.f32.mrb[28].mxu1 }
 0xf87   : > { %v6459_v38 = vpop.f32.mrb[29].mxu0  ;;  %v6461_v62 = vpop.f32.mrb[29].mxu1 }
 0xf88   : > { %v3236_v35 = vcombine.low %v6455_v48, %v6459_v38  ;;  %v3237_v46 = vcombine.low %v6457_v39, %v6461_v62 }
 0xf8a   : > { %v3244_v21 = vrot.slane %v3236_v35, %v5709_v55  ;;  %v3251_v57 = vrot.slane %v3237_v46, %v5709_v55  ;;  %v3428_v46 = vrot.slane %v6455_v48, 2 }
 0xf8c   : > { %v3252_v17 = vcombine.low %v3244_v21, %v3251_v57  ;;  %v3430_v21 = vrot.slane %v6457_v39, 2 }
 0xf8e   : > { %v3254_v61 = vadd.f32 %v3675_v2, %v3252_v17 }
 0xf90   : > { %v3676_v60 = vmul.f32 -1.442695, %v3254_v61  ;;  %v3262_v0 = vrot.slane %v3254_v61, 2  ;;  %v3273_v25 = vrot.slane %v3254_v61, 6  ;;  %v3270_v37 = vrot.slane %v3254_v61, 4 }
 0xf92   : > { %5023 = vpow2.f32 %v3676_v60  ;;  %v3677_v11 = vmul.f32 -1.442695, %v3262_v0  ;;  %v3678_v33 = vmul.f32 -1.442695, %v3273_v25  ;;  %v3429_v60 = vrot.slane %v6459_v38, 2 }
 0xf94   : > { %5025 = vpow2.f32 %v3677_v11 }
 0xf95   : > { %5027 = vpow2.f32 %v3678_v33 }
 0xf9c   : > { %v5024_v56 = vpop.eup %5023 }
 0xf9d   : > { %v3258_v1 = vadd.f32 1.0, %v5024_v56 }
 0xf9e   : > { %v5026_v4 = vpop.eup %5025 }
 0xf9f   : > { %5029 = vrcp.f32 %v3258_v1  ;;  %v3267_v43 = vadd.f32 1.0, %v5026_v4  ;;  %v5028_v55 = vpop.eup %5027 }
 0xfa0   : > { %5031 = vtanh.f32 %v3270_v37  ;;  %v3278_v7 = vadd.f32 1.0, %v5028_v55 }
 0xfa1   : > { %5033 = vrcp.f32 %v3267_v43 }
 0xfa2   : > { %5035 = vrcp.f32 %v3278_v7 }
 0xfa9   : > { %v5030_v13 = vpop.eup %5029 }
 0xfaa   : > { %v5032_v16 = vpop.eup %5031 }
 0xfab   : > { %v5034_v63 = vpop.eup %5033  ;;  %v3282_v50 = vmul.f32 %v5032_v16, %v5030_v13 }
 0xfac   : > { %v3281_v26 = vmul.f32 %v5034_v63, %v6368_v20  ;;  %v5036_v44 = vpop.eup %5035  ;;  %v4763_v20 = vpack.c.bf16 %v3471_v19, %v3470_v18 }
 0xfae   : > { %v3283_v34 = vadd.f32 %v3282_v50, %v3281_v26 }
 0xfb0   : > { %5037 = vtanh.f32 %v3283_v34  ;;  %3466 = vst [vmem:[#allocation3] sm:$0x3] %v3283_v34 }
 0xfba   : > { %v5038_v10 = vpop.eup %5037 }
 0xfbb   : > { %v3285_v14 = vmul.f32 %v5038_v10, %v5036_v44  ;;  %v3682_v44 = vld [vmem:[%s6541_s5] ss:$0 sm:$0xff] }
 0xfbd   : > { %3351 = vmatmul.mubr.f32.vlgmr.msra.gmra.mrb[30].mxu0 %v3285_v14  ;;  %3465 = vst [vmem:[#allocation2] sm:$0x3] %v3285_v14  ;;  %3422 = vmatmul.mubr.f32.vlgmr.msra.gmra.mrb[30].mxu1 %v3285_v14 }
 0xfbe   : > { %4764 = vmatpush3.bf16.msra.mxu0 %v4763_v20  ;;  %3735 = vmatprep.mubr.msk.f32.mxu0 %vm5067_vm1, %v6661_v6  ;;  %v3431_v6 = vrot.slane %v6461_v62, 2 }
 0xfbf   : > { %4765 = vmatprep.subr.bf16.mxu0 %v5066_v29 }
 0xfc2   : > { %4767 = vmatpush3.bf16.msra.mxu0 %v4766_v27 }
 0xfc3   : > { %4768 = vmatprep.subr.bf16.mxu0 %v5066_v29 }
 0xfc6   : > { %4770 = vmatpush3.bf16.msra.mxu0 %v4769_v36 }
 0xfc7   : > { %4771 = vmatprep.subr.bf16.mxu0 %v5066_v29 }
 0xfca   : > { %4773 = vmatpush3.bf16.msra.mxu0 %v4772_v52 }
 0xfcb   : > { %4774 = vmatprep.subr.bf16.mxu0 %v5066_v29 }
 0xfce   : > { %4776 = vmatpush3.bf16.msra.mxu0 %v4775_v58 }
 0xfcf   : > { %4777 = vmatprep.subr.bf16.mxu0 %v5066_v29 }
 0xfd2   : > { %4779 = vmatpush3.bf16.msra.mxu0 %v4778_v22 }
 0xfd3   : > { %4780 = vmatprep.subr.bf16.mxu0 %v5066_v29 }
 0xfd6   : > { %4782 = vmatpush3.bf16.msra.mxu0 %v4781_v42 }
 0xfd7   : > { %4783 = vmatprep.subr.bf16.mxu0 %v5066_v29 }
 0xfda   : > { %4785 = vmatpush3.bf16.msra.mxu0 %v4784_v59 }
0x1090   : > { %v3352_v8 = vpop.f32.mrb[30].mxu0  ;;  %v3423_v35 = vpop.f32.mrb[30].mxu1 }
0x1091   : > { %v3353_v57 = vadd.f32 %v3352_v8, %v6847_v15  ;;  %v3424_v2 = vadd.f32 %v3423_v35, %v6848_v24  ;;  %v3354_v17 = vpop.f32.mrb[31].mxu0  ;;  %v3425_v61 = vpop.f32.mrb[31].mxu1 }
0x1092   : > { %v3355_v0 = vadd.f32 %v3354_v17, %v5776_v9  ;;  %v3426_v11 = vadd.f32 %v3425_v61, %v5778_v47 }
0x1093   : > { %v3436_v25 = vadd.f32 %v3428_v46, %v3353_v57  ;;  %v3438_v33 = vadd.f32 %v3430_v21, %v3424_v2 }
0x1094   : > { %v3437_v56 = vadd.f32 %v3429_v60, %v3355_v0  ;;  %v3439_v48 = vadd.f32 %v3431_v6, %v3426_v11 }
0x1095   : > { %v3679_v37 = vmul.f32 -1.442695, %v3436_v25 }
0x1096   : > { %v3680_v39 = vmul.f32 -1.442695, %v3437_v56  ;;  %v3681_v15 = vmul.f32 -1.442695, %v3439_v48 }
0x1097   : > { %5039 = vpow2.f32 %v3679_v37 }
0x1098   : > { %5041 = vpow2.f32 %v3680_v39 }
0x1099   : > { %5043 = vpow2.f32 %v3681_v15 }
0x109a   : > { %5045 = vtanh.f32 %v3438_v33 }
0x10a1   : > { %v5040_v24 = vpop.eup %5039 }
0x10a2   : > { %v5042_v1 = vpop.eup %5041  ;;  %v3443_v4 = vadd.f32 1.0, %v5040_v24 }
0x10a3   : > { %v3449_v38 = vadd.f32 1.0, %v5042_v1  ;;  %v5044_v9 = vpop.eup %5043 }
0x10a4   : > { %5047 = vrcp.f32 %v3443_v4  ;;  %v5046_v62 = vpop.eup %5045  ;;  %v3456_v13 = vadd.f32 1.0, %v5044_v9 }
0x10a5   : > { %5049 = vrcp.f32 %v3449_v38 }
0x10a6   : > { %5051 = vrcp.f32 %v3456_v13 }
0x10ae   : > { %v5048_v47 = vpop.eup %5047 }
0x10af   : > { %v5050_v43 = vpop.eup %5049  ;;  %v3460_v55 = vmul.f32 %v5048_v47, %v5046_v62 }
0x10b0   : > { %v3459_v16 = vmul.f32 %v5050_v43, %v6418_v41  ;;  %v5052_v7 = vpop.eup %5051 }
0x10b2   : > { %v3461_v63 = vadd.f32 %v3460_v55, %v3459_v16 }
0x10b4   : > { %5053 = vtanh.f32 %v3461_v63  ;;  %3468 = vst [vmem:[#allocation5] sm:$0x3] %v3461_v63 }
0x10be   : > { %v5054_v26 = vpop.eup %5053 }
0x10bf   : > { %v3463_v50 = vmul.f32 %v5054_v26, %v5052_v7 }
0x10c1   : > { %3464 = vst [vmem:[#allocation6 + $0x6] sm:$0x2] %v3463_v50  ;;  %3467 = vst [vmem:[#allocation4] sm:$0x3] %v3463_v50 }
0x10c8   : > { %v3469_v34 = vld [vmem:[#allocation6] sm:$0xff] }
0x10c9   : > { %3736 = vmatmul.mubr.f32.vlgmr.msra.gmra.mrb[32].mxu0 %v3469_v34 }
0x119c   : > { %v3559_v10 = vpop.f32.mrb[32].mxu0 }
0x119d   : > { %v3560_v14 = vadd.f32 %v3682_v44, %v3559_v10  ;;  %v3737_v18 = vpop.f32.mrb[33].mxu0 }
0x119f   : > { %3563 = vst [vmem:[%s5114_s29] sm:$0xff] %v3560_v14 }
0x11a0 PF: > { %s16_s21 = sadd.s32 1, %s5061_s21  }
0x11a1   : > { %p13_p6 = scmp.ge.s32.totalorder %s16_s21, 4  }
0x11a3   :  { %15 = sbr.rel (!%p13_p6) target bundleno = 1 (0x1), region = 85 }

</bundles_post_ra>
